<compile_context>
chip_gen: v7x
topology: tpu7x:2x2x1
jax: 0.10.0
libtpu: 0.0.40
codegen_flags: <defaults>
</compile_context>

<pallas_src>
import functools

import jax
import jax.numpy as jnp
from jax.experimental import pallas as pl
from jax.experimental.pallas import tpu as pltpu


def _residual_block_kernel(x_ref, B1_ref, b1_ref, B2_ref, b2_ref, o_ref,
                           xpad_ref, *, H, W, C, res_scale):
    """One batch element per grid step.

    x_ref   : (1, H, W*C)          f32   input (also the identity branch)
    B*_ref  : (3, (W+2)*C, W*C)    bf16  banded per-kh weight matrices
    b*_ref  : (1, W*C)             f32   biases tiled across W
    o_ref   : (1, H, W*C)          f32   output
    xpad_ref: (H+2, (W+2)*C)       f32   padded activation scratch (reused)
    """
    Wp = W + 2

    x2d = x_ref[0]                                         # (H, W*C) f32

    # ---- zero only the 1-pixel halo ring of the padded scratch ------------
    zrow = jnp.zeros((1, Wp * C), jnp.float32)
    zcol = jnp.zeros((H + 2, C), jnp.float32)
    xpad_ref[0:1, :] = zrow
    xpad_ref[H + 1:H + 2, :] = zrow
    xpad_ref[:, 0:C] = zcol
    xpad_ref[:, (W + 1) * C:(W + 2) * C] = zcol

    def conv3x3(B_ref, b_ref):
        # out(h, w*C+co) = sum_kh [ xpad(h+kh, :) @ B_kh ](w*C+co) + b(co)
        acc = None
        for kh in range(3):
            slab = xpad_ref[kh:kh + H, :].astype(jnp.bfloat16)   # (H, Wp*C)
            part = jnp.dot(slab, B_ref[kh],
                           preferred_element_type=jnp.float32)   # (H, W*C)
            acc = part if acc is None else acc + part
        return acc + b_ref[...]

    # ---- conv1 + bias + ReLU ------------------------------------------------
    xpad_ref[1:H + 1, C:(W + 1) * C] = x2d
    h1 = jnp.maximum(conv3x3(B1_ref, b1_ref), 0.0)             # (H, W*C) f32

    # ---- conv2 (reuse padded scratch; halo ring is still zero) --------------
    xpad_ref[1:H + 1, C:(W + 1) * C] = h1
    out2 = conv3x3(B2_ref, b2_ref)                             # (H, W*C) f32

    # ---- residual add, lane-dense store -------------------------------------
    if res_scale == 1.0:
        res = x2d + out2
    else:
        res = x2d + jnp.float32(res_scale) * out2
    o_ref[0] = res.astype(o_ref.dtype)


def _make_banded(w_hwio, W, C):
    """Build (3, (W+2)*C, W*C) bf16 banded matrices from an HWIO (3,3,C,C) weight.

    B[kh, (w+kw)*C + ci, w*C + co] = w_hwio[kh, kw, ci, co]
    so that  conv(x)[h, w*C+co] = sum_kh (xpad[h+kh, :] @ B[kh])[w*C+co].
    """
    Wp = W + 2
    mats = []
    for kh in range(3):
        B = jnp.zeros((Wp, W, C, C), jnp.float32)
        for kw in range(3):
            B = B.at[jnp.arange(W) + kw, jnp.arange(W)].set(w_hwio[kh, kw])
        # (Wp, W, Ci, Co) -> (Wp, Ci, W, Co) -> (Wp*Ci, W*Co)
        mats.append(B.transpose(0, 2, 1, 3).reshape(Wp * C, W * C))
    return jnp.stack(mats, axis=0).astype(jnp.bfloat16)


def residual_block(x_nhwc, w1, b1, w2, b2, *, res_scale=1.0):
    """x_nhwc: (N, H, W, C) float32. Weights HWIO (3,3,C,C), biases (C,)."""
    N, H, W, C = x_nhwc.shape
    Wp = W + 2

    # Lane-dense activation layout (free reshape in XLA).
    x2d = x_nhwc.reshape(N, H, W * C)

    # Banded bf16 weight matrices and W-tiled f32 biases.
    B1 = _make_banded(w1, W, C)                     # (3, Wp*C, W*C) bf16
    B2 = _make_banded(w2, W, C)
    b1_t = jnp.tile(b1.astype(jnp.float32), W).reshape(1, W * C)
    b2_t = jnp.tile(b2.astype(jnp.float32), W).reshape(1, W * C)

    kernel = functools.partial(_residual_block_kernel,
                               H=H, W=W, C=C, res_scale=float(res_scale))

    out2d = pl.pallas_call(
        kernel,
        out_shape=jax.ShapeDtypeStruct((N, H, W * C), x_nhwc.dtype),
        grid_spec=pltpu.PrefetchScalarGridSpec(
            num_scalar_prefetch=0,
            grid=(N,),
            in_specs=[
                pl.BlockSpec((1, H, W * C), lambda n: (n, 0, 0)),
                pl.BlockSpec((3, Wp * C, W * C), lambda n: (0, 0, 0)),  # resident
                pl.BlockSpec((1, W * C), lambda n: (0, 0)),             # resident
                pl.BlockSpec((3, Wp * C, W * C), lambda n: (0, 0, 0)),  # resident
                pl.BlockSpec((1, W * C), lambda n: (0, 0)),             # resident
            ],
            out_specs=pl.BlockSpec((1, H, W * C), lambda n: (n, 0, 0)),
            scratch_shapes=[
                pltpu.VMEM((H + 2, Wp * C), jnp.float32),   # padded activation
            ],
        ),
        compiler_params=pltpu.CompilerParams(
            dimension_semantics=("parallel",)),
    )(x2d, B1, b1_t, B2, b2_t)

    return out2d.reshape(N, H, W, C)


def _reference(x_nhwc, w1, b1, w2, b2, res_scale=1.0):
    dn = ("NHWC", "HWIO", "NHWC")
    o = jax.lax.conv_general_dilated(x_nhwc, w1, (1, 1), "SAME",
                                     dimension_numbers=dn) + b1
    o = jnp.maximum(o, 0.0)
    o = jax.lax.conv_general_dilated(o, w2, (1, 1), "SAME",
                                     dimension_numbers=dn) + b2
    return x_nhwc + res_scale * o


if __name__ == "__main__":
    # batch=8 gives >=4 grid steps per core on multi-core parts;
    # C=32, W=16 makes the lane-dense minor dim W*C = 512 (multiple of 128).
    N, C, H, W = 8, 32, 16, 16
    res_scale = 1.0

    key = jax.random.PRNGKey(0)
    kx, kw1, kw2, kb1, kb2 = jax.random.split(key, 5)

    # Input generated as NCHW (PyTorch convention), converted to NHWC for TPU.
    x_nchw = jax.random.normal(kx, (N, C, H, W), jnp.float32)
    x_nhwc = jnp.transpose(x_nchw, (0, 2, 3, 1))

    # default_init_weights: kaiming-normal scaled by 0.1 (biases nonzero here
    # just to exercise the bias path; module semantics are identical).
    fan_in = C * 3 * 3
    std = (2.0 / fan_in) ** 0.5 * 0.1
    w1 = jax.random.normal(kw1, (3, 3, C, C), jnp.float32) * std  # HWIO
    b1 = jax.random.normal(kb1, (C,), jnp.float32) * 0.05
    w2 = jax.random.normal(kw2, (3, 3, C, C), jnp.float32) * std
    b2 = jax.random.normal(kb2, (C,), jnp.float32) * 0.05

    out = residual_block(x_nhwc, w1, b1, w2, b2, res_scale=res_scale)
    out = jax.block_until_ready(out)

    ref = _reference(x_nhwc, w1, b1, w2, b2, res_scale)
    assert out.shape == (N, H, W, C)
    max_err = jnp.max(jnp.abs(out - ref))
    # bf16 matmul operands (f32 accumulation) -> slightly looser tolerance.
    assert jnp.allclose(out, ref, atol=5e-3, rtol=5e-3), f"max err {max_err}"

    print("KERNEL_OK")
</pallas_src>

<mosaic_0001>
module attributes {stable_mosaic.version = 11 : i64} {
  func.func @_residual_block_kernel(%arg0: i32, %arg1: memref<1x16x512xf32, #tpu.memory_space<vmem>>, %arg2: memref<3x576x512xbf16, #tpu.memory_space<vmem>>, %arg3: memref<1x512xf32, #tpu.memory_space<vmem>>, %arg4: memref<3x576x512xbf16, #tpu.memory_space<vmem>>, %arg5: memref<1x512xf32, #tpu.memory_space<vmem>>, %arg6: memref<1x16x512xf32, #tpu.memory_space<vmem>>, %arg7: memref<18x576xf32, #tpu.memory_space<vmem>>) attributes {dimension_semantics = [#tpu.dimension_semantics<parallel>], iteration_bounds = array<i64: 8>, scalar_prefetch = 0 : i64, scratch_operands = 1 : i64, tpu.core_type = #tpu.core_type<tc>, window_params = [{transform_indices = @transform_0, window_bounds = array<i64: 1, 16, 512>}, {pipeline_mode = #tpu.pipeline_mode<synchronous>, transform_indices = @transform_1, window_bounds = array<i64: 3, 576, 512>}, {pipeline_mode = #tpu.pipeline_mode<synchronous>, transform_indices = @transform_2, window_bounds = array<i64: 1, 512>}, {pipeline_mode = #tpu.pipeline_mode<synchronous>, transform_indices = @transform_3, window_bounds = array<i64: 3, 576, 512>}, {pipeline_mode = #tpu.pipeline_mode<synchronous>, transform_indices = @transform_4, window_bounds = array<i64: 1, 512>}, {transform_indices = @transform_5, window_bounds = array<i64: 1, 16, 512>}]} {
    %c0 = arith.constant 0 : index
    %c0_0 = arith.constant 0 : index
    %c0_1 = arith.constant 0 : index
    %0 = vector.load %arg1[%c0, %c0_0, %c0_1] : memref<1x16x512xf32, #tpu.memory_space<vmem>>, vector<1x16x512xf32>
    %1 = vector.shape_cast %0 : vector<1x16x512xf32> to vector<16x512xf32>
    %cst = arith.constant 0.000000e+00 : f32
    %2 = vector.broadcast %cst : f32 to vector<1x576xf32>
    %cst_2 = arith.constant 0.000000e+00 : f32
    %3 = vector.broadcast %cst_2 : f32 to vector<18x32xf32>
    %c0_3 = arith.constant 0 : index
    %c0_4 = arith.constant 0 : index
    %4 = vector.load %arg7[%c0_3, %c0_4] : memref<18x576xf32, #tpu.memory_space<vmem>>, vector<1x576xf32>
    tpu.vector_store %arg7[%c0_3, %c0_4], %2 {strides = array<i32>} : memref<18x576xf32, #tpu.memory_space<vmem>>, vector<1x576xf32>,
    %c17 = arith.constant 17 : index
    %c0_5 = arith.constant 0 : index
    %5 = vector.load %arg7[%c17, %c0_5] : memref<18x576xf32, #tpu.memory_space<vmem>>, vector<1x576xf32>
    tpu.vector_store %arg7[%c17, %c0_5], %2 {strides = array<i32>} : memref<18x576xf32, #tpu.memory_space<vmem>>, vector<1x576xf32>,
    %c0_6 = arith.constant 0 : index
    %c0_7 = arith.constant 0 : index
    %6 = vector.load %arg7[%c0_6, %c0_7] : memref<18x576xf32, #tpu.memory_space<vmem>>, vector<18x32xf32>
    tpu.vector_store %arg7[%c0_6, %c0_7], %3 {strides = array<i32>} : memref<18x576xf32, #tpu.memory_space<vmem>>, vector<18x32xf32>,
    %c0_8 = arith.constant 0 : index
    %c544 = arith.constant 544 : index
    %7 = vector.load %arg7[%c0_8, %c544] : memref<18x576xf32, #tpu.memory_space<vmem>>, vector<18x32xf32>
    tpu.vector_store %arg7[%c0_8, %c544], %3 {strides = array<i32>} : memref<18x576xf32, #tpu.memory_space<vmem>>, vector<18x32xf32>,
    %c1 = arith.constant 1 : index
    %c32 = arith.constant 32 : index
    %8 = vector.load %arg7[%c1, %c32] : memref<18x576xf32, #tpu.memory_space<vmem>>, vector<16x512xf32>
    tpu.vector_store %arg7[%c1, %c32], %1 {strides = array<i32>} : memref<18x576xf32, #tpu.memory_space<vmem>>, vector<16x512xf32>,
    %c0_9 = arith.constant 0 : index
    %c0_10 = arith.constant 0 : index
    %9 = vector.load %arg7[%c0_9, %c0_10] : memref<18x576xf32, #tpu.memory_space<vmem>>, vector<16x576xf32>
    %10 = arith.truncf %9 : vector<16x576xf32> to vector<16x576xbf16>
    %c0_11 = arith.constant 0 : index
    %c0_12 = arith.constant 0 : index
    %c0_13 = arith.constant 0 : index
    %11 = vector.load %arg2[%c0_11, %c0_12, %c0_13] : memref<3x576x512xbf16, #tpu.memory_space<vmem>>, vector<1x576x512xbf16>
    %12 = vector.shape_cast %11 : vector<1x576x512xbf16> to vector<576x512xbf16>
    %cst_14 = arith.constant dense<0.000000e+00> : vector<16x512xf32>
    %13 = tpu.matmul %10, %12, %cst_14 {dimension_numbers = #tpu.dot_dimension_numbers<[1], [0], [0], [1], [0, 0, 1, 1], [], []>} : vector<16x576xbf16>, vector<576x512xbf16>, vector<16x512xf32> -> vector<16x512xf32>
    %c1_15 = arith.constant 1 : index
    %c0_16 = arith.constant 0 : index
    %14 = vector.load %arg7[%c1_15, %c0_16] : memref<18x576xf32, #tpu.memory_space<vmem>>, vector<16x576xf32>
    %15 = arith.truncf %14 : vector<16x576xf32> to vector<16x576xbf16>
    %c1_17 = arith.constant 1 : index
    %c0_18 = arith.constant 0 : index
    %c0_19 = arith.constant 0 : index
    %16 = vector.load %arg2[%c1_17, %c0_18, %c0_19] : memref<3x576x512xbf16, #tpu.memory_space<vmem>>, vector<1x576x512xbf16>
    %17 = vector.shape_cast %16 : vector<1x576x512xbf16> to vector<576x512xbf16>
    %cst_20 = arith.constant dense<0.000000e+00> : vector<16x512xf32>
    %18 = tpu.matmul %15, %17, %cst_20 {dimension_numbers = #tpu.dot_dimension_numbers<[1], [0], [0], [1], [0, 0, 1, 1], [], []>} : vector<16x576xbf16>, vector<576x512xbf16>, vector<16x512xf32> -> vector<16x512xf32>
    %19 = arith.addf %13, %18 : vector<16x512xf32>
    %c2 = arith.constant 2 : index
    %c0_21 = arith.constant 0 : index
    %20 = vector.load %arg7[%c2, %c0_21] : memref<18x576xf32, #tpu.memory_space<vmem>>, vector<16x576xf32>
    %21 = arith.truncf %20 : vector<16x576xf32> to vector<16x576xbf16>
    %c2_22 = arith.constant 2 : index
    %c0_23 = arith.constant 0 : index
    %c0_24 = arith.constant 0 : index
    %22 = vector.load %arg2[%c2_22, %c0_23, %c0_24] : memref<3x576x512xbf16, #tpu.memory_space<vmem>>, vector<1x576x512xbf16>
    %23 = vector.shape_cast %22 : vector<1x576x512xbf16> to vector<576x512xbf16>
    %cst_25 = arith.constant dense<0.000000e+00> : vector<16x512xf32>
    %24 = tpu.matmul %21, %23, %cst_25 {dimension_numbers = #tpu.dot_dimension_numbers<[1], [0], [0], [1], [0, 0, 1, 1], [], []>} : vector<16x576xbf16>, vector<576x512xbf16>, vector<16x512xf32> -> vector<16x512xf32>
    %25 = arith.addf %19, %24 : vector<16x512xf32>
    %c0_26 = arith.constant 0 : index
    %c0_27 = arith.constant 0 : index
    %26 = vector.load %arg3[%c0_26, %c0_27] : memref<1x512xf32, #tpu.memory_space<vmem>>, vector<1x512xf32>
    %27 = vector.broadcast %26 : vector<1x512xf32> to vector<16x512xf32>
    %28 = arith.addf %25, %27 : vector<16x512xf32>
    %cst_28 = arith.constant 0.000000e+00 : f32
    %29 = vector.broadcast %cst_28 : f32 to vector<16x512xf32>
    %30 = arith.maximumf %28, %29 : vector<16x512xf32>
    %c1_29 = arith.constant 1 : index
    %c32_30 = arith.constant 32 : index
    %31 = vector.load %arg7[%c1_29, %c32_30] : memref<18x576xf32, #tpu.memory_space<vmem>>, vector<16x512xf32>
    tpu.vector_store %arg7[%c1_29, %c32_30], %30 {strides = array<i32>} : memref<18x576xf32, #tpu.memory_space<vmem>>, vector<16x512xf32>,
    %c0_31 = arith.constant 0 : index
    %c0_32 = arith.constant 0 : index
    %32 = vector.load %arg7[%c0_31, %c0_32] : memref<18x576xf32, #tpu.memory_space<vmem>>, vector<16x576xf32>
    %33 = arith.truncf %32 : vector<16x576xf32> to vector<16x576xbf16>
    %c0_33 = arith.constant 0 : index
    %c0_34 = arith.constant 0 : index
    %c0_35 = arith.constant 0 : index
    %34 = vector.load %arg4[%c0_33, %c0_34, %c0_35] : memref<3x576x512xbf16, #tpu.memory_space<vmem>>, vector<1x576x512xbf16>
    %35 = vector.shape_cast %34 : vector<1x576x512xbf16> to vector<576x512xbf16>
    %cst_36 = arith.constant dense<0.000000e+00> : vector<16x512xf32>
    %36 = tpu.matmul %33, %35, %cst_36 {dimension_numbers = #tpu.dot_dimension_numbers<[1], [0], [0], [1], [0, 0, 1, 1], [], []>} : vector<16x576xbf16>, vector<576x512xbf16>, vector<16x512xf32> -> vector<16x512xf32>
    %c1_37 = arith.constant 1 : index
    %c0_38 = arith.constant 0 : index
    %37 = vector.load %arg7[%c1_37, %c0_38] : memref<18x576xf32, #tpu.memory_space<vmem>>, vector<16x576xf32>
    %38 = arith.truncf %37 : vector<16x576xf32> to vector<16x576xbf16>
    %c1_39 = arith.constant 1 : index
    %c0_40 = arith.constant 0 : index
    %c0_41 = arith.constant 0 : index
    %39 = vector.load %arg4[%c1_39, %c0_40, %c0_41] : memref<3x576x512xbf16, #tpu.memory_space<vmem>>, vector<1x576x512xbf16>
    %40 = vector.shape_cast %39 : vector<1x576x512xbf16> to vector<576x512xbf16>
    %cst_42 = arith.constant dense<0.000000e+00> : vector<16x512xf32>
    %41 = tpu.matmul %38, %40, %cst_42 {dimension_numbers = #tpu.dot_dimension_numbers<[1], [0], [0], [1], [0, 0, 1, 1], [], []>} : vector<16x576xbf16>, vector<576x512xbf16>, vector<16x512xf32> -> vector<16x512xf32>
    %42 = arith.addf %36, %41 : vector<16x512xf32>
    %c2_43 = arith.constant 2 : index
    %c0_44 = arith.constant 0 : index
    %43 = vector.load %arg7[%c2_43, %c0_44] : memref<18x576xf32, #tpu.memory_space<vmem>>, vector<16x576xf32>
    %44 = arith.truncf %43 : vector<16x576xf32> to vector<16x576xbf16>
    %c2_45 = arith.constant 2 : index
    %c0_46 = arith.constant 0 : index
    %c0_47 = arith.constant 0 : index
    %45 = vector.load %arg4[%c2_45, %c0_46, %c0_47] : memref<3x576x512xbf16, #tpu.memory_space<vmem>>, vector<1x576x512xbf16>
    %46 = vector.shape_cast %45 : vector<1x576x512xbf16> to vector<576x512xbf16>
    %cst_48 = arith.constant dense<0.000000e+00> : vector<16x512xf32>
    %47 = tpu.matmul %44, %46, %cst_48 {dimension_numbers = #tpu.dot_dimension_numbers<[1], [0], [0], [1], [0, 0, 1, 1], [], []>} : vector<16x576xbf16>, vector<576x512xbf16>, vector<16x512xf32> -> vector<16x512xf32>
    %48 = arith.addf %42, %47 : vector<16x512xf32>
    %c0_49 = arith.constant 0 : index
    %c0_50 = arith.constant 0 : index
    %49 = vector.load %arg5[%c0_49, %c0_50] : memref<1x512xf32, #tpu.memory_space<vmem>>, vector<1x512xf32>
    %50 = vector.broadcast %49 : vector<1x512xf32> to vector<16x512xf32>
    %51 = arith.addf %48, %50 : vector<16x512xf32>
    %52 = arith.addf %1, %51 : vector<16x512xf32>
    %c0_51 = arith.constant 0 : index
    %c0_52 = arith.constant 0 : index
    %c0_53 = arith.constant 0 : index
    %53 = vector.load %arg6[%c0_51, %c0_52, %c0_53] : memref<1x16x512xf32, #tpu.memory_space<vmem>>, vector<1x16x512xf32>
    %54 = vector.shape_cast %53 : vector<1x16x512xf32> to vector<16x512xf32>
    %55 = vector.shape_cast %52 : vector<16x512xf32> to vector<1x16x512xf32>
    tpu.vector_store %arg6[%c0_51, %c0_52, %c0_53], %55 {strides = array<i32>} : memref<1x16x512xf32, #tpu.memory_space<vmem>>, vector<1x16x512xf32>,
    return
  }
  func.func @transform_0(%arg0: i32) -> (i32, i32, i32) {
    %c0_i32 = arith.constant 0 : i32
    %c0_i32_0 = arith.constant 0 : i32
    %c0_i32_1 = arith.constant 0 : i32
    return %arg0, %c0_i32, %c0_i32_0 : i32, i32, i32
  }
  func.func @transform_1(%arg0: i32) -> (i32, i32, i32) {
    %c0_i32 = arith.constant 0 : i32
    %c0_i32_0 = arith.constant 0 : i32
    %c0_i32_1 = arith.constant 0 : i32
    %c0_i32_2 = arith.constant 0 : i32
    return %c0_i32, %c0_i32_0, %c0_i32_1 : i32, i32, i32
  }
  func.func @transform_2(%arg0: i32) -> (i32, i32) {
    %c0_i32 = arith.constant 0 : i32
    %c0_i32_0 = arith.constant 0 : i32
    %c0_i32_1 = arith.constant 0 : i32
    return %c0_i32, %c0_i32_0 : i32, i32
  }
  func.func @transform_3(%arg0: i32) -> (i32, i32, i32) {
    %c0_i32 = arith.constant 0 : i32
    %c0_i32_0 = arith.constant 0 : i32
    %c0_i32_1 = arith.constant 0 : i32
    %c0_i32_2 = arith.constant 0 : i32
    return %c0_i32, %c0_i32_0, %c0_i32_1 : i32, i32, i32
  }
  func.func @transform_4(%arg0: i32) -> (i32, i32) {
    %c0_i32 = arith.constant 0 : i32
    %c0_i32_0 = arith.constant 0 : i32
    %c0_i32_1 = arith.constant 0 : i32
    return %c0_i32, %c0_i32_0 : i32, i32
  }
  func.func @transform_5(%arg0: i32) -> (i32, i32, i32) {
    %c0_i32 = arith.constant 0 : i32
    %c0_i32_0 = arith.constant 0 : i32
    %c0_i32_1 = arith.constant 0 : i32
    return %arg0, %c0_i32, %c0_i32_0 : i32, i32, i32
  }
}

</mosaic_0001>

<bundles_post_ra>
// kernel: tpu_custom_call.1
= control target key start
LH: loop header
LB: loop body
LE: loop exit
PB: predicated region body
PF: predicated region fallthrough
CT: control target
= control target key end

     0   :  { %10 = vsyncpa [#allocation4], 0  ;;  %s10962_s0 = inlined_call_operand.hbm [shape: f32[8,16,512], index: 0, kind: input, shape index: {}]   ;;  %s10963_s1 = inlined_call_operand.hbm [shape: bf16[3,576,512], index: 1, kind: input, shape index: {}]   ;;  %s10964_s2 = inlined_call_operand.hbm [shape: f32[1,512], index: 2, kind: input, shape index: {}]   ;;  %s10965_s3 = inlined_call_operand.hbm [shape: bf16[3,576,512], index: 3, kind: input, shape index: {}]   ;;  %s10966_s4 = inlined_call_operand.hbm [shape: f32[1,512], index: 4, kind: input, shape index: {}]   ;;  %s10967_s5 = inlined_call_operand.hbm [shape: f32[8,16,512], index: 5, kind: output, shape index: {}]  }
   0x1   :  { %12 = vsyncpa [#allocation4 + $0x1], 0 }
   0x2   :  { %13 = vsyncpa [#allocation7], 0 }
   0x3   :  { %14 = vsyncpa [#allocation10], 0 }
   0x4   :  { %15 = vsyncpa [#allocation5], 0 }
   0x5   :  { %17 = vsyncpa [#allocation5 + $0x1], 0  ;;  %s10473_s18 = smov 0   ;;  %s10475_s19 = smov 0  }
   0x6   :  { %s10477_s20 = smov 0   ;;  %s10479_s21 = smov 0  }
   0x7 LB: > { %s10494_s22 = sadd.s32 4294967295, %s10427_s21   ;;  %s7775_s23 = sadd.s32 4294967294, %s10427_s21   ;;  %s10427_s21 = sphi %s10479_s21, %s10989_s21   ;;  %s10423_s20 = sphi %s10477_s20, %s10988_s20   ;;  %s10419_s19 = sphi %s10475_s19, %s10987_s19   ;;  %s10415_s18 = sphi %s10473_s18, %s10986_s18  }
   0x8   : > { %p43_p0 = scmp.ne.s32.totalorder %s10419_s19, %s10415_s18  ;;  %p10968_p1 = scmp.eq.s32.totalorder %s10494_s22, 0 }
   0x9   : > { %p157_p3 = scmp.eq.s32.totalorder %s7775_s23, 7  ;;  %p7776_p5 = scmp.ge.s32.totalorder %s10427_s21, 1 }
   0xa   : > { %p10503_p4 = por %p10968_p1, %p43_p0  ;;  %p164_p7 = scmp.lt.s32.totalorder %s10427_s21, 9 }
   0xb   : > { %p10508_p6 = por %p157_p3, %p43_p0  ;;  %s10429_s27 = smov [#allocation6]  }
   0xc   : > { %s10971_s24 = scalar_select %p10503_p4, 1, 0 }
   0xd   : > { %s10972_s25 = scalar_select %p10508_p6, 1, 0 }
   0xe   : > { %p10513_p8 = pnand %p7776_p5, %p164_p7  ;;  %s176_s28 = sshll.u32 %s10429_s27, 4  ;;  %s10517_s28 = int_to_ptr.vmem [resolvable:$true] %s176_s28 }
   0xf   : > { %s10430_s30 = smov [#allocation9]   ;;  %s10431_s7 = smov [#allocation8]  }
  0x10   : > { %s10973_s26 = scalar_select %p10513_p8, 1, 0 }
  0x11   : > { %p8823_p9 = pneg %p10513_p8  ;;  %s200_s6 = sshll.u32 %s10430_s30, 4  ;;  %s10527_s6 = int_to_ptr.vmem [resolvable:$true] %s200_s6 }
  0x12   : > { %s10529_s8 = sshll.u32 %s10431_s7, 4  ;;  %s10211_s11 = scalar_lea.hbm %s10963_s1, 55296  ;;  %s191_s8 = int_to_ptr.vmem [resolvable:$true] %s10529_s8 }
  0x13   : > { %p10523_p10 = pnand %p8823_p9, %p10968_p1  ;;  %p10212_p11 = scmp.ne.s32.totalorder %s10963_s1, %s10211_s11 }
  0x14   : > { %p10218_p3 = scmp.lt.u32.totalorder %s10211_s11, %s10963_s1 }
  0x15   : > { %p10539_p12 = pneg %p10523_p10 }
  0x17   : > { %p10214_p13 = pnand %p10539_p12, %p10212_p11 }
  0x19   : > { %p10215_p0 = pneg %p10214_p13 }
  0x1b   : > { %p10220_p5 = pnand %p10218_p3, %p10215_p0 }
  0x1d   : > { %10223 = shalt.err (!%p10220_p5)
}
  0x1e   : > { %s10224_s17 = scalar_lea.vmem %s10517_s28, 55296  ;;  %p10232_p2 = scmp.lt.s32.totalorder %s10517_s28, %s10517_s28 }
  0x1f   : > { %p10225_p7 = scmp.ne.s32.totalorder %s10517_s28, %s10224_s17  ;;  %p10233_p6 = scmp.lt.s32.totalorder %s10224_s17, %s10224_s17 }
  0x21   : > { %p10227_p9 = pnand %p10225_p7, %p10539_p12  ;;  %p10234_p11 = por %p10233_p6, %p10232_p2 }
  0x23   : > { %p10228_p1 = pneg %p10227_p9 }
  0x25   : > { %p10235_p13 = pnand %p10234_p11, %p10228_p1 }
  0x27   : > { %10238 = shalt.err (!%p10235_p13)
}
  0x28   : > { %s10432_s23 = smov 256   ;;  %s10433_s27 = smov 16  }
  0x29   : > { %8826 = dma.hbm_to_vmem [thread:$0]  (!%p10523_p10), %s10963_s1, 55296, %s10517_s28, [#allocation7], %s10432_s23, %s10432_s23, %s10433_s27  }
  0x2a   : > { %s10239_s11 = scalar_lea.hbm %s10965_s3, 55296 }
  0x2b   : > { %p10240_p2 = scmp.ne.s32.totalorder %s10965_s3, %s10239_s11  ;;  %p10246_p0 = scmp.lt.u32.totalorder %s10239_s11, %s10965_s3 }
  0x2d   : > { %p10242_p1 = pnand %p10240_p2, %p10539_p12 }
  0x2f   : > { %p10243_p6 = pneg %p10242_p1 }
  0x31   : > { %p10248_p3 = pnand %p10246_p0, %p10243_p6 }
  0x33   : > { %10251 = shalt.err (!%p10248_p3)
}
  0x34   : > { %s10252_s28 = scalar_lea.vmem %s10527_s6, 55296  ;;  %p10260_p11 = scmp.lt.s32.totalorder %s10527_s6, %s10527_s6 }
  0x35   : > { %p10253_p5 = scmp.ne.s32.totalorder %s10527_s6, %s10252_s28  ;;  %p10261_p13 = scmp.lt.s32.totalorder %s10252_s28, %s10252_s28 }
  0x37   : > { %p10255_p7 = pnand %p10253_p5, %p10539_p12  ;;  %p10262_p2 = por %p10261_p13, %p10260_p11 }
  0x39   : > { %p10256_p9 = pneg %p10255_p7 }
  0x3b   : > { %p10263_p1 = pnand %p10262_p2, %p10256_p9 }
  0x3d   : > { %10266 = shalt.err (!%p10263_p1)
}
  0x3e   : > { %8832 = dma.hbm_to_vmem [thread:$0]  (!%p10523_p10), %s10965_s3, 55296, %s10527_s6, [#allocation10], %s10432_s23, %s10432_s23, %s10433_s27  }
  0x3f   : > { %s10267_s10 = scalar_lea.hbm %s10964_s2, 64 }
  0x40   : > { %p10268_p6 = scmp.ne.s32.totalorder %s10964_s2, %s10267_s10  ;;  %p10274_p5 = scmp.lt.u32.totalorder %s10267_s10, %s10964_s2 }
  0x42   : > { %p10270_p0 = pnand %p10268_p6, %p10539_p12 }
  0x44   : > { %p10271_p3 = pneg %p10270_p0 }
  0x46   : > { %p10276_p7 = pnand %p10274_p5, %p10271_p3 }
  0x48   : > { %10279 = shalt.err (!%p10276_p7)
}
  0x49   : > { %s10280_s16 = scalar_lea.vmem %s191_s8, 64  ;;  %p10288_p2 = scmp.lt.s32.totalorder %s191_s8, %s191_s8 }
  0x4a   : > { %p10281_p9 = scmp.ne.s32.totalorder %s191_s8, %s10280_s16  ;;  %p10289_p1 = scmp.lt.s32.totalorder %s10280_s16, %s10280_s16 }
  0x4c   : > { %p10283_p11 = pnand %p10281_p9, %p10539_p12  ;;  %p10290_p4 = por %p10289_p1, %p10288_p2 }
  0x4e   : > { %p10284_p13 = pneg %p10283_p11 }
  0x50   : > { %p10291_p8 = pnand %p10290_p4, %p10284_p13 }
  0x52   : > { %10294 = shalt.err (!%p10291_p8)
}
  0x53   : > { %8829 = dma.hbm_to_vmem [thread:$0]  (!%p10523_p10), %s10964_s2, 64, %s191_s8, [#allocation7]  }
  0x54   : > { %s10434_s27 = smov [#allocation11]   ;;  %s10295_s7 = scalar_lea.hbm %s10966_s4, 64 }
  0x55   : > { %s214_s28 = sshll.u32 %s10434_s27, 4  ;;  %p10296_p6 = scmp.ne.s32.totalorder %s10966_s4, %s10295_s7  ;;  %s215_s28 = int_to_ptr.vmem [resolvable:$true] %s214_s28 }
  0x56   : > { %p10302_p0 = scmp.lt.u32.totalorder %s10295_s7, %s10966_s4 }
  0x57   : > { %p10298_p4 = pnand %p10296_p6, %p10539_p12 }
  0x59   : > { %p10299_p8 = pneg %p10298_p4 }
  0x5b   : > { %p10304_p3 = pnand %p10302_p0, %p10299_p8 }
  0x5d   : > { %10307 = shalt.err (!%p10304_p3)
}
  0x5e   : > { %s10308_s8 = scalar_lea.vmem %s215_s28, 64  ;;  %p10316_p11 = scmp.lt.s32.totalorder %s215_s28, %s215_s28 }
  0x5f   : > { %p10309_p5 = scmp.ne.s32.totalorder %s215_s28, %s10308_s8  ;;  %p10317_p13 = scmp.lt.s32.totalorder %s10308_s8, %s10308_s8 }
  0x61   : > { %p10311_p7 = pnand %p10309_p5, %p10539_p12  ;;  %p10318_p2 = por %p10317_p13, %p10316_p11 }
  0x63   : > { %p10312_p9 = pneg %p10311_p7 }
  0x65   : > { %p10319_p1 = pnand %p10318_p2, %p10312_p9 }
  0x67   : > { %10322 = shalt.err (!%p10319_p1)
}
  0x68   : > { %8835 = dma.hbm_to_vmem [thread:$0]  (!%p10523_p10), %s10966_s4, 64, %s215_s28, [#allocation10]  }
  0x69   : > { %s10621_s14 = sadd.s32 1, %s10427_s21   ;;  %s30_s16 = sadd.s32 1, %s10423_s20 }
  0x6a   : > { %s27_s29 = ssub.s32 %s10427_s21, %s10621_s14  ;;  %p37_p12 = scmp.ne.s32.totalorder %s10423_s20, %s10419_s19 }
  0x6b   : > { %p28_p6 = scmp.eq.s32.totalorder %s27_s29, 0  ;;  %p38_p4 = scmp.eq.s32.totalorder %s10427_s21, 0 }
  0x6c   : > { %p10976_p8 = scmp.eq.s32.totalorder %s10494_s22, 7  ;;  %p8848_p3 = scmp.lt.s32.totalorder %s10427_s21, 8 }
  0x6d   : > { %s10637_s23 = scalar_select %p28_p6, %s10423_s20, %s30_s16  }
  0x6e   : > { %p10631_p0 = por %p10976_p8, %p37_p12  ;;  %p39_p5 = por %p38_p4, %p37_p12 }
  0x6f   : > { %s225_s27 = sand.u32 1, %s10423_s20   ;;  %s8673_s28 = sshll.u32 %s10427_s21, 10 }
  0x70   : > { %s7782_s17 = sshll.u32 %s225_s27, 6  ;;  %s10644_s9 = scalar_lea.hbm %s10962_s0, %s8673_s28 }
  0x71   : > { %s229_s10 = scalar_lea.vmem [#allocation3], %s7782_s17  ;;  %p10648_p10 = pnand %p8848_p3, %p39_p5 }
  0x72   : > { %s236_s11 = sshll.u32 %s229_s10, 4  ;;  %s10652_s8 = scalar_lea.sflag [#allocation4], %s225_s27  ;;  %s10646_s11 = int_to_ptr.vmem [resolvable:$true] %s236_s11 }
  0x73   : > { %s10323_s13 = scalar_lea.hbm %s10644_s9, 1024  ;;  %p10325_p9 = pneg %p10648_p10 }
  0x74   : > { %p10324_p7 = scmp.ne.s32.totalorder %s10644_s9, %s10323_s13  ;;  %s10328_s29 = scalar_lea.hbm %s10962_s0, 8192 }
  0x75   : > { %p10329_p2 = scmp.lt.u32.totalorder %s10644_s9, %s10962_s0  ;;  %p10330_p1 = scmp.lt.u32.totalorder %s10328_s29, %s10323_s13 }
  0x76   : > { %p10326_p11 = pnand %p10325_p9, %p10324_p7  ;;  %p10332_p6 = scmp.lt.u32.totalorder %s10323_s13, %s10644_s9 }
  0x77   : > { %p10331_p12 = por %p10330_p1, %p10329_p2 }
  0x78   : > { %p10327_p13 = pneg %p10326_p11 }
  0x79   : > { %p10333_p4 = por %p10332_p6, %p10331_p12 }
  0x7b   : > { %p10334_p8 = pnand %p10333_p4, %p10327_p13 }
  0x7d   : > { %10337 = shalt.err (!%p10334_p8)
}
  0x7e   : > { %s10338_s27 = scalar_lea.vmem %s10646_s11, 1024  ;;  %s10435_s30 = smov [#allocation3]  }
  0x7f   : > { %p10339_p3 = scmp.ne.s32.totalorder %s10646_s11, %s10338_s27  ;;  %s10343_s7 = sshll.u32 %s10435_s30, 4  ;;  %s10344_s7 = int_to_ptr.vmem [resolvable:$false] %s10343_s7 }
  0x80   : > { %s10345_s10 = scalar_lea.vmem %s10344_s7, 2048  ;;  %p10346_p11 = scmp.lt.s32.totalorder %s10646_s11, %s10344_s7 }
  0x81   : > { %p10341_p5 = pnand %p10339_p3, %p10325_p9  ;;  %p10347_p2 = scmp.lt.s32.totalorder %s10345_s10, %s10338_s27 }
  0x83   : > { %p10342_p7 = pneg %p10341_p5  ;;  %p10348_p1 = por %p10347_p2, %p10346_p11 }
  0x85   : > { %p10349_p12 = pnand %p10348_p1, %p10342_p7 }
  0x87   : > { %10352 = shalt.err (!%p10349_p12)
}
  0x88   : > { %s10436_s13 = smov 512   ;;  %s10437_s15 = smov 32  }
  0x89   : > { %8839 = dma.hbm_to_vmem [thread:$0]  (!%p10648_p10), %s10644_s9, 1024, %s10646_s11, %s10652_s8, %s10436_s13, %s10436_s13, %s10437_s15  }
  0x8a   : > { %p10979_p9 = scmp.ne.s32.totalorder %s10973_s26, 0 }
  0x8b   : > { %s10683_s16 = sand.u32 (!%p10979_p9), 1, %s10419_s19   ;;  %p10980_p13 = scmp.ne.s32.totalorder (!%p10979_p9), %s10971_s24, 0 }
  0x8c   : > { %248 = sbr.rel (%p10979_p9) target bundleno = 1630 (0x65e), region = 40  ;;  %s7786_s29 = sshll.u32 (!%p10979_p9), %s10683_s16, 6 }
  0x8d   : > { %s251_s17 = scalar_lea.sflag (!%p10979_p9), [#allocation4], %s10683_s16  ;;  %s10689_s28 = scalar_lea.vmem (!%p10979_p9), [#allocation3], %s7786_s29 }
  0x93   : > { %10398 = dma.done.wait (%p10980_p13), %s251_s17, 1024  }
  0x94   : > { %10400 = vsyncadd (%p10980_p13), %s251_s17, 4294966272  ;;  %p10981_p10 = scmp.eq.s32.totalorder %s10494_s22, 0 }
  0x96   : > { %10402 = dma.done.wait (%p10981_p10), [#allocation7], 55360   ;;  %p10982_p6 = pmov %p10981_p10 }
  0x98   : > { %10404 = vsyncadd (%p10982_p6), [#allocation7], 4294911936  ;;  %p10983_p4 = pmov %p10982_p6 }
  0x9a   : > { %10406 = dma.done.wait (%p10983_p4), [#allocation10], 55360   ;;  %p10984_p8 = pmov %p10983_p4 }
  0x9b   : > { %v306_v0 = vlaneseq  ;;  %vm315_vm0 = vcmask 261120   ;;  %v10438_v1 = vmov 0.0   ;;  %vm318_vm2 = vcmask 254976   ;;  %v298_v2 = vld [vmem:[%s10689_s28] sm:$0xff]  ;;  %v299_v4 = vld [vmem:[%s10689_s28 + $0x8] sm:$0xff]  ;;  %s10439_s24 = smov 32  }
  0x9c   : > { %10408 = vsyncadd (%p10984_p8), [#allocation10], 4294911936  ;;  %317 = vst.msk [vmem:[#allocation2 + $0x28] sm:$0xff] %vm315_vm0, %v10438_v1  ;;  %v302_v3 = vld [vmem:[%s10689_s28 + $0x20] sm:$0xff]  ;;  %vm333_vm3 = vcmask 1040384   ;;  %v334_v5 = vrot.slane %v298_v2, 7 }
  0x9d   : > { %vm308_vm1 = vcmp.lt.s32.totalorder %v306_v0, 576  ;;  %v338_v6 = vrot.slane %v302_v3, 7  ;;  %v335_v7 = vrot.slane %v299_v4, 7  ;;  %v303_v8 = vld [vmem:[%s10689_s28 + $0x28] sm:$0xff]  ;;  %v8898_v11 = vld [vmem:[#allocation6 + $0x484] ss:$16 sps:$4 sm:$0xff]  }
  0x9e   : > { %310 = vst.msk [vmem:[#allocation2] ss:$8 sm:$0xf] %vm308_vm1, %v10438_v1  ;;  %311 = vst.msk [vmem:[#allocation2] ss:$8 sm:$0x10] %vm308_vm1, %v10438_v1  ;;  %346 = vrot.lane.b32.xlu0 %v334_v5, %s10439_s24  ;;  %1527 = vmatprep.subr.bf16.mxu0 %v8898_v11 }
  0x9f   : > { %313 = vst.msk [vmem:[#allocation2 + $0x51] ss:$8 sm:$0xf] %vm308_vm1, %v10438_v1  ;;  %314 = vst.msk [vmem:[#allocation2 + $0x51] ss:$8 sm:$0x10] %vm308_vm1, %v10438_v1  ;;  %v339_v10 = vsel %vm333_vm3, %v334_v5, %v338_v6 }
  0xa0   : > { %316 = vst.msk [vmem:[#allocation2] sm:$0xff] %vm315_vm0, %v10438_v1  ;;  %v340_v9 = vrot.slane %v303_v8, 7  ;;  %354 = vrot.lane.b32.xlu1 %v339_v10, %s10439_s24  ;;  %v8900_v12 = vld [vmem:[#allocation6 + $0x48c] ss:$16 sps:$4 sm:$0xff]   ;;  %v8902_v13 = vld [vmem:[#allocation6 + $0x480] ss:$16 sps:$4 sm:$0xff]  }
  0xa1   : > { %319 = vst.msk [vmem:[#allocation2 + $0x50] sm:$0x3] %vm318_vm2, %v10438_v1  ;;  %v8903_v15 = vld [vmem:[#allocation6 + $0x488] ss:$16 sps:$4 sm:$0xff]   ;;  %v300_v16 = vld [vmem:[%s10689_s28 + $0x10] sm:$0xff]  ;;  %1656 = vmatprep.subr.bf16.mxu1 %v8900_v12  ;;  %1528 = vmatpush1.bf16.msra.mxu0 %v8902_v13  ;;  %vm320_vm4 = vcmask 523520  }
  0xa2   : > { %v341_v14 = vsel %vm333_vm3, %v335_v7, %v340_v9  ;;  %v8904_v17 = vld [vmem:[#allocation6 + $0x4a4] ss:$16 sps:$4 sm:$0xff]   ;;  %348 = vrot.lane.b32.xlu0 %v335_v7, %s10439_s24  ;;  %v301_v19 = vld [vmem:[%s10689_s28 + $0x18] sm:$0xff]  ;;  %1657 = vmatpush1.bf16.msra.mxu1 %v8903_v15  ;;  %v8908_v21 = vld [vmem:[#allocation6 + $0x4a0] ss:$16 sps:$4 sm:$0xff]   ;;  %v336_v27 = vrot.slane %v300_v16, 7 }
  0xa3   : > { %v304_v18 = vld [vmem:[%s10689_s28 + $0x30] sm:$0xff]  ;;  %v8906_v20 = vld [vmem:[#allocation6 + $0x4ac] ss:$16 sps:$4 sm:$0xff]   ;;  %v8909_v22 = vld [vmem:[#allocation6 + $0x4a8] ss:$16 sps:$4 sm:$0xff]   ;;  %1529 = vmatprep.subr.bf16.mxu0 %v8904_v17  ;;  %v337_v30 = vrot.slane %v301_v19, 7 }
  0xa4   : > { %356 = vrot.lane.b32.xlu1 %v341_v14, %s10439_s24  ;;  %v8910_v23 = vld [vmem:[#allocation6 + $0x4c4] ss:$16 sps:$4 sm:$0xff]   ;;  %1658 = vmatprep.subr.bf16.mxu1 %v8906_v20  ;;  %v8912_v24 = vld [vmem:[#allocation6 + $0x4cc] ss:$16 sps:$4 sm:$0xff]   ;;  %v8914_v26 = vld [vmem:[#allocation6 + $0x4c0] ss:$16 sps:$4 sm:$0xff]  }
  0xa5   : > { %v305_v25 = vld [vmem:[%s10689_s28 + $0x38] sm:$0xff]  ;;  %1530 = vmatpush1.bf16.msra.mxu0 %v8908_v21  ;;  %v342_v29 = vrot.slane %v304_v18, 7  ;;  %v8916_v31 = vld [vmem:[#allocation6 + $0x4e4] ss:$16 sps:$4 sm:$0xff]   ;;  %v8920_v34 = vld [vmem:[#allocation6 + $0x4e0] ss:$16 sps:$4 sm:$0xff]  }
  0xa6   : > { %362 = vrot.lane.b32.xlu0 %v338_v6, %s10439_s24  ;;  %1659 = vmatpush1.bf16.msra.mxu1 %v8909_v22  ;;  %v8915_v28 = vld [vmem:[#allocation6 + $0x4c8] ss:$16 sps:$4 sm:$0xff]   ;;  %v344_v32 = vrot.slane %v305_v25, 7  ;;  %v8918_v33 = vld [vmem:[#allocation6 + $0x4ec] ss:$16 sps:$4 sm:$0xff]   ;;  %321 = vst.msk [vmem:[#allocation2 + $0x20] sm:$0xff] %vm320_vm4, %v10438_v1 }
  0xa7   : > { %1531 = vmatprep.subr.bf16.mxu0 %v8910_v23  ;;  %1660 = vmatprep.subr.bf16.mxu1 %v8912_v24  ;;  %v8921_v35 = vld [vmem:[#allocation6 + $0x4e8] ss:$16 sps:$4 sm:$0xff]   ;;  %v343_v36 = vsel %vm333_vm3, %v336_v27, %v342_v29  ;;  %v8922_v37 = vld [vmem:[#allocation6 + $0x504] ss:$16 sps:$4 sm:$0xff]   ;;  %v8924_v39 = vld [vmem:[#allocation6 + $0x50c] ss:$16 sps:$4 sm:$0xff]  }
  0xa8   : > { %364 = vrot.lane.b32.xlu1 %v340_v9, %s10439_s24  ;;  %v345_v38 = vsel %vm333_vm3, %v337_v30, %v344_v32  ;;  %v8926_v40 = vld [vmem:[#allocation6 + $0x500] ss:$16 sps:$4 sm:$0xff]   ;;  %v8927_v41 = vld [vmem:[#allocation6 + $0x508] ss:$16 sps:$4 sm:$0xff]   ;;  %v8928_v42 = vld [vmem:[#allocation6 + $0x524] ss:$16 sps:$4 sm:$0xff]  }
  0xa9   : > { %1532 = vmatpush1.bf16.msra.mxu0 %v8914_v26  ;;  %v8930_v43 = vld [vmem:[#allocation6 + $0x52c] ss:$16 sps:$4 sm:$0xff]   ;;  %v8932_v44 = vld [vmem:[#allocation6 + $0x520] ss:$16 sps:$4 sm:$0xff]   ;;  %v8933_v45 = vld [vmem:[#allocation6 + $0x528] ss:$16 sps:$4 sm:$0xff]  }
  0xaa   : > { %350 = vrot.lane.b32.xlu0 %v336_v27, %s10439_s24  ;;  %1661 = vmatpush1.bf16.msra.mxu1 %v8915_v28  ;;  %v8934_v46 = vld [vmem:[#allocation6 + $0x544] ss:$16 sps:$4 sm:$0xff]   ;;  %v8936_v47 = vld [vmem:[#allocation6 + $0x54c] ss:$16 sps:$4 sm:$0xff]   ;;  %v8938_v48 = vld [vmem:[#allocation6 + $0x540] ss:$16 sps:$4 sm:$0xff]  }
  0xab   : > { %1533 = vmatprep.subr.bf16.mxu0 %v8916_v31  ;;  %1662 = vmatprep.subr.bf16.mxu1 %v8918_v33  ;;  %v8939_v49 = vld [vmem:[#allocation6 + $0x548] ss:$16 sps:$4 sm:$0xff]   ;;  %v8940_v50 = vld [vmem:[#allocation6 + $0x564] ss:$16 sps:$4 sm:$0xff]   ;;  %v8942_v51 = vld [vmem:[#allocation6 + $0x56c] ss:$16 sps:$4 sm:$0xff]  }
  0xac   : > { %352 = vrot.lane.b32.xlu1 %v337_v30, %s10439_s24  ;;  %v8944_v52 = vld [vmem:[#allocation6 + $0x560] ss:$16 sps:$4 sm:$0xff]   ;;  %v8945_v53 = vld [vmem:[#allocation6 + $0x568] ss:$16 sps:$4 sm:$0xff]   ;;  %v8946_v54 = vld [vmem:[#allocation6 + $0x584] ss:$16 sps:$4 sm:$0xff]  }
  0xad   : > { %1534 = vmatpush1.bf16.msra.mxu0 %v8920_v34  ;;  %v8948_v55 = vld [vmem:[#allocation6 + $0x58c] ss:$16 sps:$4 sm:$0xff]   ;;  %v8950_v56 = vld [vmem:[#allocation6 + $0x580] ss:$16 sps:$4 sm:$0xff]   ;;  %v8951_v57 = vld [vmem:[#allocation6 + $0x588] ss:$16 sps:$4 sm:$0xff]  }
  0xae   : > { %358 = vrot.lane.b32.xlu0 %v343_v36, %s10439_s24  ;;  %1663 = vmatpush1.bf16.msra.mxu1 %v8921_v35  ;;  %v8952_v58 = vld [vmem:[#allocation6 + $0x5a4] ss:$16 sps:$4 sm:$0xff]   ;;  %v8954_v59 = vld [vmem:[#allocation6 + $0x5ac] ss:$16 sps:$4 sm:$0xff]   ;;  %v8956_v60 = vld [vmem:[#allocation6 + $0x5a0] ss:$16 sps:$4 sm:$0xff]  }
  0xaf   : > { %1535 = vmatprep.subr.bf16.mxu0 %v8922_v37  ;;  %1664 = vmatprep.subr.bf16.mxu1 %v8924_v39  ;;  %v8957_v61 = vld [vmem:[#allocation6 + $0x5a8] ss:$16 sps:$4 sm:$0xff]   ;;  %v8958_v62 = vld [vmem:[#allocation6 + $0x5c4] ss:$16 sps:$4 sm:$0xff]   ;;  %v8960_v63 = vld [vmem:[#allocation6 + $0x5cc] ss:$16 sps:$4 sm:$0xff]  }
  0xb0   : > { %360 = vrot.lane.b32.xlu1 %v345_v38, %s10439_s24  ;;  %v8962_v2 = vld [vmem:[#allocation6 + $0x5c0] ss:$16 sps:$4 sm:$0xff]   ;;  %v8963_v3 = vld [vmem:[#allocation6 + $0x5c8] ss:$16 sps:$4 sm:$0xff]   ;;  %v8964_v4 = vld [vmem:[#allocation6 + $0x5e4] ss:$16 sps:$4 sm:$0xff]  }
  0xb1   : > { %1536 = vmatpush1.bf16.msra.mxu0 %v8926_v40  ;;  %v8966_v5 = vld [vmem:[#allocation6 + $0x5ec] ss:$16 sps:$4 sm:$0xff]   ;;  %v8968_v6 = vld [vmem:[#allocation6 + $0x5e0] ss:$16 sps:$4 sm:$0xff]   ;;  %322 = vst.msk [vmem:[#allocation2 + $0x48] sm:$0xff] %vm320_vm4, %v10438_v1  ;;  %vm323_vm5 = vcmask 517376  }
  0xb2   : > { %366 = vrot.lane.b32.xlu0 %v342_v29, %s10439_s24  ;;  %1665 = vmatpush1.bf16.msra.mxu1 %v8927_v41  ;;  %v8969_v7 = vld [vmem:[#allocation6 + $0x5e8] ss:$16 sps:$4 sm:$0xff]   ;;  %v8970_v8 = vld [vmem:[#allocation6 + $0x604] ss:$16 sps:$4 sm:$0xff]   ;;  %v8972_v9 = vld [vmem:[#allocation6 + $0x60c] ss:$16 sps:$4 sm:$0xff]  }
  0xb3   : > { %1537 = vmatprep.subr.bf16.mxu0 %v8928_v42  ;;  %1666 = vmatprep.subr.bf16.mxu1 %v8930_v43  ;;  %v8974_v10 = vld [vmem:[#allocation6 + $0x600] ss:$16 sps:$4 sm:$0xff]   ;;  %v8975_v11 = vld [vmem:[#allocation6 + $0x608] ss:$16 sps:$4 sm:$0xff]   ;;  %v8976_v12 = vld [vmem:[#allocation6 + $0x624] ss:$16 sps:$4 sm:$0xff]  }
  0xb4   : > { %368 = vrot.lane.b32.xlu1 %v344_v32, %s10439_s24  ;;  %v8978_v13 = vld [vmem:[#allocation6 + $0x62c] ss:$16 sps:$4 sm:$0xff]   ;;  %v8980_v14 = vld [vmem:[#allocation6 + $0x620] ss:$16 sps:$4 sm:$0xff]   ;;  %324 = vst.msk [vmem:[#allocation2 + $0x70] sm:$0x3] %vm323_vm5, %v10438_v1 }
  0xb5   : > { %1538 = vmatpush1.bf16.msra.mxu0 %v8932_v44  ;;  %v8981_v15 = vld [vmem:[#allocation6 + $0x628] ss:$16 sps:$4 sm:$0xff]   ;;  %v8982_v16 = vld [vmem:[#allocation6 + $0x644] ss:$16 sps:$4 sm:$0xff]   ;;  %v8984_v17 = vld [vmem:[#allocation6 + $0x64c] ss:$16 sps:$4 sm:$0xff]  }
  0xb6   : > { %1667 = vmatpush1.bf16.msra.mxu1 %v8933_v45  ;;  %1539 = vmatprep.subr.bf16.mxu0 %v8934_v46  ;;  %v8986_v18 = vld [vmem:[#allocation6 + $0x640] ss:$16 sps:$4 sm:$0xff]   ;;  %v8987_v19 = vld [vmem:[#allocation6 + $0x648] ss:$16 sps:$4 sm:$0xff]   ;;  %v8988_v20 = vld [vmem:[#allocation6 + $0x664] ss:$16 sps:$4 sm:$0xff]  }
  0xb7   : > { %1668 = vmatprep.subr.bf16.mxu1 %v8936_v47  ;;  %v8990_v21 = vld [vmem:[#allocation6 + $0x66c] ss:$16 sps:$4 sm:$0xff]   ;;  %v8992_v22 = vld [vmem:[#allocation6 + $0x660] ss:$16 sps:$4 sm:$0xff]   ;;  %v8993_v23 = vld [vmem:[#allocation6 + $0x668] ss:$16 sps:$4 sm:$0xff]  }
  0xb8   : > { %v8996_v1 = vld [vmem:[#allocation6 + $0x684] ss:$16 sps:$4 sm:$0xff]   ;;  %v8999_v24 = vld [vmem:[#allocation6 + $0x68c] ss:$16 sps:$4 sm:$0xff]   ;;  %vm394_vm6 = vcmask 1047809   ;;  %vm401_vm7 = vcmask 1047808  }
  0xb9   : > { %1540 = vmatpush1.bf16.msra.mxu0 %v8938_v48  ;;  %vm407_vm8 = vcmask 1040640   ;;  %vm399_vm9 = vcmask 261121   ;;  %vm412_vm10 = vcmask 253952   ;;  %vm738_vm11 = vsmask.f32 7424  ;;  %s10894_s26 = scalar_lea.vmem [#allocation12], %s7786_s29 }
  0xba   : > { %1669 = vmatpush1.bf16.msra.mxu1 %v8939_v49  ;;  %1541 = vmatprep.subr.bf16.mxu0 %v8940_v50  ;;  %vm1523_vm12 = vcmask 523264   ;;  %vm2941_vm13 = vcmask 1046528   ;;  %s7664_s9 = sshll.u32 %s10894_s26, 4  ;;  %s8674_s11 = sshll.u32 %s10494_s22, 10  ;;  %s10903_s9 = int_to_ptr.vmem [resolvable:$true] %s7664_s9 }
  0xbb   : > { %1670 = vmatprep.subr.bf16.mxu1 %v8942_v51  ;;  %s10915_s8 = scalar_lea.hbm %s10967_s5, %s8674_s11  ;;  %s7651_s27 = scalar_lea.sflag [#allocation5], %s10683_s16 }
  0xbc   : > { %s10353_s30 = scalar_lea.vmem %s10903_s9, 1024  ;;  %s10441_s7 = smov [#allocation12]  }
  0xbd   : > { %1542 = vmatpush1.bf16.msra.mxu0 %v8944_v52  ;;  %p10354_p3 = scmp.ne.s32.totalorder %s10903_s9, %s10353_s30  ;;  %s10357_s10 = sshll.u32 %s10441_s7, 4  ;;  %s10358_s10 = int_to_ptr.vmem [resolvable:$false] %s10357_s10 }
  0xbe   : > { %1671 = vmatpush1.bf16.msra.mxu1 %v8945_v53  ;;  %1543 = vmatprep.subr.bf16.mxu0 %v8946_v54  ;;  %s10359_s13 = scalar_lea.vmem %s10358_s10, 2048  ;;  %p10360_p11 = scmp.lt.s32.totalorder %s10903_s9, %s10358_s10 }
  0xbf   : > { %1672 = vmatprep.subr.bf16.mxu1 %v8948_v55  ;;  %p10355_p5 = pnand %p10354_p3, %p10631_p0  ;;  %p10361_p2 = scmp.lt.s32.totalorder %s10359_s13, %s10353_s30 }
  0xc1   : > { %1544 = vmatpush1.bf16.msra.mxu0 %v8950_v56  ;;  %p10356_p7 = pneg %p10355_p5  ;;  %p10362_p1 = por %p10361_p2, %p10360_p11 }
  0xc2   : > { %1673 = vmatpush1.bf16.msra.mxu1 %v8951_v57  ;;  %1545 = vmatprep.subr.bf16.mxu0 %v8952_v58 }
  0xc3   : > { %1674 = vmatprep.subr.bf16.mxu1 %v8954_v59  ;;  %p10363_p12 = pnand %p10362_p1, %p10356_p7 }
  0xc5   : > { %1546 = vmatpush1.bf16.msra.mxu0 %v8956_v60 }
  0xc6   : > { %1675 = vmatpush1.bf16.msra.mxu1 %v8957_v61  ;;  %1547 = vmatprep.subr.bf16.mxu0 %v8958_v62 }
  0xc7   : > { %1676 = vmatprep.subr.bf16.mxu1 %v8960_v63 }
  0xc9   : > { %1548 = vmatpush1.bf16.msra.mxu0 %v8962_v2 }
  0xca   : > { %1677 = vmatpush1.bf16.msra.mxu1 %v8963_v3  ;;  %1549 = vmatprep.subr.bf16.mxu0 %v8964_v4 }
  0xcb   : > { %1678 = vmatprep.subr.bf16.mxu1 %v8966_v5  ;;  %v8994_v5 = vld [vmem:[#allocation6 + $0x680] ss:$16 sps:$4 sm:$0xff]  }
  0xcd   : > { %1550 = vmatpush1.bf16.msra.mxu0 %v8968_v6 }
  0xce   : > { %1679 = vmatpush1.bf16.msra.mxu1 %v8969_v7  ;;  %1551 = vmatprep.subr.bf16.mxu0 %v8970_v8  ;;  %v8997_v7 = vld [vmem:[#allocation6 + $0x688] ss:$16 sps:$4 sm:$0xff]  }
  0xcf   : > { %1680 = vmatprep.subr.bf16.mxu1 %v8972_v9 }
  0xd1   : > { %1552 = vmatpush1.bf16.msra.mxu0 %v8974_v10  ;;  %v9002_v10 = vld [vmem:[#allocation6 + $0x6a4] ss:$16 sps:$4 sm:$0xff]  }
  0xd2   : > { %1681 = vmatpush1.bf16.msra.mxu1 %v8975_v11  ;;  %1553 = vmatprep.subr.bf16.mxu0 %v8976_v12  ;;  %v9005_v11 = vld [vmem:[#allocation6 + $0x6ac] ss:$16 sps:$4 sm:$0xff]  }
  0xd3   : > { %1682 = vmatprep.subr.bf16.mxu1 %v8978_v13 }
  0xd5   : > { %1554 = vmatpush1.bf16.msra.mxu0 %v8980_v14  ;;  %v9000_v14 = vld [vmem:[#allocation6 + $0x6a0] ss:$16 sps:$4 sm:$0xff]  }
  0xd6   : > { %1683 = vmatpush1.bf16.msra.mxu1 %v8981_v15  ;;  %1555 = vmatprep.subr.bf16.mxu0 %v8982_v16  ;;  %v9003_v15 = vld [vmem:[#allocation6 + $0x6a8] ss:$16 sps:$4 sm:$0xff]   ;;  %v9008_v16 = vld [vmem:[#allocation6 + $0x6c4] ss:$16 sps:$4 sm:$0xff]  }
  0xd7   : > { %1684 = vmatprep.subr.bf16.mxu1 %v8984_v17  ;;  %v9011_v17 = vld [vmem:[#allocation6 + $0x6cc] ss:$16 sps:$4 sm:$0xff]  }
  0xd9   : > { %1556 = vmatpush1.bf16.msra.mxu0 %v8986_v18 }
  0xda   : > { %1685 = vmatpush1.bf16.msra.mxu1 %v8987_v19  ;;  %1557 = vmatprep.subr.bf16.mxu0 %v8988_v20 }
  0xdb   : > { %1686 = vmatprep.subr.bf16.mxu1 %v8990_v21  ;;  %v9006_v21 = vld [vmem:[#allocation6 + $0x6c0] ss:$16 sps:$4 sm:$0xff]  }
  0xdd   : > { %1558 = vmatpush1.bf16.msra.mxu0 %v8992_v22  ;;  %v9009_v22 = vld [vmem:[#allocation6 + $0x6c8] ss:$16 sps:$4 sm:$0xff]  }
  0xde   : > { %1687 = vmatpush1.bf16.msra.mxu1 %v8993_v23  ;;  %1570 = vmatprep.subr.bf16.mxu0 %v8996_v1  ;;  %v9014_v1 = vld [vmem:[#allocation6 + $0x6e4] ss:$16 sps:$4 sm:$0xff]  }
  0xdf   : > { %1699 = vmatprep.subr.bf16.mxu1 %v8999_v24  ;;  %v9017_v24 = vld [vmem:[#allocation6 + $0x6ec] ss:$16 sps:$4 sm:$0xff]  }
 0x110   : > { %v347_v25 = vpop.permute.xlu0 %346 }
 0x111   : > { %395 = vst.msk [vmem:[#allocation2] sm:$0xfe] %vm394_vm6, %v347_v25 }
 0x112   : > { %v355_v26 = vpop.permute.xlu1 %354 }
 0x113   : > { %402 = vst.msk [vmem:[#allocation2 + $0x28] sm:$0xff] %vm401_vm7, %v355_v26 }
 0x114   : > { %v349_v27 = vpop.permute.xlu0 %348 }
 0x115   : > { %v370_v28 = vsel %vm315_vm0, %v347_v25, %v349_v27 }
 0x116   : > { %v357_v29 = vpop.permute.xlu1 %356  ;;  %396 = vst [vmem:[#allocation2 + $0x8] sm:$0xfe] %v370_v28  ;;  %v9015_v28 = vld [vmem:[#allocation6 + $0x6e8] ss:$16 sps:$4 sm:$0xff]  }
 0x117   : > { %v10746_v37 = vsel %vm315_vm0, %v355_v26, %v357_v29 }
 0x118   : > { %v363_v30 = vpop.permute.xlu0 %362  ;;  %v573_v33 = vld [vmem:[#allocation2] sm:$0xfe] }
 0x119   : > { %408 = vst.msk [vmem:[#allocation2 + $0x50] sm:$0x1] %vm407_vm8, %v363_v30 }
 0x11a   : > { %v365_v31 = vpop.permute.xlu1 %364  ;;  %v419_v32 = vld [vmem:[#allocation2 + $0x28] sm:$0xff] }
 0x11b   : > { %v376_v34 = vsel %vm315_vm0, %v363_v30, %v365_v31  ;;  %v583_v36 = vpack.c.bf16 %v419_v32, %v573_v33  ;;  %v9020_v30 = vld [vmem:[#allocation6 + $0x704] ss:$16 sps:$4 sm:$0xff]   ;;  %v9018_v33 = vld [vmem:[#allocation6 + $0x700] ss:$16 sps:$4 sm:$0xff]  }
 0x11c   : > { %409 = vst [vmem:[#allocation2 + $0x58] sm:$0x1] %v376_v34  ;;  %v351_v35 = vpop.permute.xlu0 %350  ;;  %v9021_v34 = vld [vmem:[#allocation6 + $0x708] ss:$16 sps:$4 sm:$0xff]  }
 0x11d   : > { %v371_v38 = vsel %vm315_vm0, %v349_v27, %v351_v35  ;;  %v574_v39 = vld [vmem:[#allocation2 + $0x8] sm:$0xfe]  ;;  %v742_v46 = vshll.u32 %v583_v36, 16  ;;  %v740_v61 = vshrl.u32 %v583_v36, 16  ;;  %v9029_v36 = vld [vmem:[#allocation6 + $0x72c] ss:$16 sps:$4 sm:$0xff]  }
 0x11e   : > { %v353_v40 = vpop.permute.xlu1 %352  ;;  %397 = vst [vmem:[#allocation2 + $0x10] sm:$0xfe] %v371_v38  ;;  %v584_v41 = vpack.c.bf16 %v10746_v37, %v574_v39  ;;  %v9012_v27 = vld [vmem:[#allocation6 + $0x6e0] ss:$16 sps:$4 sm:$0xff]   ;;  %v9027_v39 = vld [vmem:[#allocation6 + $0x728] ss:$16 sps:$4 sm:$0xff]  }
 0x11f   : > { %v372_v42 = vsel %vm315_vm0, %v351_v35, %v353_v40  ;;  %400 = vst.msk [vmem:[#allocation2 + $0x20] sm:$0xfe] %vm399_vm9, %v353_v40  ;;  %v744_v55 = vrot.slane %v742_v46, 1  ;;  %v9026_v35 = vld [vmem:[#allocation6 + $0x724] ss:$16 sps:$4 sm:$0xff]  }
 0x120   : > { %398 = vst [vmem:[#allocation2 + $0x18] sm:$0xfe] %v372_v42  ;;  %v359_v43 = vpop.permute.xlu0 %358  ;;  %v754_v44 = vshll.u32 %v584_v41, 16  ;;  %v578_v45 = vld [vmem:[#allocation2 + $0x50] sm:$0x1]  ;;  %v752_v58 = vshrl.u32 %v584_v41, 16 }
 0x121   : > { %v10753_v47 = vsel %vm315_vm0, %v357_v29, %v359_v43  ;;  %v588_v48 = vpack.c.bf16 %v578_v45, %v578_v45  ;;  %v745_v8 = vor.u32 %v744_v55, %v740_v61  ;;  %v9024_v38 = vld [vmem:[#allocation6 + $0x720] ss:$16 sps:$4 sm:$0xff]   ;;  %v9032_v40 = vld [vmem:[#allocation6 + $0x744] ss:$16 sps:$4 sm:$0xff]   ;;  %v9035_v41 = vld [vmem:[#allocation6 + $0x74c] ss:$16 sps:$4 sm:$0xff]  }
 0x122   : > { %v361_v49 = vpop.permute.xlu1 %360  ;;  %v756_v52 = vrot.slane %v754_v44, 1  ;;  %v9030_v42 = vld [vmem:[#allocation6 + $0x740] ss:$16 sps:$4 sm:$0xff]   ;;  %v9038_v44 = vld [vmem:[#allocation6 + $0x764] ss:$16 sps:$4 sm:$0xff]  }
 0x123   : > { %v579_v50 = vld [vmem:[#allocation2 + $0x58] sm:$0x1]  ;;  %406 = vst.msk [vmem:[#allocation2 + $0x48] sm:$0xff] %vm315_vm0, %v361_v49  ;;  %v747_v53 = vshll.u32 %v588_v48, 16  ;;  %v10757_v56 = vsel %vm315_vm0, %v359_v43, %v361_v49  ;;  %v9033_v43 = vld [vmem:[#allocation6 + $0x748] ss:$16 sps:$4 sm:$0xff]  }
 0x124   : > { %v589_v51 = vpack.c.bf16 %v579_v50, %v579_v50  ;;  %v367_v54 = vpop.permute.xlu0 %366  ;;  %v757_v3 = vor.u32 %v756_v52, %v752_v58  ;;  %v9041_v45 = vld [vmem:[#allocation6 + $0x76c] ss:$16 sps:$4 sm:$0xff]   ;;  %v9036_v46 = vld [vmem:[#allocation6 + $0x760] ss:$16 sps:$4 sm:$0xff]   ;;  %v9039_v48 = vld [vmem:[#allocation6 + $0x768] ss:$16 sps:$4 sm:$0xff]  }
 0x125   : > { %v377_v57 = vsel %vm315_vm0, %v365_v31, %v367_v54  ;;  %v749_v62 = vrot.slane %v747_v53, 1  ;;  %v9023_v31 = vld [vmem:[#allocation6 + $0x70c] ss:$16 sps:$4 sm:$0xff]   ;;  %v9044_v49 = vld [vmem:[#allocation6 + $0x784] ss:$16 sps:$4 sm:$0xff]  }
 0x126   : > { %v759_v59 = vshll.u32 %v589_v51, 16  ;;  %v369_v60 = vpop.permute.xlu1 %368  ;;  %410 = vst [vmem:[#allocation2 + $0x60] sm:$0x1] %v377_v57  ;;  %v9047_v50 = vld [vmem:[#allocation6 + $0x78c] ss:$16 sps:$4 sm:$0xff]  }
 0x127   : > { %v378_v63 = vsel %vm315_vm0, %v367_v54, %v369_v60  ;;  %413 = vst.msk [vmem:[#allocation2 + $0x70] sm:$0x1] %vm412_vm10, %v369_v60  ;;  %v576_v2 = vld [vmem:[#allocation2 + $0x18] sm:$0xfe]  ;;  %v750_v13 = vsel %vm738_vm11, %v745_v8, %v749_v62  ;;  %v9045_v52 = vld [vmem:[#allocation6 + $0x788] ss:$16 sps:$4 sm:$0xff]  }
 0x128   : > { %v761_v4 = vrot.slane %v759_v59, 1  ;;  %411 = vst [vmem:[#allocation2 + $0x68] sm:$0x1] %v378_v63  ;;  %v586_v6 = vpack.c.bf16 %v10757_v56, %v576_v2  ;;  %v9042_v51 = vld [vmem:[#allocation6 + $0x780] ss:$16 sps:$4 sm:$0xff]  }
 0x129   : > { %v9050_v53 = vld [vmem:[#allocation6 + $0x7a4] ss:$16 sps:$4 sm:$0xff]   ;;  %v9053_v54 = vld [vmem:[#allocation6 + $0x7ac] ss:$16 sps:$4 sm:$0xff]   ;;  %v9048_v55 = vld [vmem:[#allocation6 + $0x7a0] ss:$16 sps:$4 sm:$0xff]  }
 0x12a   : > { %v762_v9 = vsel %vm738_vm11, %v757_v3, %v761_v4  ;;  %v778_v12 = vshll.u32 %v586_v6, 16  ;;  %v776_v18 = vshrl.u32 %v586_v6, 16  ;;  %v9051_v57 = vld [vmem:[#allocation6 + $0x7a8] ss:$16 sps:$4 sm:$0xff]   ;;  %v9056_v58 = vld [vmem:[#allocation6 + $0x7c4] ss:$16 sps:$4 sm:$0xff]  }
 0x12b   : > { %1559 = vmatprep.mubr.bf16.mxu0 %v762_v9  ;;  %1688 = vmatprep.mubr.bf16.mxu1 %v762_v9  ;;  %v9059_v59 = vld [vmem:[#allocation6 + $0x7cc] ss:$16 sps:$4 sm:$0xff]   ;;  %v9054_v60 = vld [vmem:[#allocation6 + $0x7c0] ss:$16 sps:$4 sm:$0xff]   ;;  %v9057_v61 = vld [vmem:[#allocation6 + $0x7c8] ss:$16 sps:$4 sm:$0xff]  }
 0x12c   : > { %1560 = vmatmul.mubr.bf16.vlgmr.msra.gmra.mrb[0].mxu0 %v750_v13  ;;  %1689 = vmatmul.mubr.bf16.vlgmr.msra.gmra.mrb[0].mxu1 %v750_v13  ;;  %v780_v19 = vrot.slane %v778_v12, 1  ;;  %v9062_v62 = vld [vmem:[#allocation6 + $0x7e4] ss:$16 sps:$4 sm:$0xff]   ;;  %v9065_v63 = vld [vmem:[#allocation6 + $0x7ec] ss:$16 sps:$4 sm:$0xff]  }
 0x12d   : > { %1571 = vmatpush1.bf16.msra.mxu0 %v8994_v5  ;;  %1700 = vmatpush1.bf16.msra.mxu1 %v8997_v7  ;;  %v9060_v2 = vld [vmem:[#allocation6 + $0x7e0] ss:$16 sps:$4 sm:$0xff]   ;;  %v9063_v3 = vld [vmem:[#allocation6 + $0x7e8] ss:$16 sps:$4 sm:$0xff]   ;;  %v9068_v4 = vld [vmem:[#allocation6 + $0x804] ss:$16 sps:$4 sm:$0xff]  }
 0x12e   : > { %1572 = vmatprep.subr.bf16.mxu0 %v9002_v10  ;;  %1701 = vmatprep.subr.bf16.mxu1 %v9005_v11  ;;  %v781_v25 = vor.u32 %v780_v19, %v776_v18  ;;  %v9071_v5 = vld [vmem:[#allocation6 + $0x80c] ss:$16 sps:$4 sm:$0xff]   ;;  %v9066_v6 = vld [vmem:[#allocation6 + $0x800] ss:$16 sps:$4 sm:$0xff]   ;;  %v9069_v7 = vld [vmem:[#allocation6 + $0x808] ss:$16 sps:$4 sm:$0xff]  }
 0x12f   : > { %v581_v20 = vld [vmem:[#allocation2 + $0x68] sm:$0x1]  ;;  %v9074_v8 = vld [vmem:[#allocation6 + $0x824] ss:$16 sps:$4 sm:$0xff]   ;;  %v9077_v9 = vld [vmem:[#allocation6 + $0x82c] ss:$16 sps:$4 sm:$0xff]  }
 0x130   : > { %v591_v23 = vpack.c.bf16 %v581_v20, %v581_v20  ;;  %v575_v10 = vld [vmem:[#allocation2 + $0x10] sm:$0xfe]  ;;  %v9072_v11 = vld [vmem:[#allocation6 + $0x820] ss:$16 sps:$4 sm:$0xff]   ;;  %v580_v13 = vld [vmem:[#allocation2 + $0x60] sm:$0x1] }
 0x131   : > { %1573 = vmatpush1.bf16.msra.mxu0 %v9000_v14  ;;  %1702 = vmatpush1.bf16.msra.mxu1 %v9003_v15  ;;  %v9075_v12 = vld [vmem:[#allocation6 + $0x828] ss:$16 sps:$4 sm:$0xff]   ;;  %v585_v14 = vpack.c.bf16 %v10753_v47, %v575_v10  ;;  %v9080_v15 = vld [vmem:[#allocation6 + $0x844] ss:$16 sps:$4 sm:$0xff]   ;;  %v590_v19 = vpack.c.bf16 %v580_v13, %v580_v13 }
 0x132   : > { %1574 = vmatprep.subr.bf16.mxu0 %v9008_v16  ;;  %1703 = vmatprep.subr.bf16.mxu1 %v9011_v17  ;;  %v783_v26 = vshll.u32 %v591_v23, 16  ;;  %v9083_v16 = vld [vmem:[#allocation6 + $0x84c] ss:$16 sps:$4 sm:$0xff]   ;;  %v9078_v17 = vld [vmem:[#allocation6 + $0x840] ss:$16 sps:$4 sm:$0xff]  }
 0x133   : > { %v9081_v18 = vld [vmem:[#allocation6 + $0x848] ss:$16 sps:$4 sm:$0xff]   ;;  %v766_v20 = vshll.u32 %v585_v14, 16  ;;  %v9084_v23 = vld [vmem:[#allocation6 + $0x860] ss:$16 sps:$4 sm:$0xff]  }
 0x134   : > { %v785_v29 = vrot.slane %v783_v26, 1  ;;  %v9092_v26 = vld [vmem:[#allocation6 + $0x884] ss:$16 sps:$4 sm:$0xff]   ;;  %v9129_v13 = vld [vmem:[#allocation6 + $0x48] ss:$16 sps:$4 sm:$0xff]  }
 0x135   : > { %1575 = vmatpush1.bf16.msra.mxu0 %v9006_v21  ;;  %1704 = vmatpush1.bf16.msra.mxu1 %v9009_v22  ;;  %v9086_v21 = vld [vmem:[#allocation6 + $0x864] ss:$16 sps:$4 sm:$0xff]   ;;  %v9089_v22 = vld [vmem:[#allocation6 + $0x86c] ss:$16 sps:$4 sm:$0xff]  }
 0x136   : > { %1576 = vmatprep.subr.bf16.mxu0 %v9014_v1  ;;  %1705 = vmatprep.subr.bf16.mxu1 %v9017_v24  ;;  %v786_v32 = vsel %vm738_vm11, %v781_v25, %v785_v29  ;;  %v9087_v1 = vld [vmem:[#allocation6 + $0x868] ss:$16 sps:$4 sm:$0xff]   ;;  %v771_v24 = vshll.u32 %v590_v19, 16  ;;  %v768_v25 = vrot.slane %v766_v20, 1  ;;  %v764_v29 = vshrl.u32 %v585_v14, 16 }
 0x137   : > { %1602 = vmatprep.mubr.bf16.mxu0 %v786_v32  ;;  %1731 = vmatprep.mubr.bf16.mxu1 %v786_v32  ;;  %v9093_v32 = vld [vmem:[#allocation6 + $0x888] ss:$16 sps:$4 sm:$0xff]   ;;  %v9128_v10 = vld [vmem:[#allocation6 + $0x44] ss:$16 sps:$4 sm:$0xff]   ;;  %v9138_v19 = vld [vmem:[#allocation6 + $0x80] ss:$16 sps:$4 sm:$0xff]  }
 0x138   : > { %v9134_v14 = vld [vmem:[#allocation6 + $0x64] ss:$16 sps:$4 sm:$0xff]   ;;  %v9143_v20 = vld [vmem:[#allocation6 + $0x8c] ss:$16 sps:$4 sm:$0xff]  }
 0x139   : > { %1577 = vmatpush1.bf16.msra.mxu0 %v9012_v27  ;;  %1706 = vmatpush1.bf16.msra.mxu1 %v9015_v28  ;;  %v9095_v27 = vld [vmem:[#allocation6 + $0x88c] ss:$16 sps:$4 sm:$0xff]  }
 0x13a   : > { %1578 = vmatprep.subr.bf16.mxu0 %v9020_v30  ;;  %1707 = vmatprep.subr.bf16.mxu1 %v9023_v31  ;;  %v577_v28 = vld [vmem:[#allocation2 + $0x20] sm:$0xfe]  ;;  %v773_v30 = vrot.slane %v771_v24, 1  ;;  %v9090_v31 = vld [vmem:[#allocation6 + $0x880] ss:$16 sps:$4 sm:$0xff]  }
 0x13b   : > { %v9147_v24 = vld [vmem:[#allocation6 + $0xa8] ss:$16 sps:$4 sm:$0xff]  }
 0x13d   : > { %1579 = vmatpush1.bf16.msra.mxu0 %v9018_v33  ;;  %1708 = vmatpush1.bf16.msra.mxu1 %v9021_v34  ;;  %v423_v33 = vld [vmem:[#allocation2 + $0x48] sm:$0xff]  ;;  %v769_v34 = vor.u32 %v768_v25, %v764_v29 }
 0x13e   : > { %1580 = vmatprep.subr.bf16.mxu0 %v9026_v35  ;;  %1709 = vmatprep.subr.bf16.mxu1 %v9029_v36  ;;  %v9098_v35 = vld [vmem:[#allocation6 + $0x8a4] ss:$16 sps:$4 sm:$0xff]   ;;  %v9101_v36 = vld [vmem:[#allocation6 + $0x8ac] ss:$16 sps:$4 sm:$0xff]  }
 0x13f   : > { %v9152_v25 = vld [vmem:[#allocation6 + $0xc4] ss:$16 sps:$4 sm:$0xff]  }
 0x140   : > { %v9158_v29 = vld [vmem:[#allocation6 + $0xe4] ss:$16 sps:$4 sm:$0xff]  }
 0x141   : > { %1581 = vmatpush1.bf16.msra.mxu0 %v9024_v38  ;;  %1710 = vmatpush1.bf16.msra.mxu1 %v9027_v39  ;;  %v774_v38 = vsel %vm738_vm11, %v769_v34, %v773_v30  ;;  %v9096_v39 = vld [vmem:[#allocation6 + $0x8a0] ss:$16 sps:$4 sm:$0xff]   ;;  %v9161_v30 = vld [vmem:[#allocation6 + $0xec] ss:$16 sps:$4 sm:$0xff]  }
 0x142   : > { %1582 = vmatprep.subr.bf16.mxu0 %v9032_v40  ;;  %1711 = vmatprep.subr.bf16.mxu1 %v9035_v41  ;;  %v9099_v40 = vld [vmem:[#allocation6 + $0x8a8] ss:$16 sps:$4 sm:$0xff]   ;;  %v9162_v34 = vld [vmem:[#allocation6 + $0x100] ss:$16 sps:$4 sm:$0xff]  }
 0x143   : > { %v582_v41 = vld [vmem:[#allocation2 + $0x70] sm:$0x1] }
 0x145   : > { %1583 = vmatpush1.bf16.msra.mxu0 %v9030_v42  ;;  %1712 = vmatpush1.bf16.msra.mxu1 %v9033_v43  ;;  %v587_v42 = vpack.c.bf16 %v423_v33, %v577_v28  ;;  %v9104_v43 = vld [vmem:[#allocation6 + $0x8c4] ss:$16 sps:$4 sm:$0xff]   ;;  %v9153_v28 = vld [vmem:[#allocation6 + $0xc8] ss:$16 sps:$4 sm:$0xff]  }
 0x146   : > { %1584 = vmatprep.subr.bf16.mxu0 %v9038_v44  ;;  %1713 = vmatprep.subr.bf16.mxu1 %v9041_v45  ;;  %v9107_v44 = vld [vmem:[#allocation6 + $0x8cc] ss:$16 sps:$4 sm:$0xff]   ;;  %v9102_v45 = vld [vmem:[#allocation6 + $0x8c0] ss:$16 sps:$4 sm:$0xff]   ;;  %v9164_v33 = vld [vmem:[#allocation6 + $0x104] ss:$16 sps:$4 sm:$0xff]  }
 0x149   : > { %1585 = vmatpush1.bf16.msra.mxu0 %v9036_v46  ;;  %1714 = vmatpush1.bf16.msra.mxu1 %v9039_v48  ;;  %v9105_v46 = vld [vmem:[#allocation6 + $0x8c8] ss:$16 sps:$4 sm:$0xff]   ;;  %v10440_v48 = vmov 0  }
 0x14a   : > { %1586 = vmatprep.subr.bf16.mxu0 %v9044_v49  ;;  %1715 = vmatprep.subr.bf16.mxu1 %v9047_v50  ;;  %v592_v49 = vpack.c.bf16 %v582_v41, %v582_v41  ;;  %v790_v50 = vshll.u32 %v587_v42, 16  ;;  %v9171_v41 = vld [vmem:[#allocation6 + $0x128] ss:$16 sps:$4 sm:$0xff]  }
 0x14d   : > { %1587 = vmatpush1.bf16.msra.mxu0 %v9042_v51  ;;  %1716 = vmatpush1.bf16.msra.mxu1 %v9045_v52  ;;  %v9110_v51 = vld [vmem:[#allocation6 + $0x8e4] ss:$16 sps:$4 sm:$0xff]   ;;  %v9113_v52 = vld [vmem:[#allocation6 + $0x8ec] ss:$16 sps:$4 sm:$0xff]  }
 0x14e   : > { %1588 = vmatprep.subr.bf16.mxu0 %v9050_v53  ;;  %1717 = vmatprep.subr.bf16.mxu1 %v9053_v54  ;;  %v788_v53 = vshrl.u32 %v587_v42, 16  ;;  %v792_v54 = vrot.slane %v790_v50, 1  ;;  %v9176_v42 = vld [vmem:[#allocation6 + $0x144] ss:$16 sps:$4 sm:$0xff]   ;;  %v9185_v50 = vld [vmem:[#allocation6 + $0x16c] ss:$16 sps:$4 sm:$0xff]  }
 0x151   : > { %1589 = vmatpush1.bf16.msra.mxu0 %v9048_v55  ;;  %1718 = vmatpush1.bf16.msra.mxu1 %v9051_v57  ;;  %v795_v55 = vshll.u32 %v592_v49, 16  ;;  %v9108_v57 = vld [vmem:[#allocation6 + $0x8e0] ss:$16 sps:$4 sm:$0xff]  }
 0x152   : > { %1590 = vmatprep.subr.bf16.mxu0 %v9056_v58  ;;  %1719 = vmatprep.subr.bf16.mxu1 %v9059_v59  ;;  %v9111_v58 = vld [vmem:[#allocation6 + $0x8e8] ss:$16 sps:$4 sm:$0xff]   ;;  %v9116_v59 = vld [vmem:[#allocation6 + $0x4] ss:$16 sps:$4 sm:$0xff]   ;;  %v9180_v49 = vld [vmem:[#allocation6 + $0x160] ss:$16 sps:$4 sm:$0xff]  }
 0x155   : > { %1591 = vmatpush1.bf16.msra.mxu0 %v9054_v60  ;;  %1720 = vmatpush1.bf16.msra.mxu1 %v9057_v61  ;;  %v9119_v60 = vld [vmem:[#allocation6 + $0xc] ss:$16 sps:$4 sm:$0xff]   ;;  %v793_v61 = vor.u32 %v792_v54, %v788_v53  ;;  %v9186_v53 = vld [vmem:[#allocation6 + $0x180] ss:$16 sps:$4 sm:$0xff]  }
 0x156   : > { %1592 = vmatprep.subr.bf16.mxu0 %v9062_v62  ;;  %1721 = vmatprep.subr.bf16.mxu1 %v9065_v63  ;;  %v797_v62 = vrot.slane %v795_v55, 1  ;;  %v9114_v63 = vld [vmem:[#allocation6] ss:$16 sps:$4 sm:$0xff]   ;;  %v9191_v54 = vld [vmem:[#allocation6 + $0x18c] ss:$16 sps:$4 sm:$0xff]  }
 0x157   : > { %v9189_v55 = vld [vmem:[#allocation6 + $0x188] ss:$16 sps:$4 sm:$0xff]  }
 0x159   : > { %1593 = vmatpush1.bf16.msra.mxu0 %v9060_v2  ;;  %1722 = vmatpush1.bf16.msra.mxu1 %v9063_v3  ;;  %v9117_v2 = vld [vmem:[#allocation6 + $0x8] ss:$16 sps:$4 sm:$0xff]   ;;  %v415_v3 = vld [vmem:[#allocation2 + $0x8] sm:$0xff] }
 0x15a   : > { %1594 = vmatprep.subr.bf16.mxu0 %v9068_v4  ;;  %1723 = vmatprep.subr.bf16.mxu1 %v9071_v5  ;;  %v9122_v4 = vld [vmem:[#allocation6 + $0x24] ss:$16 sps:$4 sm:$0xff]   ;;  %v9125_v5 = vld [vmem:[#allocation6 + $0x2c] ss:$16 sps:$4 sm:$0xff]  }
 0x15d   : > { %1595 = vmatpush1.bf16.msra.mxu0 %v9066_v6  ;;  %1724 = vmatpush1.bf16.msra.mxu1 %v9069_v7  ;;  %v798_v6 = vsel %vm738_vm11, %v793_v61, %v797_v62  ;;  %v425_v7 = vpack.c.bf16 %v10746_v37, %v415_v3  ;;  %v9200_v61 = vld [vmem:[#allocation6 + $0x1c4] ss:$16 sps:$4 sm:$0xff]   ;;  %v9198_v62 = vld [vmem:[#allocation6 + $0x1c0] ss:$16 sps:$4 sm:$0xff]  }
 0x15e   : > { %1596 = vmatprep.subr.bf16.mxu0 %v9074_v8  ;;  %1725 = vmatprep.subr.bf16.mxu1 %v9077_v9  ;;  %v9120_v8 = vld [vmem:[#allocation6 + $0x20] ss:$16 sps:$4 sm:$0xff]   ;;  %v9123_v9 = vld [vmem:[#allocation6 + $0x28] ss:$16 sps:$4 sm:$0xff]   ;;  %v9206_v3 = vld [vmem:[#allocation6 + $0x1e4] ss:$16 sps:$4 sm:$0xff]  }
 0x161   : > { %1597 = vmatpush1.bf16.msra.mxu0 %v9072_v11  ;;  %1726 = vmatpush1.bf16.msra.mxu1 %v9075_v12  ;;  %v9126_v11 = vld [vmem:[#allocation6 + $0x40] ss:$16 sps:$4 sm:$0xff]   ;;  %v9131_v12 = vld [vmem:[#allocation6 + $0x4c] ss:$16 sps:$4 sm:$0xff]  }
 0x162   : > { %1598 = vmatprep.subr.bf16.mxu0 %v9080_v15  ;;  %1727 = vmatprep.subr.bf16.mxu1 %v9083_v16  ;;  %v9132_v15 = vld [vmem:[#allocation6 + $0x60] ss:$16 sps:$4 sm:$0xff]   ;;  %v9137_v16 = vld [vmem:[#allocation6 + $0x6c] ss:$16 sps:$4 sm:$0xff]  }
 0x165   : > { %1599 = vmatpush1.bf16.msra.mxu0 %v9078_v17  ;;  %1728 = vmatpush1.bf16.msra.mxu1 %v9081_v18  ;;  %v9135_v17 = vld [vmem:[#allocation6 + $0x68] ss:$16 sps:$4 sm:$0xff]   ;;  %v9140_v18 = vld [vmem:[#allocation6 + $0x84] ss:$16 sps:$4 sm:$0xff]  }
 0x166   : > { %1600 = vmatprep.subr.bf16.mxu0 %v9086_v21  ;;  %1729 = vmatprep.subr.bf16.mxu1 %v9089_v22  ;;  %v9141_v21 = vld [vmem:[#allocation6 + $0x88] ss:$16 sps:$4 sm:$0xff]   ;;  %v9146_v22 = vld [vmem:[#allocation6 + $0xa4] ss:$16 sps:$4 sm:$0xff]  }
 0x169   : > { %1601 = vmatpush1.bf16.msra.mxu0 %v9084_v23  ;;  %1730 = vmatpush1.bf16.msra.mxu1 %v9087_v1  ;;  %v9149_v23 = vld [vmem:[#allocation6 + $0xac] ss:$16 sps:$4 sm:$0xff]   ;;  %v9144_v1 = vld [vmem:[#allocation6 + $0xa0] ss:$16 sps:$4 sm:$0xff]  }
 0x16a   : > { %1613 = vmatprep.subr.bf16.mxu0 %v9092_v26  ;;  %1742 = vmatprep.subr.bf16.mxu1 %v9095_v27  ;;  %v9155_v26 = vld [vmem:[#allocation6 + $0xcc] ss:$16 sps:$4 sm:$0xff]   ;;  %v9150_v27 = vld [vmem:[#allocation6 + $0xc0] ss:$16 sps:$4 sm:$0xff]  }
 0x16c   : > { %1603 = vmatmul.mubr.bf16.vlgmr.msra.gmra.mrb[0].mxu0 %v774_v38  ;;  %1732 = vmatmul.mubr.bf16.vlgmr.msra.gmra.mrb[0].mxu1 %v774_v38  ;;  %v9170_v38 = vld [vmem:[#allocation6 + $0x124] ss:$16 sps:$4 sm:$0xff]  }
 0x16d   : > { %1614 = vmatpush1.bf16.msra.mxu0 %v9090_v31  ;;  %1743 = vmatpush1.bf16.msra.mxu1 %v9093_v32  ;;  %v9156_v31 = vld [vmem:[#allocation6 + $0xe0] ss:$16 sps:$4 sm:$0xff]   ;;  %v9159_v32 = vld [vmem:[#allocation6 + $0xe8] ss:$16 sps:$4 sm:$0xff]  }
 0x16e   : > { %1615 = vmatprep.subr.bf16.mxu0 %v9098_v35  ;;  %1744 = vmatprep.subr.bf16.mxu1 %v9101_v36  ;;  %v9167_v35 = vld [vmem:[#allocation6 + $0x10c] ss:$16 sps:$4 sm:$0xff]   ;;  %v9165_v36 = vld [vmem:[#allocation6 + $0x108] ss:$16 sps:$4 sm:$0xff]  }
 0x16f   : > { %1645 = vmatprep.mubr.bf16.mxu0 %v10440_v48  ;;  %1774 = vmatprep.mubr.bf16.mxu1 %v10440_v48 }
 0x171   : > { %1616 = vmatpush1.bf16.msra.mxu0 %v9096_v39  ;;  %1745 = vmatpush1.bf16.msra.mxu1 %v9099_v40  ;;  %v9168_v39 = vld [vmem:[#allocation6 + $0x120] ss:$16 sps:$4 sm:$0xff]   ;;  %v9173_v40 = vld [vmem:[#allocation6 + $0x12c] ss:$16 sps:$4 sm:$0xff]  }
 0x172   : > { %1617 = vmatprep.subr.bf16.mxu0 %v9104_v43  ;;  %1746 = vmatprep.subr.bf16.mxu1 %v9107_v44  ;;  %v9179_v43 = vld [vmem:[#allocation6 + $0x14c] ss:$16 sps:$4 sm:$0xff]   ;;  %v9174_v44 = vld [vmem:[#allocation6 + $0x140] ss:$16 sps:$4 sm:$0xff]  }
 0x175   : > { %1618 = vmatpush1.bf16.msra.mxu0 %v9102_v45  ;;  %1747 = vmatpush1.bf16.msra.mxu1 %v9105_v46  ;;  %v9177_v45 = vld [vmem:[#allocation6 + $0x148] ss:$16 sps:$4 sm:$0xff]   ;;  %v9182_v46 = vld [vmem:[#allocation6 + $0x164] ss:$16 sps:$4 sm:$0xff]  }
 0x176   : > { %1619 = vmatprep.subr.bf16.mxu0 %v9110_v51  ;;  %1748 = vmatprep.subr.bf16.mxu1 %v9113_v52  ;;  %v9183_v51 = vld [vmem:[#allocation6 + $0x168] ss:$16 sps:$4 sm:$0xff]   ;;  %v9188_v52 = vld [vmem:[#allocation6 + $0x184] ss:$16 sps:$4 sm:$0xff]  }
 0x179   : > { %1620 = vmatpush1.bf16.msra.mxu0 %v9108_v57  ;;  %1749 = vmatpush1.bf16.msra.mxu1 %v9111_v58  ;;  %v9194_v57 = vld [vmem:[#allocation6 + $0x1a4] ss:$16 sps:$4 sm:$0xff]   ;;  %v9192_v58 = vld [vmem:[#allocation6 + $0x1a0] ss:$16 sps:$4 sm:$0xff]  }
 0x17a   : > { %2508 = vmatprep.subr.bf16.mxu0 %v9116_v59  ;;  %2637 = vmatprep.subr.bf16.mxu1 %v9119_v60  ;;  %v9197_v59 = vld [vmem:[#allocation6 + $0x1ac] ss:$16 sps:$4 sm:$0xff]   ;;  %v9195_v60 = vld [vmem:[#allocation6 + $0x1a8] ss:$16 sps:$4 sm:$0xff]  }
 0x17c   : > { %7936 = vmatmul.mubr.msk.bf16.vlgmr.msra.gmra.mrb[0].mxu0 %vm1523_vm12, %v798_v6  ;;  %7937 = vmatmul.mubr.msk.bf16.vlgmr.msra.gmra.mrb[0].mxu1 %vm1523_vm12, %v798_v6  ;;  %v9207_v6 = vld [vmem:[#allocation6 + $0x1e8] ss:$16 sps:$4 sm:$0xff]  }
 0x17d   : > { %2509 = vmatpush1.bf16.msra.mxu0 %v9114_v63  ;;  %2540 = vmatprep.mubr.bf16.mxu0 %v425_v7  ;;  %v9203_v63 = vld [vmem:[#allocation6 + $0x1cc] ss:$16 sps:$4 sm:$0xff]  }
 0x17e   : > { %2638 = vmatpush1.bf16.msra.mxu1 %v9117_v2  ;;  %2669 = vmatprep.mubr.bf16.mxu1 %v425_v7  ;;  %v9201_v2 = vld [vmem:[#allocation6 + $0x1c8] ss:$16 sps:$4 sm:$0xff]  }
 0x17f   : > { %2510 = vmatprep.subr.bf16.mxu0 %v9122_v4  ;;  %2639 = vmatprep.subr.bf16.mxu1 %v9125_v5  ;;  %v9204_v4 = vld [vmem:[#allocation6 + $0x1e0] ss:$16 sps:$4 sm:$0xff]   ;;  %v9209_v5 = vld [vmem:[#allocation6 + $0x1ec] ss:$16 sps:$4 sm:$0xff]  }
 0x180   : > { %v414_v7 = vld [vmem:[#allocation2] sm:$0xff] }
 0x181   : > { %2511 = vmatpush1.bf16.msra.mxu0 %v9120_v8  ;;  %v9212_v8 = vld [vmem:[#allocation6 + $0x204] ss:$16 sps:$4 sm:$0xff]  }
 0x182   : > { %2640 = vmatpush1.bf16.msra.mxu1 %v9123_v9  ;;  %2512 = vmatprep.subr.bf16.mxu0 %v9128_v10  ;;  %v9210_v9 = vld [vmem:[#allocation6 + $0x200] ss:$16 sps:$4 sm:$0xff]   ;;  %v9215_v10 = vld [vmem:[#allocation6 + $0x20c] ss:$16 sps:$4 sm:$0xff]  }
 0x183   : > { %2641 = vmatprep.subr.bf16.mxu1 %v9131_v12  ;;  %v10194_v12 = vld [vmem:[#allocation2 + $0x28] sm:$0xff] }
 0x185   : > { %2513 = vmatpush1.bf16.msra.mxu0 %v9126_v11  ;;  %v417_v11 = vld [vmem:[#allocation2 + $0x18] sm:$0xff] }
 0x186   : > { %2642 = vmatpush1.bf16.msra.mxu1 %v9129_v13  ;;  %2514 = vmatprep.subr.bf16.mxu0 %v9134_v14  ;;  %v424_v13 = vpack.c.bf16 %v10194_v12, %v414_v7  ;;  %v9213_v14 = vld [vmem:[#allocation6 + $0x208] ss:$16 sps:$4 sm:$0xff]   ;;  %v9293_v7 = vld [vmem:[#allocation6 + $0x3ac] ss:$16 sps:$4 sm:$0xff]  }
 0x187   : > { %2643 = vmatprep.subr.bf16.mxu1 %v9137_v16  ;;  %v9216_v16 = vld [vmem:[#allocation6 + $0x220] ss:$16 sps:$4 sm:$0xff]   ;;  %v9297_v12 = vld [vmem:[#allocation6 + $0x3c8] ss:$16 sps:$4 sm:$0xff]  }
 0x189   : > { %2515 = vmatpush1.bf16.msra.mxu0 %v9132_v15  ;;  %v9218_v15 = vld [vmem:[#allocation6 + $0x224] ss:$16 sps:$4 sm:$0xff]  }
 0x18a   : > { %2644 = vmatpush1.bf16.msra.mxu1 %v9135_v17  ;;  %2516 = vmatprep.subr.bf16.mxu0 %v9140_v18  ;;  %v9221_v17 = vld [vmem:[#allocation6 + $0x22c] ss:$16 sps:$4 sm:$0xff]   ;;  %v427_v18 = vpack.c.bf16 %v10757_v56, %v417_v11 }
 0x18b   : > { %2645 = vmatprep.subr.bf16.mxu1 %v9143_v20  ;;  %v9224_v20 = vld [vmem:[#allocation6 + $0x244] ss:$16 sps:$4 sm:$0xff]   ;;  %v9299_v11 = vld [vmem:[#allocation6 + $0x3cc] ss:$16 sps:$4 sm:$0xff]  }
 0x18d   : > { %2517 = vmatpush1.bf16.msra.mxu0 %v9138_v19  ;;  %v9219_v19 = vld [vmem:[#allocation6 + $0x228] ss:$16 sps:$4 sm:$0xff]  }
 0x18e   : > { %2646 = vmatpush1.bf16.msra.mxu1 %v9141_v21  ;;  %2518 = vmatprep.subr.bf16.mxu0 %v9146_v22  ;;  %v9222_v21 = vld [vmem:[#allocation6 + $0x240] ss:$16 sps:$4 sm:$0xff]   ;;  %v9227_v22 = vld [vmem:[#allocation6 + $0x24c] ss:$16 sps:$4 sm:$0xff]  }
 0x18f   : > { %2647 = vmatprep.subr.bf16.mxu1 %v9149_v23  ;;  %v9225_v23 = vld [vmem:[#allocation6 + $0x248] ss:$16 sps:$4 sm:$0xff]  }
 0x191   : > { %2519 = vmatpush1.bf16.msra.mxu0 %v9144_v1  ;;  %v9230_v1 = vld [vmem:[#allocation6 + $0x264] ss:$16 sps:$4 sm:$0xff]  }
 0x192   : > { %2648 = vmatpush1.bf16.msra.mxu1 %v9147_v24  ;;  %2520 = vmatprep.subr.bf16.mxu0 %v9152_v25  ;;  %v9228_v24 = vld [vmem:[#allocation6 + $0x260] ss:$16 sps:$4 sm:$0xff]   ;;  %v9233_v25 = vld [vmem:[#allocation6 + $0x26c] ss:$16 sps:$4 sm:$0xff]  }
 0x193   : > { %2649 = vmatprep.subr.bf16.mxu1 %v9155_v26  ;;  %v9231_v26 = vld [vmem:[#allocation6 + $0x268] ss:$16 sps:$4 sm:$0xff]  }
 0x195   : > { %2521 = vmatpush1.bf16.msra.mxu0 %v9150_v27  ;;  %v9236_v27 = vld [vmem:[#allocation6 + $0x284] ss:$16 sps:$4 sm:$0xff]  }
 0x196   : > { %2650 = vmatpush1.bf16.msra.mxu1 %v9153_v28  ;;  %2522 = vmatprep.subr.bf16.mxu0 %v9158_v29  ;;  %v9234_v28 = vld [vmem:[#allocation6 + $0x280] ss:$16 sps:$4 sm:$0xff]   ;;  %v9239_v29 = vld [vmem:[#allocation6 + $0x28c] ss:$16 sps:$4 sm:$0xff]  }
 0x197   : > { %2651 = vmatprep.subr.bf16.mxu1 %v9161_v30  ;;  %v9237_v30 = vld [vmem:[#allocation6 + $0x288] ss:$16 sps:$4 sm:$0xff]  }
 0x199   : > { %2523 = vmatpush1.bf16.msra.mxu0 %v9156_v31  ;;  %v9242_v31 = vld [vmem:[#allocation6 + $0x2a4] ss:$16 sps:$4 sm:$0xff]  }
 0x19a   : > { %2652 = vmatpush1.bf16.msra.mxu1 %v9159_v32  ;;  %2524 = vmatprep.subr.bf16.mxu0 %v9164_v33  ;;  %v9245_v32 = vld [vmem:[#allocation6 + $0x2ac] ss:$16 sps:$4 sm:$0xff]   ;;  %v9240_v33 = vld [vmem:[#allocation6 + $0x2a0] ss:$16 sps:$4 sm:$0xff]  }
 0x19b   : > { %2653 = vmatprep.subr.bf16.mxu1 %v9167_v35  ;;  %v9248_v35 = vld [vmem:[#allocation6 + $0x2c4] ss:$16 sps:$4 sm:$0xff]  }
 0x19d   : > { %2525 = vmatpush1.bf16.msra.mxu0 %v9162_v34  ;;  %v9243_v34 = vld [vmem:[#allocation6 + $0x2a8] ss:$16 sps:$4 sm:$0xff]  }
 0x19e   : > { %2654 = vmatpush1.bf16.msra.mxu1 %v9165_v36  ;;  %2526 = vmatprep.subr.bf16.mxu0 %v9170_v38  ;;  %v9251_v36 = vld [vmem:[#allocation6 + $0x2cc] ss:$16 sps:$4 sm:$0xff]   ;;  %v9246_v38 = vld [vmem:[#allocation6 + $0x2c0] ss:$16 sps:$4 sm:$0xff]  }
 0x19f   : > { %2655 = vmatprep.subr.bf16.mxu1 %v9173_v40  ;;  %v9254_v40 = vld [vmem:[#allocation6 + $0x2e4] ss:$16 sps:$4 sm:$0xff]  }
 0x1a1   : > { %2527 = vmatpush1.bf16.msra.mxu0 %v9168_v39  ;;  %v9249_v39 = vld [vmem:[#allocation6 + $0x2c8] ss:$16 sps:$4 sm:$0xff]  }
 0x1a2   : > { %2656 = vmatpush1.bf16.msra.mxu1 %v9171_v41  ;;  %2528 = vmatprep.subr.bf16.mxu0 %v9176_v42  ;;  %v9252_v41 = vld [vmem:[#allocation6 + $0x2e0] ss:$16 sps:$4 sm:$0xff]   ;;  %v9257_v42 = vld [vmem:[#allocation6 + $0x2ec] ss:$16 sps:$4 sm:$0xff]  }
 0x1a3   : > { %2657 = vmatprep.subr.bf16.mxu1 %v9179_v43  ;;  %v9255_v43 = vld [vmem:[#allocation6 + $0x2e8] ss:$16 sps:$4 sm:$0xff]  }
 0x1a5   : > { %2529 = vmatpush1.bf16.msra.mxu0 %v9174_v44  ;;  %v9260_v44 = vld [vmem:[#allocation6 + $0x304] ss:$16 sps:$4 sm:$0xff]  }
 0x1a6   : > { %2658 = vmatpush1.bf16.msra.mxu1 %v9177_v45  ;;  %2530 = vmatprep.subr.bf16.mxu0 %v9182_v46  ;;  %v9258_v45 = vld [vmem:[#allocation6 + $0x300] ss:$16 sps:$4 sm:$0xff]   ;;  %v9263_v46 = vld [vmem:[#allocation6 + $0x30c] ss:$16 sps:$4 sm:$0xff]  }
 0x1a7   : > { %2659 = vmatprep.subr.bf16.mxu1 %v9185_v50  ;;  %v9266_v50 = vld [vmem:[#allocation6 + $0x324] ss:$16 sps:$4 sm:$0xff]  }
 0x1a9   : > { %2531 = vmatpush1.bf16.msra.mxu0 %v9180_v49  ;;  %v9261_v49 = vld [vmem:[#allocation6 + $0x308] ss:$16 sps:$4 sm:$0xff]  }
 0x1aa   : > { %2660 = vmatpush1.bf16.msra.mxu1 %v9183_v51  ;;  %2532 = vmatprep.subr.bf16.mxu0 %v9188_v52  ;;  %v9264_v51 = vld [vmem:[#allocation6 + $0x320] ss:$16 sps:$4 sm:$0xff]   ;;  %v9269_v52 = vld [vmem:[#allocation6 + $0x32c] ss:$16 sps:$4 sm:$0xff]  }
 0x1ab   : > { %2661 = vmatprep.subr.bf16.mxu1 %v9191_v54  ;;  %v9272_v54 = vld [vmem:[#allocation6 + $0x344] ss:$16 sps:$4 sm:$0xff]  }
 0x1ad   : > { %2533 = vmatpush1.bf16.msra.mxu0 %v9186_v53  ;;  %v9267_v53 = vld [vmem:[#allocation6 + $0x328] ss:$16 sps:$4 sm:$0xff]  }
 0x1ae   : > { %2662 = vmatpush1.bf16.msra.mxu1 %v9189_v55  ;;  %2534 = vmatprep.subr.bf16.mxu0 %v9194_v57  ;;  %v9270_v55 = vld [vmem:[#allocation6 + $0x340] ss:$16 sps:$4 sm:$0xff]   ;;  %v9275_v57 = vld [vmem:[#allocation6 + $0x34c] ss:$16 sps:$4 sm:$0xff]  }
 0x1af   : > { %2663 = vmatprep.subr.bf16.mxu1 %v9197_v59  ;;  %v9278_v59 = vld [vmem:[#allocation6 + $0x364] ss:$16 sps:$4 sm:$0xff]  }
 0x1b1   : > { %2535 = vmatpush1.bf16.msra.mxu0 %v9192_v58  ;;  %v9273_v58 = vld [vmem:[#allocation6 + $0x348] ss:$16 sps:$4 sm:$0xff]  }
 0x1b2   : > { %2664 = vmatpush1.bf16.msra.mxu1 %v9195_v60  ;;  %2536 = vmatprep.subr.bf16.mxu0 %v9200_v61  ;;  %v9276_v60 = vld [vmem:[#allocation6 + $0x360] ss:$16 sps:$4 sm:$0xff]   ;;  %v9281_v61 = vld [vmem:[#allocation6 + $0x36c] ss:$16 sps:$4 sm:$0xff]  }
 0x1b3   : > { %2665 = vmatprep.subr.bf16.mxu1 %v9203_v63  ;;  %v9284_v63 = vld [vmem:[#allocation6 + $0x384] ss:$16 sps:$4 sm:$0xff]  }
 0x1b5   : > { %2537 = vmatpush1.bf16.msra.mxu0 %v9198_v62  ;;  %v9279_v62 = vld [vmem:[#allocation6 + $0x368] ss:$16 sps:$4 sm:$0xff]  }
 0x1b6   : > { %2666 = vmatpush1.bf16.msra.mxu1 %v9201_v2  ;;  %2538 = vmatprep.subr.bf16.mxu0 %v9206_v3  ;;  %v9282_v2 = vld [vmem:[#allocation6 + $0x380] ss:$16 sps:$4 sm:$0xff]   ;;  %v9287_v3 = vld [vmem:[#allocation6 + $0x38c] ss:$16 sps:$4 sm:$0xff]  }
 0x1b7   : > { %2667 = vmatprep.subr.bf16.mxu1 %v9209_v5  ;;  %v9290_v5 = vld [vmem:[#allocation6 + $0x3a4] ss:$16 sps:$4 sm:$0xff]  }
 0x1b9   : > { %2539 = vmatpush1.bf16.msra.mxu0 %v9204_v4  ;;  %v9285_v4 = vld [vmem:[#allocation6 + $0x388] ss:$16 sps:$4 sm:$0xff]  }
 0x1ba   : > { %2668 = vmatpush1.bf16.msra.mxu1 %v9207_v6  ;;  %2551 = vmatprep.subr.bf16.mxu0 %v9212_v8  ;;  %v9288_v6 = vld [vmem:[#allocation6 + $0x3a0] ss:$16 sps:$4 sm:$0xff]   ;;  %v9291_v8 = vld [vmem:[#allocation6 + $0x3a8] ss:$16 sps:$4 sm:$0xff]  }
 0x1bb   : > { %2680 = vmatprep.subr.bf16.mxu1 %v9215_v10  ;;  %v9294_v10 = vld [vmem:[#allocation6 + $0x3c0] ss:$16 sps:$4 sm:$0xff]  }
 0x1bc   : > { %2541 = vmatmul.mubr.bf16.vlgmr.msra.gmra.mrb[0].mxu0 %v424_v13 }
 0x1bd   : > { %2670 = vmatmul.mubr.bf16.vlgmr.msra.gmra.mrb[0].mxu1 %v424_v13  ;;  %2552 = vmatpush1.bf16.msra.mxu0 %v9210_v9  ;;  %v9296_v9 = vld [vmem:[#allocation6 + $0x3c4] ss:$16 sps:$4 sm:$0xff]  }
 0x1be   : > { %2583 = vmatprep.mubr.bf16.mxu0 %v427_v18  ;;  %2681 = vmatpush1.bf16.msra.mxu1 %v9213_v14  ;;  %v9302_v13 = vld [vmem:[#allocation6 + $0x3e4] ss:$16 sps:$4 sm:$0xff]   ;;  %v9300_v14 = vld [vmem:[#allocation6 + $0x3e0] ss:$16 sps:$4 sm:$0xff]  }
 0x1bf   : > { %2712 = vmatprep.mubr.bf16.mxu1 %v427_v18  ;;  %2553 = vmatprep.subr.bf16.mxu0 %v9218_v15  ;;  %v9305_v15 = vld [vmem:[#allocation6 + $0x3ec] ss:$16 sps:$4 sm:$0xff]   ;;  %v9308_v18 = vld [vmem:[#allocation6 + $0x404] ss:$16 sps:$4 sm:$0xff]  }
 0x1c0   : > { %2682 = vmatprep.subr.bf16.mxu1 %v9221_v17  ;;  %v416_v17 = vld [vmem:[#allocation2 + $0x10] sm:$0xff] }
 0x1c1   : > { %2554 = vmatpush1.bf16.msra.mxu0 %v9216_v16  ;;  %v9303_v16 = vld [vmem:[#allocation6 + $0x3e8] ss:$16 sps:$4 sm:$0xff]  }
 0x1c2   : > { %2683 = vmatpush1.bf16.msra.mxu1 %v9219_v19  ;;  %2555 = vmatprep.subr.bf16.mxu0 %v9224_v20  ;;  %v9306_v19 = vld [vmem:[#allocation6 + $0x400] ss:$16 sps:$4 sm:$0xff]   ;;  %v9311_v20 = vld [vmem:[#allocation6 + $0x40c] ss:$16 sps:$4 sm:$0xff]  }
 0x1c3   : > { %2684 = vmatprep.subr.bf16.mxu1 %v9227_v22  ;;  %v9309_v22 = vld [vmem:[#allocation6 + $0x408] ss:$16 sps:$4 sm:$0xff]  }
 0x1c5   : > { %2556 = vmatpush1.bf16.msra.mxu0 %v9222_v21  ;;  %v426_v21 = vpack.c.bf16 %v10753_v47, %v416_v17  ;;  %v9380_v17 = vld [vmem:[#allocation6 + $0xa04] ss:$16 sps:$4 sm:$0xff]  }
 0x1c6   : > { %2685 = vmatpush1.bf16.msra.mxu1 %v9225_v23  ;;  %2557 = vmatprep.subr.bf16.mxu0 %v9230_v1  ;;  %v9314_v23 = vld [vmem:[#allocation6 + $0x424] ss:$16 sps:$4 sm:$0xff]   ;;  %v9312_v1 = vld [vmem:[#allocation6 + $0x420] ss:$16 sps:$4 sm:$0xff]  }
 0x1c7   : > { %2686 = vmatprep.subr.bf16.mxu1 %v9233_v25  ;;  %v9315_v25 = vld [vmem:[#allocation6 + $0x428] ss:$16 sps:$4 sm:$0xff]  }
 0x1c9   : > { %2558 = vmatpush1.bf16.msra.mxu0 %v9228_v24  ;;  %v9317_v24 = vld [vmem:[#allocation6 + $0x42c] ss:$16 sps:$4 sm:$0xff]  }
 0x1ca   : > { %2687 = vmatpush1.bf16.msra.mxu1 %v9231_v26  ;;  %2559 = vmatprep.subr.bf16.mxu0 %v9236_v27  ;;  %v9320_v26 = vld [vmem:[#allocation6 + $0x444] ss:$16 sps:$4 sm:$0xff]   ;;  %v9318_v27 = vld [vmem:[#allocation6 + $0x440] ss:$16 sps:$4 sm:$0xff]  }
 0x1cb   : > { %2688 = vmatprep.subr.bf16.mxu1 %v9239_v29  ;;  %v9321_v29 = vld [vmem:[#allocation6 + $0x448] ss:$16 sps:$4 sm:$0xff]  }
 0x1cd   : > { %2560 = vmatpush1.bf16.msra.mxu0 %v9234_v28  ;;  %v9323_v28 = vld [vmem:[#allocation6 + $0x44c] ss:$16 sps:$4 sm:$0xff]  }
 0x1ce   : > { %2689 = vmatpush1.bf16.msra.mxu1 %v9237_v30  ;;  %2561 = vmatprep.subr.bf16.mxu0 %v9242_v31  ;;  %v9326_v30 = vld [vmem:[#allocation6 + $0x464] ss:$16 sps:$4 sm:$0xff]  }
 0x1cf   : > { %2690 = vmatprep.subr.bf16.mxu1 %v9245_v32  ;;  %v2767_v31 = vld [vmem:[#allocation2 + $0x8] sm:$0xfc]  ;;  %v2772_v32 = vld [vmem:[#allocation2 + $0x58] sm:$0x3] }
 0x1d1   : > { %2562 = vmatpush1.bf16.msra.mxu0 %v9240_v33  ;;  %v9324_v33 = vld [vmem:[#allocation6 + $0x460] ss:$16 sps:$4 sm:$0xff]  }
 0x1d2   : > { %2691 = vmatpush1.bf16.msra.mxu1 %v9243_v34  ;;  %2563 = vmatprep.subr.bf16.mxu0 %v9248_v35  ;;  %v9329_v34 = vld [vmem:[#allocation6 + $0x46c] ss:$16 sps:$4 sm:$0xff]   ;;  %v2782_v35 = vpack.c.bf16 %v2772_v32, %v2772_v32  ;;  %v9404_v32 = vld [vmem:[#allocation6 + $0xa84] ss:$16 sps:$4 sm:$0xff]  }
 0x1d3   : > { %2692 = vmatprep.subr.bf16.mxu1 %v9251_v36  ;;  %v9327_v36 = vld [vmem:[#allocation6 + $0x468] ss:$16 sps:$4 sm:$0xff]  }
 0x1d5   : > { %2564 = vmatpush1.bf16.msra.mxu0 %v9246_v38  ;;  %v418_v38 = vld [vmem:[#allocation2 + $0x20] sm:$0xff] }
 0x1d6   : > { %2693 = vmatpush1.bf16.msra.mxu1 %v9249_v39  ;;  %2565 = vmatprep.subr.bf16.mxu0 %v9254_v40  ;;  %v9332_v39 = vld [vmem:[#allocation6 + $0x904] ss:$16 sps:$4 sm:$0xff]   ;;  %v9330_v40 = vld [vmem:[#allocation6 + $0x900] ss:$16 sps:$4 sm:$0xff]  }
 0x1d7   : > { %2694 = vmatprep.subr.bf16.mxu1 %v9257_v42  ;;  %v2777_v42 = vpack.c.bf16 %v10746_v37, %v2767_v31  ;;  %v9336_v37 = vld [vmem:[#allocation6 + $0x920] ss:$16 sps:$4 sm:$0xff]   ;;  %v9399_v31 = vld [vmem:[#allocation6 + $0xa68] ss:$16 sps:$4 sm:$0xff]  }
 0x1d9   : > { %2566 = vmatpush1.bf16.msra.mxu0 %v9252_v41  ;;  %v9335_v41 = vld [vmem:[#allocation6 + $0x90c] ss:$16 sps:$4 sm:$0xff]  }
 0x1da   : > { %2695 = vmatpush1.bf16.msra.mxu1 %v9255_v43  ;;  %2567 = vmatprep.subr.bf16.mxu0 %v9260_v44  ;;  %v9333_v43 = vld [vmem:[#allocation6 + $0x908] ss:$16 sps:$4 sm:$0xff]   ;;  %v2946_v44 = vrot.slane %v2782_v35, 1 }
 0x1db   : > { %2696 = vmatprep.subr.bf16.mxu1 %v9263_v46  ;;  %v10195_v46 = vld [vmem:[#allocation2 + $0x48] sm:$0xff]  ;;  %v9405_v35 = vld [vmem:[#allocation6 + $0xa88] ss:$16 sps:$4 sm:$0xff]  }
 0x1dd   : > { %2568 = vmatpush1.bf16.msra.mxu0 %v9258_v45  ;;  %v9338_v45 = vld [vmem:[#allocation6 + $0x924] ss:$16 sps:$4 sm:$0xff]  }
 0x1de   : > { %2697 = vmatpush1.bf16.msra.mxu1 %v9261_v49  ;;  %2569 = vmatprep.subr.bf16.mxu0 %v9266_v50  ;;  %v428_v49 = vpack.c.bf16 %v10195_v46, %v418_v38  ;;  %v2945_v50 = vrot.slane %v2777_v42, 1  ;;  %v9413_v38 = vld [vmem:[#allocation6 + $0xaac] ss:$16 sps:$4 sm:$0xff]   ;;  %v9422_v46 = vld [vmem:[#allocation6 + $0xae4] ss:$16 sps:$4 sm:$0xff]  }
 0x1df   : > { %2698 = vmatprep.subr.bf16.mxu1 %v9269_v52  ;;  %v9419_v42 = vld [vmem:[#allocation6 + $0xacc] ss:$16 sps:$4 sm:$0xff]  }
 0x1e0   : > { %v2947_v52 = vsel %vm2941_vm13, %v2945_v50, %v2946_v44  ;;  %v9414_v44 = vld [vmem:[#allocation6 + $0xac0] ss:$16 sps:$4 sm:$0xff]  }
 0x1e1   : > { %2570 = vmatpush1.bf16.msra.mxu0 %v9264_v51  ;;  %v9341_v51 = vld [vmem:[#allocation6 + $0x92c] ss:$16 sps:$4 sm:$0xff]   ;;  %v2769_v50 = vld [vmem:[#allocation2 + $0x18] sm:$0xfc] }
 0x1e2   : > { %2699 = vmatpush1.bf16.msra.mxu1 %v9267_v53  ;;  %2571 = vmatprep.subr.bf16.mxu0 %v9272_v54  ;;  %v9339_v53 = vld [vmem:[#allocation6 + $0x928] ss:$16 sps:$4 sm:$0xff]   ;;  %v9344_v54 = vld [vmem:[#allocation6 + $0x944] ss:$16 sps:$4 sm:$0xff]  }
 0x1e3   : > { %2700 = vmatprep.subr.bf16.mxu1 %v9275_v57  ;;  %v9347_v57 = vld [vmem:[#allocation6 + $0x94c] ss:$16 sps:$4 sm:$0xff]  }
 0x1e5   : > { %2572 = vmatpush1.bf16.msra.mxu0 %v9270_v55  ;;  %v9342_v55 = vld [vmem:[#allocation6 + $0x940] ss:$16 sps:$4 sm:$0xff]  }
 0x1e6   : > { %2701 = vmatpush1.bf16.msra.mxu1 %v9273_v58  ;;  %2573 = vmatprep.subr.bf16.mxu0 %v9278_v59  ;;  %v9345_v58 = vld [vmem:[#allocation6 + $0x948] ss:$16 sps:$4 sm:$0xff]   ;;  %v9350_v59 = vld [vmem:[#allocation6 + $0x964] ss:$16 sps:$4 sm:$0xff]  }
 0x1e7   : > { %2702 = vmatprep.subr.bf16.mxu1 %v9281_v61  ;;  %v9353_v61 = vld [vmem:[#allocation6 + $0x96c] ss:$16 sps:$4 sm:$0xff]  }
 0x1e9   : > { %2574 = vmatpush1.bf16.msra.mxu0 %v9276_v60  ;;  %v9348_v60 = vld [vmem:[#allocation6 + $0x960] ss:$16 sps:$4 sm:$0xff]  }
 0x1ea   : > { %2703 = vmatpush1.bf16.msra.mxu1 %v9279_v62  ;;  %2575 = vmatprep.subr.bf16.mxu0 %v9284_v63  ;;  %v9351_v62 = vld [vmem:[#allocation6 + $0x968] ss:$16 sps:$4 sm:$0xff]   ;;  %v9356_v63 = vld [vmem:[#allocation6 + $0x984] ss:$16 sps:$4 sm:$0xff]  }
 0x1eb   : > { %2704 = vmatprep.subr.bf16.mxu1 %v9287_v3  ;;  %v9359_v3 = vld [vmem:[#allocation6 + $0x98c] ss:$16 sps:$4 sm:$0xff]  }
 0x1ed   : > { %2576 = vmatpush1.bf16.msra.mxu0 %v9282_v2  ;;  %v9354_v2 = vld [vmem:[#allocation6 + $0x980] ss:$16 sps:$4 sm:$0xff]  }
 0x1ee   : > { %2705 = vmatpush1.bf16.msra.mxu1 %v9285_v4  ;;  %2577 = vmatprep.subr.bf16.mxu0 %v9290_v5  ;;  %v9357_v4 = vld [vmem:[#allocation6 + $0x988] ss:$16 sps:$4 sm:$0xff]   ;;  %v9362_v5 = vld [vmem:[#allocation6 + $0x9a4] ss:$16 sps:$4 sm:$0xff]  }
 0x1ef   : > { %2706 = vmatprep.subr.bf16.mxu1 %v9293_v7  ;;  %v9360_v7 = vld [vmem:[#allocation6 + $0x9a0] ss:$16 sps:$4 sm:$0xff]  }
 0x1f1   : > { %2578 = vmatpush1.bf16.msra.mxu0 %v9288_v6  ;;  %v9365_v6 = vld [vmem:[#allocation6 + $0x9ac] ss:$16 sps:$4 sm:$0xff]  }
 0x1f2   : > { %2707 = vmatpush1.bf16.msra.mxu1 %v9291_v8  ;;  %2579 = vmatprep.subr.bf16.mxu0 %v9296_v9  ;;  %v9363_v8 = vld [vmem:[#allocation6 + $0x9a8] ss:$16 sps:$4 sm:$0xff]   ;;  %v9368_v9 = vld [vmem:[#allocation6 + $0x9c4] ss:$16 sps:$4 sm:$0xff]  }
 0x1f3   : > { %2708 = vmatprep.subr.bf16.mxu1 %v9299_v11  ;;  %v9366_v11 = vld [vmem:[#allocation6 + $0x9c0] ss:$16 sps:$4 sm:$0xff]  }
 0x1f5   : > { %2580 = vmatpush1.bf16.msra.mxu0 %v9294_v10  ;;  %v9371_v10 = vld [vmem:[#allocation6 + $0x9cc] ss:$16 sps:$4 sm:$0xff]  }
 0x1f6   : > { %2709 = vmatpush1.bf16.msra.mxu1 %v9297_v12  ;;  %2581 = vmatprep.subr.bf16.mxu0 %v9302_v13  ;;  %v9369_v12 = vld [vmem:[#allocation6 + $0x9c8] ss:$16 sps:$4 sm:$0xff]   ;;  %v9374_v13 = vld [vmem:[#allocation6 + $0x9e4] ss:$16 sps:$4 sm:$0xff]  }
 0x1f7   : > { %2710 = vmatprep.subr.bf16.mxu1 %v9305_v15  ;;  %v9372_v15 = vld [vmem:[#allocation6 + $0x9e0] ss:$16 sps:$4 sm:$0xff]  }
 0x1f9   : > { %2582 = vmatpush1.bf16.msra.mxu0 %v9300_v14  ;;  %v9377_v14 = vld [vmem:[#allocation6 + $0x9ec] ss:$16 sps:$4 sm:$0xff]  }
 0x1fa   : > { %2711 = vmatpush1.bf16.msra.mxu1 %v9303_v16  ;;  %2594 = vmatprep.subr.bf16.mxu0 %v9308_v18  ;;  %v9375_v16 = vld [vmem:[#allocation6 + $0x9e8] ss:$16 sps:$4 sm:$0xff]   ;;  %v9383_v18 = vld [vmem:[#allocation6 + $0xa0c] ss:$16 sps:$4 sm:$0xff]  }
 0x1fb   : > { %2723 = vmatprep.subr.bf16.mxu1 %v9311_v20  ;;  %v9381_v20 = vld [vmem:[#allocation6 + $0xa08] ss:$16 sps:$4 sm:$0xff]  }
 0x1fc   : > { %2584 = vmatmul.mubr.bf16.vlgmr.msra.gmra.mrb[0].mxu0 %v426_v21 }
 0x1fd   : > { %2713 = vmatmul.mubr.bf16.vlgmr.msra.gmra.mrb[0].mxu1 %v426_v21  ;;  %2595 = vmatpush1.bf16.msra.mxu0 %v9306_v19  ;;  %v9378_v19 = vld [vmem:[#allocation6 + $0xa00] ss:$16 sps:$4 sm:$0xff]   ;;  %v9386_v21 = vld [vmem:[#allocation6 + $0xa24] ss:$16 sps:$4 sm:$0xff]  }
 0x1fe   : > { %2724 = vmatpush1.bf16.msra.mxu1 %v9309_v22  ;;  %2596 = vmatprep.subr.bf16.mxu0 %v9314_v23  ;;  %v9389_v22 = vld [vmem:[#allocation6 + $0xa2c] ss:$16 sps:$4 sm:$0xff]   ;;  %v9384_v23 = vld [vmem:[#allocation6 + $0xa20] ss:$16 sps:$4 sm:$0xff]  }
 0x1ff   : > { %2725 = vmatprep.subr.bf16.mxu1 %v9317_v24  ;;  %2626 = vmatprep.mubr.bf16.mxu0 %v10440_v48  ;;  %v9392_v24 = vld [vmem:[#allocation6 + $0xa44] ss:$16 sps:$4 sm:$0xff]  }
 0x200   : > { %2755 = vmatprep.mubr.bf16.mxu1 %v10440_v48 }
 0x201   : > { %2597 = vmatpush1.bf16.msra.mxu0 %v9312_v1  ;;  %v9387_v1 = vld [vmem:[#allocation6 + $0xa28] ss:$16 sps:$4 sm:$0xff]  }
 0x202   : > { %2726 = vmatpush1.bf16.msra.mxu1 %v9315_v25  ;;  %2598 = vmatprep.subr.bf16.mxu0 %v9320_v26  ;;  %v9395_v25 = vld [vmem:[#allocation6 + $0xa4c] ss:$16 sps:$4 sm:$0xff]   ;;  %v9390_v26 = vld [vmem:[#allocation6 + $0xa40] ss:$16 sps:$4 sm:$0xff]  }
 0x203   : > { %2727 = vmatprep.subr.bf16.mxu1 %v9323_v28  ;;  %v9398_v28 = vld [vmem:[#allocation6 + $0xa64] ss:$16 sps:$4 sm:$0xff]  }
 0x205   : > { %2599 = vmatpush1.bf16.msra.mxu0 %v9318_v27  ;;  %v9393_v27 = vld [vmem:[#allocation6 + $0xa48] ss:$16 sps:$4 sm:$0xff]  }
 0x206   : > { %2728 = vmatpush1.bf16.msra.mxu1 %v9321_v29  ;;  %2600 = vmatprep.subr.bf16.mxu0 %v9326_v30  ;;  %v9401_v29 = vld [vmem:[#allocation6 + $0xa6c] ss:$16 sps:$4 sm:$0xff]   ;;  %v9396_v30 = vld [vmem:[#allocation6 + $0xa60] ss:$16 sps:$4 sm:$0xff]  }
 0x207   : > { %2729 = vmatprep.subr.bf16.mxu1 %v9329_v34  ;;  %v9402_v34 = vld [vmem:[#allocation6 + $0xa80] ss:$16 sps:$4 sm:$0xff]  }
 0x209   : > { %2601 = vmatpush1.bf16.msra.mxu0 %v9324_v33  ;;  %v9407_v33 = vld [vmem:[#allocation6 + $0xa8c] ss:$16 sps:$4 sm:$0xff]  }
 0x20a   : > { %2730 = vmatpush1.bf16.msra.mxu1 %v9327_v36  ;;  %3684 = vmatprep.subr.bf16.mxu0 %v9332_v39  ;;  %v9410_v36 = vld [vmem:[#allocation6 + $0xaa4] ss:$16 sps:$4 sm:$0xff]   ;;  %v9408_v39 = vld [vmem:[#allocation6 + $0xaa0] ss:$16 sps:$4 sm:$0xff]  }
 0x20b   : > { %3813 = vmatprep.subr.bf16.mxu1 %v9335_v41  ;;  %v9416_v41 = vld [vmem:[#allocation6 + $0xac4] ss:$16 sps:$4 sm:$0xff]  }
 0x20c   : > { %8082 = vmatmul.mubr.msk.bf16.vlgmr.msra.gmra.mrb[0].mxu0 %vm1523_vm12, %v428_v49 }
 0x20d   : > { %8083 = vmatmul.mubr.msk.bf16.vlgmr.msra.gmra.mrb[0].mxu1 %vm1523_vm12, %v428_v49  ;;  %3685 = vmatpush1.bf16.msra.mxu0 %v9330_v40  ;;  %v9411_v40 = vld [vmem:[#allocation6 + $0xaa8] ss:$16 sps:$4 sm:$0xff]  }
 0x20e   : > { %3716 = vmatprep.mubr.bf16.mxu0 %v2947_v52  ;;  %3814 = vmatpush1.bf16.msra.mxu1 %v9333_v43  ;;  %v2771_v43 = vld [vmem:[#allocation2 + $0x50] sm:$0x3]  ;;  %v2766_v49 = vld [vmem:[#allocation2] sm:$0xfc] }
 0x20f   : > { %3845 = vmatprep.mubr.bf16.mxu1 %v2947_v52  ;;  %3686 = vmatprep.subr.bf16.mxu0 %v9338_v45  ;;  %v9417_v45 = vld [vmem:[#allocation6 + $0xac8] ss:$16 sps:$4 sm:$0xff]   ;;  %v9425_v52 = vld [vmem:[#allocation6 + $0xaec] ss:$16 sps:$4 sm:$0xff]  }
 0x210   : > { %3815 = vmatprep.subr.bf16.mxu1 %v9341_v51  ;;  %v2774_v51 = vld [vmem:[#allocation2 + $0x68] sm:$0x3] }
 0x211   : > { %3687 = vmatpush1.bf16.msra.mxu0 %v9336_v37  ;;  %v9420_v37 = vld [vmem:[#allocation6 + $0xae0] ss:$16 sps:$4 sm:$0xff]  }
 0x212   : > { %3816 = vmatpush1.bf16.msra.mxu1 %v9339_v53  ;;  %3688 = vmatprep.subr.bf16.mxu0 %v9344_v54  ;;  %v2781_v53 = vpack.c.bf16 %v2771_v43, %v2771_v43  ;;  %v9423_v54 = vld [vmem:[#allocation6 + $0xae8] ss:$16 sps:$4 sm:$0xff]   ;;  %v9488_v43 = vld [vmem:[#allocation6 + $0xc44] ss:$16 sps:$4 sm:$0xff]  }
 0x213   : > { %3817 = vmatprep.subr.bf16.mxu1 %v9347_v57  ;;  %v10196_v57 = vld [vmem:[#allocation2 + $0x28] sm:$0xff] }
 0x215   : > { %3689 = vmatpush1.bf16.msra.mxu0 %v9342_v55  ;;  %v9428_v55 = vld [vmem:[#allocation6 + $0xb04] ss:$16 sps:$4 sm:$0xff]  }
 0x216   : > { %3818 = vmatpush1.bf16.msra.mxu1 %v9345_v58  ;;  %3690 = vmatprep.subr.bf16.mxu0 %v9350_v59  ;;  %v2776_v58 = vpack.c.bf16 %v10196_v57, %v2766_v49  ;;  %v9431_v59 = vld [vmem:[#allocation6 + $0xb0c] ss:$16 sps:$4 sm:$0xff]   ;;  %v9494_v49 = vld [vmem:[#allocation6 + $0xc64] ss:$16 sps:$4 sm:$0xff]  }
 0x217   : > { %3819 = vmatprep.subr.bf16.mxu1 %v9353_v61  ;;  %v2784_v61 = vpack.c.bf16 %v2774_v51, %v2774_v51  ;;  %v9492_v51 = vld [vmem:[#allocation6 + $0xc60] ss:$16 sps:$4 sm:$0xff]   ;;  %v9506_v57 = vld [vmem:[#allocation6 + $0xca4] ss:$16 sps:$4 sm:$0xff]  }
 0x219   : > { %3691 = vmatpush1.bf16.msra.mxu0 %v9348_v60  ;;  %v2779_v60 = vpack.c.bf16 %v10757_v56, %v2769_v50  ;;  %v9435_v56 = vld [vmem:[#allocation6 + $0xb28] ss:$16 sps:$4 sm:$0xff]   ;;  %v9497_v50 = vld [vmem:[#allocation6 + $0xc6c] ss:$16 sps:$4 sm:$0xff]  }
 0x21a   : > { %3820 = vmatpush1.bf16.msra.mxu1 %v9351_v62  ;;  %3692 = vmatprep.subr.bf16.mxu0 %v9356_v63  ;;  %v2943_v62 = vrot.slane %v2781_v53, 1  ;;  %v9426_v63 = vld [vmem:[#allocation6 + $0xb00] ss:$16 sps:$4 sm:$0xff]   ;;  %v9503_v53 = vld [vmem:[#allocation6 + $0xc8c] ss:$16 sps:$4 sm:$0xff]  }
 0x21b   : > { %3821 = vmatprep.subr.bf16.mxu1 %v9359_v3  ;;  %v2942_v3 = vrot.slane %v2776_v58, 1  ;;  %v9509_v58 = vld [vmem:[#allocation6 + $0xcac] ss:$16 sps:$4 sm:$0xff]  }
 0x21d   : > { %3693 = vmatpush1.bf16.msra.mxu0 %v9354_v2  ;;  %v9429_v2 = vld [vmem:[#allocation6 + $0xb08] ss:$16 sps:$4 sm:$0xff]  }
 0x21e   : > { %3822 = vmatpush1.bf16.msra.mxu1 %v9357_v4  ;;  %3694 = vmatprep.subr.bf16.mxu0 %v9362_v5  ;;  %v2951_v4 = vrot.slane %v2779_v60, 1  ;;  %v2952_v5 = vrot.slane %v2784_v61, 1  ;;  %v9507_v60 = vld [vmem:[#allocation6 + $0xca8] ss:$16 sps:$4 sm:$0xff]   ;;  %v9512_v61 = vld [vmem:[#allocation6 + $0xcc4] ss:$16 sps:$4 sm:$0xff]  }
 0x21f   : > { %3823 = vmatprep.subr.bf16.mxu1 %v9365_v6  ;;  %v9434_v6 = vld [vmem:[#allocation6 + $0xb24] ss:$16 sps:$4 sm:$0xff]  }
 0x221   : > { %3695 = vmatpush1.bf16.msra.mxu0 %v9360_v7  ;;  %v9437_v7 = vld [vmem:[#allocation6 + $0xb2c] ss:$16 sps:$4 sm:$0xff]  }
 0x222   : > { %3824 = vmatpush1.bf16.msra.mxu1 %v9363_v8  ;;  %3696 = vmatprep.subr.bf16.mxu0 %v9368_v9  ;;  %v2944_v8 = vsel %vm2941_vm13, %v2942_v3, %v2943_v62  ;;  %v9432_v9 = vld [vmem:[#allocation6 + $0xb20] ss:$16 sps:$4 sm:$0xff]   ;;  %v9515_v62 = vld [vmem:[#allocation6 + $0xccc] ss:$16 sps:$4 sm:$0xff]   ;;  %v9513_v3 = vld [vmem:[#allocation6 + $0xcc8] ss:$16 sps:$4 sm:$0xff]  }
 0x223   : > { %3825 = vmatprep.subr.bf16.mxu1 %v9371_v10  ;;  %v9440_v10 = vld [vmem:[#allocation6 + $0xb44] ss:$16 sps:$4 sm:$0xff]  }
 0x225   : > { %3697 = vmatpush1.bf16.msra.mxu0 %v9366_v11  ;;  %v2953_v11 = vsel %vm2941_vm13, %v2951_v4, %v2952_v5  ;;  %v9518_v4 = vld [vmem:[#allocation6 + $0xce4] ss:$16 sps:$4 sm:$0xff]   ;;  %v2768_v5 = vld [vmem:[#allocation2 + $0x10] sm:$0xfc] }
 0x226   : > { %3826 = vmatpush1.bf16.msra.mxu1 %v9369_v12  ;;  %3698 = vmatprep.subr.bf16.mxu0 %v9374_v13  ;;  %v9443_v12 = vld [vmem:[#allocation6 + $0xb4c] ss:$16 sps:$4 sm:$0xff]   ;;  %v9438_v13 = vld [vmem:[#allocation6 + $0xb40] ss:$16 sps:$4 sm:$0xff]  }
 0x227   : > { %3827 = vmatprep.subr.bf16.mxu1 %v9377_v14  ;;  %v9441_v14 = vld [vmem:[#allocation6 + $0xb48] ss:$16 sps:$4 sm:$0xff]  }
 0x229   : > { %3699 = vmatpush1.bf16.msra.mxu0 %v9372_v15  ;;  %v9446_v15 = vld [vmem:[#allocation6 + $0xb64] ss:$16 sps:$4 sm:$0xff]  }
 0x22a   : > { %3828 = vmatpush1.bf16.msra.mxu1 %v9375_v16  ;;  %3700 = vmatprep.subr.bf16.mxu0 %v9380_v17  ;;  %v9449_v16 = vld [vmem:[#allocation6 + $0xb6c] ss:$16 sps:$4 sm:$0xff]   ;;  %v9444_v17 = vld [vmem:[#allocation6 + $0xb60] ss:$16 sps:$4 sm:$0xff]  }
 0x22b   : > { %3829 = vmatprep.subr.bf16.mxu1 %v9383_v18  ;;  %v9447_v18 = vld [vmem:[#allocation6 + $0xb68] ss:$16 sps:$4 sm:$0xff]  }
 0x22d   : > { %3701 = vmatpush1.bf16.msra.mxu0 %v9378_v19  ;;  %v9452_v19 = vld [vmem:[#allocation6 + $0xb84] ss:$16 sps:$4 sm:$0xff]  }
 0x22e   : > { %3830 = vmatpush1.bf16.msra.mxu1 %v9381_v20  ;;  %3702 = vmatprep.subr.bf16.mxu0 %v9386_v21  ;;  %v9455_v20 = vld [vmem:[#allocation6 + $0xb8c] ss:$16 sps:$4 sm:$0xff]   ;;  %v9450_v21 = vld [vmem:[#allocation6 + $0xb80] ss:$16 sps:$4 sm:$0xff]  }
 0x22f   : > { %3831 = vmatprep.subr.bf16.mxu1 %v9389_v22  ;;  %v9453_v22 = vld [vmem:[#allocation6 + $0xb88] ss:$16 sps:$4 sm:$0xff]  }
 0x231   : > { %3703 = vmatpush1.bf16.msra.mxu0 %v9384_v23  ;;  %v9458_v23 = vld [vmem:[#allocation6 + $0xba4] ss:$16 sps:$4 sm:$0xff]  }
 0x232   : > { %3832 = vmatpush1.bf16.msra.mxu1 %v9387_v1  ;;  %3704 = vmatprep.subr.bf16.mxu0 %v9392_v24  ;;  %v9461_v1 = vld [vmem:[#allocation6 + $0xbac] ss:$16 sps:$4 sm:$0xff]   ;;  %v9456_v24 = vld [vmem:[#allocation6 + $0xba0] ss:$16 sps:$4 sm:$0xff]  }
 0x233   : > { %3833 = vmatprep.subr.bf16.mxu1 %v9395_v25  ;;  %v9459_v25 = vld [vmem:[#allocation6 + $0xba8] ss:$16 sps:$4 sm:$0xff]  }
 0x235   : > { %3705 = vmatpush1.bf16.msra.mxu0 %v9390_v26  ;;  %v9464_v26 = vld [vmem:[#allocation6 + $0xbc4] ss:$16 sps:$4 sm:$0xff]  }
 0x236   : > { %3834 = vmatpush1.bf16.msra.mxu1 %v9393_v27  ;;  %3706 = vmatprep.subr.bf16.mxu0 %v9398_v28  ;;  %v9467_v27 = vld [vmem:[#allocation6 + $0xbcc] ss:$16 sps:$4 sm:$0xff]   ;;  %v9462_v28 = vld [vmem:[#allocation6 + $0xbc0] ss:$16 sps:$4 sm:$0xff]  }
 0x237   : > { %3835 = vmatprep.subr.bf16.mxu1 %v9401_v29  ;;  %v9465_v29 = vld [vmem:[#allocation6 + $0xbc8] ss:$16 sps:$4 sm:$0xff]  }
 0x239   : > { %3707 = vmatpush1.bf16.msra.mxu0 %v9396_v30  ;;  %v9470_v30 = vld [vmem:[#allocation6 + $0xbe4] ss:$16 sps:$4 sm:$0xff]  }
 0x23a   : > { %3836 = vmatpush1.bf16.msra.mxu1 %v9399_v31  ;;  %3708 = vmatprep.subr.bf16.mxu0 %v9404_v32  ;;  %v9473_v31 = vld [vmem:[#allocation6 + $0xbec] ss:$16 sps:$4 sm:$0xff]   ;;  %v9468_v32 = vld [vmem:[#allocation6 + $0xbe0] ss:$16 sps:$4 sm:$0xff]  }
 0x23b   : > { %3837 = vmatprep.subr.bf16.mxu1 %v9407_v33  ;;  %v9471_v33 = vld [vmem:[#allocation6 + $0xbe8] ss:$16 sps:$4 sm:$0xff]  }
 0x23d   : > { %3709 = vmatpush1.bf16.msra.mxu0 %v9402_v34  ;;  %v9476_v34 = vld [vmem:[#allocation6 + $0xc04] ss:$16 sps:$4 sm:$0xff]  }
 0x23e   : > { %3838 = vmatpush1.bf16.msra.mxu1 %v9405_v35  ;;  %3710 = vmatprep.subr.bf16.mxu0 %v9410_v36  ;;  %v9479_v35 = vld [vmem:[#allocation6 + $0xc0c] ss:$16 sps:$4 sm:$0xff]   ;;  %v9474_v36 = vld [vmem:[#allocation6 + $0xc00] ss:$16 sps:$4 sm:$0xff]  }
 0x23f   : > { %3839 = vmatprep.subr.bf16.mxu1 %v9413_v38  ;;  %v9477_v38 = vld [vmem:[#allocation6 + $0xc08] ss:$16 sps:$4 sm:$0xff]  }
 0x241   : > { %3711 = vmatpush1.bf16.msra.mxu0 %v9408_v39  ;;  %v9482_v39 = vld [vmem:[#allocation6 + $0xc24] ss:$16 sps:$4 sm:$0xff]  }
 0x242   : > { %3840 = vmatpush1.bf16.msra.mxu1 %v9411_v40  ;;  %3712 = vmatprep.subr.bf16.mxu0 %v9416_v41  ;;  %v9485_v40 = vld [vmem:[#allocation6 + $0xc2c] ss:$16 sps:$4 sm:$0xff]   ;;  %v9480_v41 = vld [vmem:[#allocation6 + $0xc20] ss:$16 sps:$4 sm:$0xff]  }
 0x243   : > { %3841 = vmatprep.subr.bf16.mxu1 %v9419_v42  ;;  %v9483_v42 = vld [vmem:[#allocation6 + $0xc28] ss:$16 sps:$4 sm:$0xff]  }
 0x245   : > { %3713 = vmatpush1.bf16.msra.mxu0 %v9414_v44  ;;  %v9491_v44 = vld [vmem:[#allocation6 + $0xc4c] ss:$16 sps:$4 sm:$0xff]  }
 0x246   : > { %3842 = vmatpush1.bf16.msra.mxu1 %v9417_v45  ;;  %3714 = vmatprep.subr.bf16.mxu0 %v9422_v46  ;;  %v9486_v45 = vld [vmem:[#allocation6 + $0xc40] ss:$16 sps:$4 sm:$0xff]   ;;  %v9489_v46 = vld [vmem:[#allocation6 + $0xc48] ss:$16 sps:$4 sm:$0xff]  }
 0x247   : > { %3843 = vmatprep.subr.bf16.mxu1 %v9425_v52  ;;  %v9495_v52 = vld [vmem:[#allocation6 + $0xc68] ss:$16 sps:$4 sm:$0xff]  }
 0x249   : > { %3715 = vmatpush1.bf16.msra.mxu0 %v9420_v37  ;;  %v9500_v37 = vld [vmem:[#allocation6 + $0xc84] ss:$16 sps:$4 sm:$0xff]  }
 0x24a   : > { %3844 = vmatpush1.bf16.msra.mxu1 %v9423_v54  ;;  %3727 = vmatprep.subr.bf16.mxu0 %v9428_v55  ;;  %v9498_v54 = vld [vmem:[#allocation6 + $0xc80] ss:$16 sps:$4 sm:$0xff]   ;;  %v9501_v55 = vld [vmem:[#allocation6 + $0xc88] ss:$16 sps:$4 sm:$0xff]  }
 0x24b   : > { %3856 = vmatprep.subr.bf16.mxu1 %v9431_v59  ;;  %v9504_v59 = vld [vmem:[#allocation6 + $0xca0] ss:$16 sps:$4 sm:$0xff]  }
 0x24c   : > { %3717 = vmatmul.mubr.bf16.vlgmr.msra.gmra.mrb[0].mxu0 %v2944_v8 }
 0x24d   : > { %3846 = vmatmul.mubr.bf16.vlgmr.msra.gmra.mrb[0].mxu1 %v2944_v8  ;;  %3728 = vmatpush1.bf16.msra.mxu0 %v9426_v63  ;;  %v2773_v63 = vld [vmem:[#allocation2 + $0x60] sm:$0x3]  ;;  %v9516_v8 = vld [vmem:[#allocation6 + $0xce0] ss:$16 sps:$4 sm:$0xff]  }
 0x24e   : > { %3759 = vmatprep.mubr.bf16.mxu0 %v2953_v11  ;;  %3857 = vmatpush1.bf16.msra.mxu1 %v9429_v2  ;;  %v9510_v2 = vld [vmem:[#allocation6 + $0xcc0] ss:$16 sps:$4 sm:$0xff]  }
 0x24f   : > { %3888 = vmatprep.mubr.bf16.mxu1 %v2953_v11  ;;  %3729 = vmatprep.subr.bf16.mxu0 %v9434_v6  ;;  %v9521_v6 = vld [vmem:[#allocation6 + $0xcec] ss:$16 sps:$4 sm:$0xff]  }
 0x250   : > { %3858 = vmatprep.subr.bf16.mxu1 %v9437_v7  ;;  %v2783_v7 = vpack.c.bf16 %v2773_v63, %v2773_v63  ;;  %v9587_v63 = vld [vmem:[#allocation9 + $0x54c] ss:$16 sps:$4 sm:$0xff]  }
 0x251   : > { %3730 = vmatpush1.bf16.msra.mxu0 %v9432_v9  ;;  %v2778_v9 = vpack.c.bf16 %v10753_v47, %v2768_v5  ;;  %v9528_v47 = vld [vmem:[#allocation6 + $0xd20] ss:$16 sps:$4 sm:$0xff]  }
 0x252   : > { %3859 = vmatpush1.bf16.msra.mxu1 %v9435_v56  ;;  %3731 = vmatprep.subr.bf16.mxu0 %v9440_v10  ;;  %v9519_v56 = vld [vmem:[#allocation6 + $0xce8] ss:$16 sps:$4 sm:$0xff]   ;;  %v9524_v10 = vld [vmem:[#allocation6 + $0xd04] ss:$16 sps:$4 sm:$0xff]   ;;  %v2949_v11 = vrot.slane %v2783_v7, 1 }
 0x253   : > { %3860 = vmatprep.subr.bf16.mxu1 %v9443_v12  ;;  %v9527_v12 = vld [vmem:[#allocation6 + $0xd0c] ss:$16 sps:$4 sm:$0xff]   ;;  %v9593_v5 = vld [vmem:[#allocation9 + $0x56c] ss:$16 sps:$4 sm:$0xff]  }
 0x254   : > { %v9591_v7 = vld [vmem:[#allocation9 + $0x568] ss:$16 sps:$4 sm:$0xff]  }
 0x255   : > { %3732 = vmatpush1.bf16.msra.mxu0 %v9438_v13  ;;  %v2948_v13 = vrot.slane %v2778_v9, 1  ;;  %v9599_v9 = vld [vmem:[#allocation9 + $0x58c] ss:$16 sps:$4 sm:$0xff]  }
 0x256   : > { %3861 = vmatpush1.bf16.msra.mxu1 %v9441_v14  ;;  %3733 = vmatprep.subr.bf16.mxu0 %v9446_v15  ;;  %v9522_v14 = vld [vmem:[#allocation6 + $0xd00] ss:$16 sps:$4 sm:$0xff]   ;;  %v9525_v15 = vld [vmem:[#allocation6 + $0xd08] ss:$16 sps:$4 sm:$0xff]  }
 0x257   : > { %3862 = vmatprep.subr.bf16.mxu1 %v9449_v16  ;;  %v9530_v16 = vld [vmem:[#allocation6 + $0xd24] ss:$16 sps:$4 sm:$0xff]  }
 0x259   : > { %3734 = vmatpush1.bf16.msra.mxu0 %v9444_v17  ;;  %v2950_v17 = vsel %vm2941_vm13, %v2948_v13, %v2949_v11  ;;  %v9602_v11 = vld [vmem:[#allocation9 + $0x5a4] ss:$16 sps:$4 sm:$0xff]   ;;  %v9600_v13 = vld [vmem:[#allocation9 + $0x5a0] ss:$16 sps:$4 sm:$0xff]  }
 0x25a   : > { %3863 = vmatpush1.bf16.msra.mxu1 %v9447_v18  ;;  %3735 = vmatprep.subr.bf16.mxu0 %v9452_v19  ;;  %v9533_v18 = vld [vmem:[#allocation6 + $0xd2c] ss:$16 sps:$4 sm:$0xff]   ;;  %v9531_v19 = vld [vmem:[#allocation6 + $0xd28] ss:$16 sps:$4 sm:$0xff]  }
 0x25b   : > { %3864 = vmatprep.subr.bf16.mxu1 %v9455_v20  ;;  %v9536_v20 = vld [vmem:[#allocation6 + $0xd44] ss:$16 sps:$4 sm:$0xff]  }
 0x25d   : > { %3736 = vmatpush1.bf16.msra.mxu0 %v9450_v21  ;;  %v9539_v21 = vld [vmem:[#allocation6 + $0xd4c] ss:$16 sps:$4 sm:$0xff]  }
 0x25e   : > { %3865 = vmatpush1.bf16.msra.mxu1 %v9453_v22  ;;  %3737 = vmatprep.subr.bf16.mxu0 %v9458_v23  ;;  %v2770_v22 = vld [vmem:[#allocation2 + $0x20] sm:$0xfc]  ;;  %v2775_v23 = vld [vmem:[#allocation2 + $0x70] sm:$0x3] }
 0x25f   : > { %3866 = vmatprep.subr.bf16.mxu1 %v9461_v1  ;;  %v9534_v1 = vld [vmem:[#allocation6 + $0xd40] ss:$16 sps:$4 sm:$0xff]  }
 0x261   : > { %3738 = vmatpush1.bf16.msra.mxu0 %v9456_v24  ;;  %v9537_v24 = vld [vmem:[#allocation6 + $0xd48] ss:$16 sps:$4 sm:$0xff]  }
 0x262   : > { %3867 = vmatpush1.bf16.msra.mxu1 %v9459_v25  ;;  %3739 = vmatprep.subr.bf16.mxu0 %v9464_v26  ;;  %v9542_v25 = vld [vmem:[#allocation6 + $0xd64] ss:$16 sps:$4 sm:$0xff]   ;;  %v9545_v26 = vld [vmem:[#allocation6 + $0xd6c] ss:$16 sps:$4 sm:$0xff]  }
 0x263   : > { %3868 = vmatprep.subr.bf16.mxu1 %v9467_v27  ;;  %v10197_v27 = vld [vmem:[#allocation2 + $0x48] sm:$0xff] }
 0x265   : > { %3740 = vmatpush1.bf16.msra.mxu0 %v9462_v28  ;;  %v2780_v28 = vpack.c.bf16 %v10197_v27, %v2770_v22  ;;  %v9609_v22 = vld [vmem:[#allocation9 + $0x5c8] ss:$16 sps:$4 sm:$0xff]   ;;  %v9612_v27 = vld [vmem:[#allocation9 + $0x5e0] ss:$16 sps:$4 sm:$0xff]  }
 0x266   : > { %3869 = vmatpush1.bf16.msra.mxu1 %v9465_v29  ;;  %3741 = vmatprep.subr.bf16.mxu0 %v9470_v30  ;;  %v2785_v29 = vpack.c.bf16 %v2775_v23, %v2775_v23  ;;  %v9540_v30 = vld [vmem:[#allocation6 + $0xd60] ss:$16 sps:$4 sm:$0xff]  }
 0x267   : > { %3870 = vmatprep.subr.bf16.mxu1 %v9473_v31  ;;  %v9543_v31 = vld [vmem:[#allocation6 + $0xd68] ss:$16 sps:$4 sm:$0xff]  }
 0x269   : > { %3742 = vmatpush1.bf16.msra.mxu0 %v9468_v32  ;;  %v2954_v32 = vrot.slane %v2780_v28, 1  ;;  %v9614_v28 = vld [vmem:[#allocation9 + $0x5e4] ss:$16 sps:$4 sm:$0xff]  }
 0x26a   : > { %3871 = vmatpush1.bf16.msra.mxu1 %v9471_v33  ;;  %3743 = vmatprep.subr.bf16.mxu0 %v9476_v34  ;;  %v2955_v33 = vrot.slane %v2785_v29, 1 }
 0x26b   : > { %3872 = vmatprep.subr.bf16.mxu1 %v9479_v35  ;;  %v9546_v35 = vld [vmem:[#allocation9 + $0x480] ss:$16 sps:$4 sm:$0xff]  }
 0x26c   : > { %v2956_v34 = vsel %vm2941_vm13, %v2954_v32, %v2955_v33  ;;  %v9615_v32 = vld [vmem:[#allocation9 + $0x5e8] ss:$16 sps:$4 sm:$0xff]   ;;  %v9617_v33 = vld [vmem:[#allocation9 + $0x5ec] ss:$16 sps:$4 sm:$0xff]  }
 0x26d   : > { %3744 = vmatpush1.bf16.msra.mxu0 %v9474_v36  ;;  %v9548_v36 = vld [vmem:[#allocation9 + $0x484] ss:$16 sps:$4 sm:$0xff]  }
 0x26e   : > { %3873 = vmatpush1.bf16.msra.mxu1 %v9477_v38  ;;  %3745 = vmatprep.subr.bf16.mxu0 %v9482_v39  ;;  %v9549_v38 = vld [vmem:[#allocation9 + $0x488] ss:$16 sps:$4 sm:$0xff]   ;;  %v9551_v39 = vld [vmem:[#allocation9 + $0x48c] ss:$16 sps:$4 sm:$0xff]  }
 0x26f   : > { %3874 = vmatprep.subr.bf16.mxu1 %v9485_v40  ;;  %v9554_v40 = vld [vmem:[#allocation9 + $0x4a4] ss:$16 sps:$4 sm:$0xff]  }
 0x271   : > { %3746 = vmatpush1.bf16.msra.mxu0 %v9480_v41  ;;  %v9557_v41 = vld [vmem:[#allocation9 + $0x4ac] ss:$16 sps:$4 sm:$0xff]  }
 0x272   : > { %3875 = vmatpush1.bf16.msra.mxu1 %v9483_v42  ;;  %3747 = vmatprep.subr.bf16.mxu0 %v9488_v43  ;;  %v9552_v42 = vld [vmem:[#allocation9 + $0x4a0] ss:$16 sps:$4 sm:$0xff]   ;;  %v9555_v43 = vld [vmem:[#allocation9 + $0x4a8] ss:$16 sps:$4 sm:$0xff]  }
 0x273   : > { %3876 = vmatprep.subr.bf16.mxu1 %v9491_v44  ;;  %v9560_v44 = vld [vmem:[#allocation9 + $0x4c4] ss:$16 sps:$4 sm:$0xff]  }
 0x275   : > { %3748 = vmatpush1.bf16.msra.mxu0 %v9486_v45  ;;  %v9563_v45 = vld [vmem:[#allocation9 + $0x4cc] ss:$16 sps:$4 sm:$0xff]  }
 0x276   : > { %3877 = vmatpush1.bf16.msra.mxu1 %v9489_v46  ;;  %3749 = vmatprep.subr.bf16.mxu0 %v9494_v49  ;;  %v9558_v46 = vld [vmem:[#allocation9 + $0x4c0] ss:$16 sps:$4 sm:$0xff]   ;;  %v9561_v49 = vld [vmem:[#allocation9 + $0x4c8] ss:$16 sps:$4 sm:$0xff]  }
 0x277   : > { %3878 = vmatprep.subr.bf16.mxu1 %v9497_v50  ;;  %v9566_v50 = vld [vmem:[#allocation9 + $0x4e4] ss:$16 sps:$4 sm:$0xff]  }
 0x279   : > { %3750 = vmatpush1.bf16.msra.mxu0 %v9492_v51  ;;  %v9569_v51 = vld [vmem:[#allocation9 + $0x4ec] ss:$16 sps:$4 sm:$0xff]  }
 0x27a   : > { %3879 = vmatpush1.bf16.msra.mxu1 %v9495_v52  ;;  %3751 = vmatprep.subr.bf16.mxu0 %v9500_v37  ;;  %v9564_v52 = vld [vmem:[#allocation9 + $0x4e0] ss:$16 sps:$4 sm:$0xff]   ;;  %v9567_v37 = vld [vmem:[#allocation9 + $0x4e8] ss:$16 sps:$4 sm:$0xff]  }
 0x27b   : > { %3880 = vmatprep.subr.bf16.mxu1 %v9503_v53  ;;  %v9572_v53 = vld [vmem:[#allocation9 + $0x504] ss:$16 sps:$4 sm:$0xff]  }
 0x27d   : > { %3752 = vmatpush1.bf16.msra.mxu0 %v9498_v54  ;;  %v9575_v54 = vld [vmem:[#allocation9 + $0x50c] ss:$16 sps:$4 sm:$0xff]  }
 0x27e   : > { %3881 = vmatpush1.bf16.msra.mxu1 %v9501_v55  ;;  %3753 = vmatprep.subr.bf16.mxu0 %v9506_v57  ;;  %v9570_v55 = vld [vmem:[#allocation9 + $0x500] ss:$16 sps:$4 sm:$0xff]   ;;  %v9573_v57 = vld [vmem:[#allocation9 + $0x508] ss:$16 sps:$4 sm:$0xff]  }
 0x27f   : > { %3882 = vmatprep.subr.bf16.mxu1 %v9509_v58  ;;  %v9578_v58 = vld [vmem:[#allocation9 + $0x524] ss:$16 sps:$4 sm:$0xff]  }
 0x281   : > { %3754 = vmatpush1.bf16.msra.mxu0 %v9504_v59  ;;  %v9581_v59 = vld [vmem:[#allocation9 + $0x52c] ss:$16 sps:$4 sm:$0xff]  }
 0x282   : > { %3883 = vmatpush1.bf16.msra.mxu1 %v9507_v60  ;;  %3755 = vmatprep.subr.bf16.mxu0 %v9512_v61  ;;  %v9576_v60 = vld [vmem:[#allocation9 + $0x520] ss:$16 sps:$4 sm:$0xff]   ;;  %v9579_v61 = vld [vmem:[#allocation9 + $0x528] ss:$16 sps:$4 sm:$0xff]  }
 0x283   : > { %3884 = vmatprep.subr.bf16.mxu1 %v9515_v62  ;;  %v9584_v62 = vld [vmem:[#allocation9 + $0x544] ss:$16 sps:$4 sm:$0xff]  }
 0x285   : > { %3756 = vmatpush1.bf16.msra.mxu0 %v9510_v2  ;;  %v9582_v2 = vld [vmem:[#allocation9 + $0x540] ss:$16 sps:$4 sm:$0xff]  }
 0x286   : > { %3885 = vmatpush1.bf16.msra.mxu1 %v9513_v3  ;;  %3757 = vmatprep.subr.bf16.mxu0 %v9518_v4  ;;  %v9585_v3 = vld [vmem:[#allocation9 + $0x548] ss:$16 sps:$4 sm:$0xff]   ;;  %v9590_v4 = vld [vmem:[#allocation9 + $0x564] ss:$16 sps:$4 sm:$0xff]  }
 0x287   : > { %3886 = vmatprep.subr.bf16.mxu1 %v9521_v6  ;;  %v9588_v6 = vld [vmem:[#allocation9 + $0x560] ss:$16 sps:$4 sm:$0xff]  }
 0x289   : > { %3758 = vmatpush1.bf16.msra.mxu0 %v9516_v8  ;;  %v9596_v8 = vld [vmem:[#allocation9 + $0x584] ss:$16 sps:$4 sm:$0xff]  }
 0x28a   : > { %3887 = vmatpush1.bf16.msra.mxu1 %v9519_v56  ;;  %3770 = vmatprep.subr.bf16.mxu0 %v9524_v10  ;;  %v9594_v56 = vld [vmem:[#allocation9 + $0x580] ss:$16 sps:$4 sm:$0xff]   ;;  %v9597_v10 = vld [vmem:[#allocation9 + $0x588] ss:$16 sps:$4 sm:$0xff]  }
 0x28b   : > { %3899 = vmatprep.subr.bf16.mxu1 %v9527_v12  ;;  %v9605_v12 = vld [vmem:[#allocation9 + $0x5ac] ss:$16 sps:$4 sm:$0xff]  }
 0x28c   : > { %3760 = vmatmul.mubr.bf16.vlgmr.msra.gmra.mrb[0].mxu0 %v2950_v17 }
 0x28d   : > { %3889 = vmatmul.mubr.bf16.vlgmr.msra.gmra.mrb[0].mxu1 %v2950_v17  ;;  %3771 = vmatpush1.bf16.msra.mxu0 %v9522_v14  ;;  %v9603_v14 = vld [vmem:[#allocation9 + $0x5a8] ss:$16 sps:$4 sm:$0xff]   ;;  %v3950_v17 = vld [vmem:[#allocation8] sm:$0xf] }
 0x28e   : > { %3900 = vmatpush1.bf16.msra.mxu1 %v9525_v15  ;;  %3772 = vmatprep.subr.bf16.mxu0 %v9530_v16  ;;  %v10793_v15 = vshrl.u32 %v306_v0, 7 }
 0x28f   : > { %3901 = vmatprep.subr.bf16.mxu1 %v9533_v18  ;;  %3802 = vmatprep.mubr.bf16.mxu0 %v10440_v48 }
 0x290   : > { %3931 = vmatprep.mubr.bf16.mxu1 %v10440_v48  ;;  %v3954_v16 = vsub.s32 0, %v10793_v15  ;;  %v3962_v18 = vsub.s32 2, %v10793_v15 }
 0x291   : > { %3773 = vmatpush1.bf16.msra.mxu0 %v9528_v47  ;;  %v3958_v47 = vsub.s32 1, %v10793_v15 }
 0x292   : > { %3902 = vmatpush1.bf16.msra.mxu1 %v9531_v19  ;;  %3774 = vmatprep.subr.bf16.mxu0 %v9536_v20  ;;  %v3966_v19 = vsub.s32 3, %v10793_v15  ;;  %v9606_v20 = vld [vmem:[#allocation9 + $0x5c0] ss:$16 sps:$4 sm:$0xff]   ;;  %v3955_v23 = vrot.slane %v3950_v17, %v3954_v16  ;;  %v3963_v0 = vrot.slane %v3950_v17, %v3962_v18 }
 0x293   : > { %3903 = vmatprep.subr.bf16.mxu1 %v9539_v21  ;;  %v9608_v21 = vld [vmem:[#allocation9 + $0x5c4] ss:$16 sps:$4 sm:$0xff]  }
 0x295   : > { %3775 = vmatpush1.bf16.msra.mxu0 %v9534_v1  ;;  %v9611_v1 = vld [vmem:[#allocation9 + $0x5cc] ss:$16 sps:$4 sm:$0xff]  }
 0x296   : > { %3904 = vmatpush1.bf16.msra.mxu1 %v9537_v24  ;;  %3776 = vmatprep.subr.bf16.mxu0 %v9542_v25  ;;  %v3959_v24 = vrot.slane %v3950_v17, %v3958_v47  ;;  %v3967_v25 = vrot.slane %v3950_v17, %v3966_v19  ;;  %v9632_v17 = vld [vmem:[#allocation9 + $0x644] ss:$16 sps:$4 sm:$0xff]  }
 0x297   : > { %3905 = vmatprep.subr.bf16.mxu1 %v9545_v26 }
 0x299   : > { %3777 = vmatpush1.bf16.msra.mxu0 %v9540_v30 }
 0x29a   : > { %3906 = vmatpush1.bf16.msra.mxu1 %v9543_v31  ;;  %5182 = vmatprep.subr.bf16.mxu0 %v9548_v36 }
 0x29b   : > { %5311 = vmatprep.subr.bf16.mxu1 %v9551_v39 }
 0x29c   : > { %8228 = vmatmul.mubr.msk.bf16.vlgmr.msra.gmra.mrb[0].mxu0 %vm1523_vm12, %v2956_v34 }
 0x29d   : > { %8229 = vmatmul.mubr.msk.bf16.vlgmr.msra.gmra.mrb[0].mxu1 %vm1523_vm12, %v2956_v34  ;;  %5183 = vmatpush1.bf16.msra.mxu0 %v9546_v35 }
 0x29e   : > { %5312 = vmatpush1.bf16.msra.mxu1 %v9549_v38  ;;  %5184 = vmatprep.subr.bf16.mxu0 %v9554_v40 }
 0x29f   : > { %5313 = vmatprep.subr.bf16.mxu1 %v9557_v41 }
 0x2a1   : > { %5185 = vmatpush1.bf16.msra.mxu0 %v9552_v42 }
 0x2a2   : > { %5314 = vmatpush1.bf16.msra.mxu1 %v9555_v43  ;;  %5186 = vmatprep.subr.bf16.mxu0 %v9560_v44 }
 0x2a3   : > { %5315 = vmatprep.subr.bf16.mxu1 %v9563_v45 }
 0x2a5   : > { %5187 = vmatpush1.bf16.msra.mxu0 %v9558_v46 }
 0x2a6   : > { %5316 = vmatpush1.bf16.msra.mxu1 %v9561_v49  ;;  %5188 = vmatprep.subr.bf16.mxu0 %v9566_v50 }
 0x2a7   : > { %5317 = vmatprep.subr.bf16.mxu1 %v9569_v51  ;;  %v9618_v51 = vld [vmem:[#allocation9 + $0x600] ss:$16 sps:$4 sm:$0xff]  }
 0x2a9   : > { %5189 = vmatpush1.bf16.msra.mxu0 %v9564_v52 }
 0x2aa   : > { %5318 = vmatpush1.bf16.msra.mxu1 %v9567_v37  ;;  %5190 = vmatprep.subr.bf16.mxu0 %v9572_v53 }
 0x2ab   : > { %5319 = vmatprep.subr.bf16.mxu1 %v9575_v54 }
 0x2ad   : > { %5191 = vmatpush1.bf16.msra.mxu0 %v9570_v55  ;;  %v9620_v55 = vld [vmem:[#allocation9 + $0x604] ss:$16 sps:$4 sm:$0xff]  }
 0x2ae   : > { %5320 = vmatpush1.bf16.msra.mxu1 %v9573_v57  ;;  %5192 = vmatprep.subr.bf16.mxu0 %v9578_v58 }
 0x2af   : > { %5321 = vmatprep.subr.bf16.mxu1 %v9581_v59 }
 0x2b1   : > { %5193 = vmatpush1.bf16.msra.mxu0 %v9576_v60  ;;  %v9621_v60 = vld [vmem:[#allocation9 + $0x608] ss:$16 sps:$4 sm:$0xff]  }
 0x2b2   : > { %5322 = vmatpush1.bf16.msra.mxu1 %v9579_v61  ;;  %5194 = vmatprep.subr.bf16.mxu0 %v9584_v62 }
 0x2b3   : > { %5323 = vmatprep.subr.bf16.mxu1 %v9587_v63 }
 0x2b5   : > { %5195 = vmatpush1.bf16.msra.mxu0 %v9582_v2  ;;  %v9623_v2 = vld [vmem:[#allocation9 + $0x60c] ss:$16 sps:$4 sm:$0xff]  }
 0x2b6   : > { %5324 = vmatpush1.bf16.msra.mxu1 %v9585_v3  ;;  %5196 = vmatprep.subr.bf16.mxu0 %v9590_v4 }
 0x2b7   : > { %5325 = vmatprep.subr.bf16.mxu1 %v9593_v5  ;;  %v9624_v5 = vld [vmem:[#allocation9 + $0x620] ss:$16 sps:$4 sm:$0xff]  }
 0x2b9   : > { %5197 = vmatpush1.bf16.msra.mxu0 %v9588_v6  ;;  %v9626_v6 = vld [vmem:[#allocation9 + $0x624] ss:$16 sps:$4 sm:$0xff]  }
 0x2ba   : > { %5326 = vmatpush1.bf16.msra.mxu1 %v9591_v7  ;;  %5198 = vmatprep.subr.bf16.mxu0 %v9596_v8 }
 0x2bb   : > { %5327 = vmatprep.subr.bf16.mxu1 %v9599_v9 }
 0x2bd   : > { %5199 = vmatpush1.bf16.msra.mxu0 %v9594_v56  ;;  %v9629_v56 = vld [vmem:[#allocation9 + $0x62c] ss:$16 sps:$4 sm:$0xff]  }
 0x2be   : > { %5328 = vmatpush1.bf16.msra.mxu1 %v9597_v10  ;;  %5200 = vmatprep.subr.bf16.mxu0 %v9602_v11 }
 0x2bf   : > { %5329 = vmatprep.subr.bf16.mxu1 %v9605_v12  ;;  %v9627_v12 = vld [vmem:[#allocation9 + $0x628] ss:$16 sps:$4 sm:$0xff]  }
 0x2c1   : > { %5201 = vmatpush1.bf16.msra.mxu0 %v9600_v13 }
 0x2c2   : > { %5330 = vmatpush1.bf16.msra.mxu1 %v9603_v14  ;;  %5202 = vmatprep.subr.bf16.mxu0 %v9608_v21  ;;  %v9630_v14 = vld [vmem:[#allocation9 + $0x640] ss:$16 sps:$4 sm:$0xff]   ;;  %v9633_v21 = vld [vmem:[#allocation9 + $0x648] ss:$16 sps:$4 sm:$0xff]  }
 0x2c3   : > { %5331 = vmatprep.subr.bf16.mxu1 %v9611_v1  ;;  %v9641_v1 = vld [vmem:[#allocation9 + $0x66c] ss:$16 sps:$4 sm:$0xff]  }
 0x2c5   : > { %5203 = vmatpush1.bf16.msra.mxu0 %v9606_v20  ;;  %v9635_v20 = vld [vmem:[#allocation9 + $0x64c] ss:$16 sps:$4 sm:$0xff]  }
 0x2c6   : > { %5332 = vmatpush1.bf16.msra.mxu1 %v9609_v22  ;;  %5204 = vmatprep.subr.bf16.mxu0 %v9614_v28  ;;  %v9636_v22 = vld [vmem:[#allocation9 + $0x660] ss:$16 sps:$4 sm:$0xff]  }
 0x2c7   : > { %5333 = vmatprep.subr.bf16.mxu1 %v9617_v33 }
 0x2c9   : > { %5205 = vmatpush1.bf16.msra.mxu0 %v9612_v27 }
 0x2ca   : > { %5334 = vmatpush1.bf16.msra.mxu1 %v9615_v32  ;;  %5206 = vmatprep.subr.bf16.mxu0 %v9620_v55 }
 0x2cb   : > { %5335 = vmatprep.subr.bf16.mxu1 %v9623_v2 }
 0x2cd   : > { %5207 = vmatpush1.bf16.msra.mxu0 %v9618_v51 }
 0x2ce   : > { %5336 = vmatpush1.bf16.msra.mxu1 %v9621_v60  ;;  %5208 = vmatprep.subr.bf16.mxu0 %v9626_v6 }
 0x2cf   : > { %5337 = vmatprep.subr.bf16.mxu1 %v9629_v56  ;;  %v9642_v56 = vld [vmem:[#allocation9 + $0x680] ss:$16 sps:$4 sm:$0xff]  }
 0x2d1   : > { %5209 = vmatpush1.bf16.msra.mxu0 %v9624_v5 }
 0x2d2   : > { %5338 = vmatpush1.bf16.msra.mxu1 %v9627_v12  ;;  %5210 = vmatprep.subr.bf16.mxu0 %v9632_v17 }
 0x2d3   : > { %5339 = vmatprep.subr.bf16.mxu1 %v9635_v20 }
 0x2d5   : > { %5211 = vmatpush1.bf16.msra.mxu0 %v9630_v14  ;;  %v9653_v14 = vld [vmem:[#allocation9 + $0x6ac] ss:$16 sps:$4 sm:$0xff]  }
 0x2d6   : > { %5340 = vmatpush1.bf16.msra.mxu1 %v9633_v21  ;;  %v9648_v21 = vld [vmem:[#allocation9 + $0x6a0] ss:$16 sps:$4 sm:$0xff]  }
 0x2d7   : > { %5341 = vmatprep.subr.bf16.mxu1 %v9641_v1  ;;  %v9659_v1 = vld [vmem:[#allocation9 + $0x6cc] ss:$16 sps:$4 sm:$0xff]  }
 0x36f   : > { %v3804_v26 = vpop.f32.mrb[0].mxu0 }
 0x370   : > { %v3972_v29 = vadd.f32 %v3955_v23, %v3804_v26  ;;  %v3933_v30 = vpop.f32.mrb[0].mxu1  ;;  %v3806_v31 = vpop.f32.mrb[1].mxu0 }
 0x371   : > { %v3974_v34 = vadd.f32 %v3963_v0, %v3933_v30  ;;  %v3973_v35 = vadd.f32 %v3959_v24, %v3806_v31  ;;  %v3935_v36 = vpop.f32.mrb[1].mxu1  ;;  %v3808_v38 = vpop.f32.mrb[2].mxu0 }
 0x372   : > { %v3980_v39 = vmax.f32 %v3972_v29, 0.0  ;;  %v3975_v40 = vadd.f32 %v3967_v25, %v3935_v36  ;;  %v3976_v41 = vadd.f32 %v3955_v23, %v3808_v38  ;;  %v3937_v42 = vpop.f32.mrb[2].mxu1  ;;  %v3810_v43 = vpop.f32.mrb[3].mxu0  ;;  %v9638_v23 = vld [vmem:[#allocation9 + $0x664] ss:$16 sps:$4 sm:$0xff]  }
 0x373   : > { %v3982_v44 = vmax.f32 %v3974_v34, 0.0  ;;  %v3981_v45 = vmax.f32 %v3973_v35, 0.0  ;;  %v3978_v46 = vadd.f32 %v3963_v0, %v3937_v42  ;;  %v3977_v49 = vadd.f32 %v3959_v24, %v3810_v43  ;;  %v3939_v50 = vpop.f32.mrb[3].mxu1  ;;  %5212 = vmatprep.subr.bf16.mxu0 %v9638_v23  ;;  %v9639_v0 = vld [vmem:[#allocation9 + $0x668] ss:$16 sps:$4 sm:$0xff]  }
 0x374   : > { %v3996_v52 = vrot.slane %v3980_v39, 7  ;;  %v3983_v37 = vmax.f32 %v3975_v40, 0.0  ;;  %v3984_v53 = vmax.f32 %v3976_v41, 0.0  ;;  %v3979_v54 = vadd.f32 %v3967_v25, %v3939_v50  ;;  %v9644_v24 = vld [vmem:[#allocation9 + $0x684] ss:$16 sps:$4 sm:$0xff]   ;;  %5213 = vmatpush1.bf16.msra.mxu0 %v9636_v22  ;;  %5342 = vmatpush1.bf16.msra.mxu1 %v9639_v0 }
 0x375   : > { %v3997_v57 = vrot.slane %v3981_v45, 7  ;;  %v3986_v58 = vmax.f32 %v3978_v46, 0.0  ;;  %v3985_v59 = vmax.f32 %v3977_v49, 0.0  ;;  %v3998_v61 = vrot.slane %v3982_v44, 7  ;;  %v9647_v25 = vld [vmem:[#allocation9 + $0x68c] ss:$16 sps:$4 sm:$0xff]   ;;  %5225 = vmatprep.subr.bf16.mxu0 %v9644_v24 }
 0x376   : > { %v4000_v62 = vrot.slane %v3984_v53, 7  ;;  %v3987_v63 = vmax.f32 %v3979_v54, 0.0  ;;  %4008 = vrot.lane.b32.xlu0 %v3996_v52, %s10439_s24  ;;  %v3999_v7 = vrot.slane %v3983_v37, 7  ;;  %5354 = vmatprep.subr.bf16.mxu1 %v9647_v25  ;;  %v9651_v22 = vld [vmem:[#allocation9 + $0x6a8] ss:$16 sps:$4 sm:$0xff]  }
 0x377   : > { %v4004_v3 = vrot.slane %v3986_v58, 7  ;;  %v4002_v4 = vrot.slane %v3985_v59, 7  ;;  %4010 = vrot.lane.b32.xlu1 %v3997_v57, %s10439_s24  ;;  %v9656_v23 = vld [vmem:[#allocation9 + $0x6c4] ss:$16 sps:$4 sm:$0xff]  }
 0x378   : > { %v4006_v8 = vrot.slane %v3987_v63, 7  ;;  %v4001_v9 = vsel %vm333_vm3, %v3996_v52, %v4000_v62 }
 0x379   : > { %v4003_v10 = vsel %vm333_vm3, %v3997_v57, %v4002_v4  ;;  %v4005_v11 = vsel %vm333_vm3, %v3998_v61, %v4004_v3 }
 0x37a   : > { %4016 = vrot.lane.b32.xlu0 %v4001_v9, %s10439_s24  ;;  %v4007_v13 = vsel %vm333_vm3, %v3999_v7, %v4006_v8 }
 0x37b   : > { %4018 = vrot.lane.b32.xlu1 %v4003_v10, %s10439_s24  ;;  %v9645_v10 = vld [vmem:[#allocation9 + $0x688] ss:$16 sps:$4 sm:$0xff]  }
 0x37e   : > { %4024 = vrot.lane.b32.xlu0 %v4000_v62, %s10439_s24 }
 0x37f   : > { %4026 = vrot.lane.b32.xlu1 %v4002_v4, %s10439_s24 }
 0x382   : > { %4012 = vrot.lane.b32.xlu0 %v3998_v61, %s10439_s24 }
 0x383   : > { %4014 = vrot.lane.b32.xlu1 %v3999_v7, %s10439_s24 }
 0x386   : > { %4020 = vrot.lane.b32.xlu0 %v4005_v11, %s10439_s24 }
 0x387   : > { %4022 = vrot.lane.b32.xlu1 %v4007_v13, %s10439_s24  ;;  %v9650_v13 = vld [vmem:[#allocation9 + $0x6a4] ss:$16 sps:$4 sm:$0xff]  }
 0x38a   : > { %4028 = vrot.lane.b32.xlu0 %v4004_v3, %s10439_s24 }
 0x38b   : > { %4030 = vrot.lane.b32.xlu1 %v4006_v8, %s10439_s24 }
 0x3e8   : > { %v4009_v26 = vpop.permute.xlu0 %4008 }
 0x3e9   : > { %4056 = vst.msk [vmem:[#allocation2] sm:$0xfe] %vm394_vm6, %v4009_v26  ;;  %v4011_v27 = vpop.permute.xlu1 %4010 }
 0x3ea   : > { %v4032_v28 = vsel %vm315_vm0, %v4009_v26, %v4011_v27  ;;  %v9654_v26 = vld [vmem:[#allocation9 + $0x6c0] ss:$16 sps:$4 sm:$0xff]  }
 0x3eb   : > { %4057 = vst [vmem:[#allocation2 + $0x8] sm:$0xfe] %v4032_v28  ;;  %v9662_v28 = vld [vmem:[#allocation9 + $0x6e4] ss:$16 sps:$4 sm:$0xff]  }
 0x3ec   : > { %v4017_v29 = vpop.permute.xlu0 %4016 }
 0x3ed   : > { %4061 = vst.msk [vmem:[#allocation2 + $0x28] sm:$0xff] %vm401_vm7, %v4017_v29  ;;  %v4019_v30 = vpop.permute.xlu1 %4018 }
 0x3ee   : > { %v10827_v31 = vsel %vm315_vm0, %v4017_v29, %v4019_v30 }
 0x3ef   : > { %4062 = vst [vmem:[#allocation2 + $0x30] sm:$0xff] %v10827_v31 }
 0x3f0   : > { %v4025_v32 = vpop.permute.xlu0 %4024  ;;  %v4230_v40 = vld [vmem:[#allocation2] sm:$0xfe] }
 0x3f1   : > { %4066 = vst.msk [vmem:[#allocation2 + $0x50] sm:$0x1] %vm407_vm8, %v4025_v32  ;;  %v4027_v33 = vpop.permute.xlu1 %4026 }
 0x3f2   : > { %v4038_v34 = vsel %vm315_vm0, %v4025_v32, %v4027_v33  ;;  %v4231_v35 = vld [vmem:[#allocation2 + $0x8] sm:$0xfe] }
 0x3f3   : > { %4067 = vst [vmem:[#allocation2 + $0x58] sm:$0x1] %v4038_v34  ;;  %v4241_v36 = vpack.c.bf16 %v10827_v31, %v4231_v35  ;;  %v9665_v32 = vld [vmem:[#allocation9 + $0x6ec] ss:$16 sps:$4 sm:$0xff]   ;;  %v9660_v35 = vld [vmem:[#allocation9 + $0x6e0] ss:$16 sps:$4 sm:$0xff]  }
 0x3f4   : > { %v4013_v38 = vpop.permute.xlu0 %4012  ;;  %v10833_v39 = vld [vmem:[#allocation2 + $0x28] sm:$0xff] }
 0x3f5   : > { %v4033_v41 = vsel %vm315_vm0, %v4011_v27, %v4013_v38  ;;  %v4015_v42 = vpop.permute.xlu1 %4014  ;;  %v4240_v43 = vpack.c.bf16 %v10833_v39, %v4230_v40  ;;  %v4410_v45 = vshll.u32 %v4241_v36, 16  ;;  %v4408_v63 = vshrl.u32 %v4241_v36, 16  ;;  %v9657_v27 = vld [vmem:[#allocation9 + $0x6c8] ss:$16 sps:$4 sm:$0xff]   ;;  %v9668_v40 = vld [vmem:[#allocation9 + $0x704] ss:$16 sps:$4 sm:$0xff]  }
 0x3f6   : > { %4058 = vst [vmem:[#allocation2 + $0x10] sm:$0xfe] %v4033_v41  ;;  %v4034_v44 = vsel %vm315_vm0, %v4013_v38, %v4015_v42  ;;  %4060 = vst.msk [vmem:[#allocation2 + $0x20] sm:$0xfe] %vm399_vm9, %v4015_v42  ;;  %v9663_v36 = vld [vmem:[#allocation9 + $0x6e8] ss:$16 sps:$4 sm:$0xff]  }
 0x3f7   : > { %4059 = vst [vmem:[#allocation2 + $0x18] sm:$0xfe] %v4034_v44  ;;  %v4398_v50 = vshll.u32 %v4240_v43, 16  ;;  %v4412_v57 = vrot.slane %v4410_v45, 1  ;;  %v4396_v4 = vshrl.u32 %v4240_v43, 16 }
 0x3f8   : > { %v4021_v46 = vpop.permute.xlu0 %4020  ;;  %v4235_v49 = vld [vmem:[#allocation2 + $0x50] sm:$0x1]  ;;  %v9671_v41 = vld [vmem:[#allocation9 + $0x70c] ss:$16 sps:$4 sm:$0xff]   ;;  %v9666_v42 = vld [vmem:[#allocation9 + $0x700] ss:$16 sps:$4 sm:$0xff]  }
 0x3f9   : > { %v10840_v51 = vsel %vm315_vm0, %v4019_v30, %v4021_v46  ;;  %v4023_v52 = vpop.permute.xlu1 %4022  ;;  %v4245_v37 = vpack.c.bf16 %v4235_v49, %v4235_v49  ;;  %v4400_v60 = vrot.slane %v4398_v50, 1  ;;  %v4413_v7 = vor.u32 %v4412_v57, %v4408_v63  ;;  %v9669_v43 = vld [vmem:[#allocation9 + $0x708] ss:$16 sps:$4 sm:$0xff]   ;;  %v9674_v44 = vld [vmem:[#allocation9 + $0x724] ss:$16 sps:$4 sm:$0xff]  }
 0x3fa   : > { %4063 = vst [vmem:[#allocation2 + $0x38] sm:$0xff] %v10840_v51  ;;  %v10844_v53 = vsel %vm315_vm0, %v4021_v46, %v4023_v52  ;;  %4065 = vst.msk [vmem:[#allocation2 + $0x48] sm:$0xff] %vm315_vm0, %v4023_v52  ;;  %v4236_v54 = vld [vmem:[#allocation2 + $0x58] sm:$0x1]  ;;  %v9672_v46 = vld [vmem:[#allocation9 + $0x720] ss:$16 sps:$4 sm:$0xff]  }
 0x3fb   : > { %4064 = vst [vmem:[#allocation2 + $0x40] sm:$0xff] %v10844_v53  ;;  %v4246_v55 = vpack.c.bf16 %v4236_v54, %v4236_v54  ;;  %v4403_v58 = vshll.u32 %v4245_v37, 16  ;;  %v4401_v11 = vor.u32 %v4400_v60, %v4396_v4  ;;  %v9677_v45 = vld [vmem:[#allocation9 + $0x72c] ss:$16 sps:$4 sm:$0xff]   ;;  %v9675_v49 = vld [vmem:[#allocation9 + $0x728] ss:$16 sps:$4 sm:$0xff]  }
 0x3fc   : > { %v4029_v59 = vpop.permute.xlu0 %4028  ;;  %v9680_v50 = vld [vmem:[#allocation9 + $0x744] ss:$16 sps:$4 sm:$0xff]   ;;  %v9683_v52 = vld [vmem:[#allocation9 + $0x74c] ss:$16 sps:$4 sm:$0xff]   ;;  %v9678_v37 = vld [vmem:[#allocation9 + $0x740] ss:$16 sps:$4 sm:$0xff]  }
 0x3fd   : > { %v4039_v61 = vsel %vm315_vm0, %v4027_v33, %v4029_v59  ;;  %v4031_v62 = vpop.permute.xlu1 %4030  ;;  %v4415_v2 = vshll.u32 %v4246_v55, 16  ;;  %v4405_v5 = vrot.slane %v4403_v58, 1  ;;  %v9681_v54 = vld [vmem:[#allocation9 + $0x748] ss:$16 sps:$4 sm:$0xff]   ;;  %v9686_v55 = vld [vmem:[#allocation9 + $0x764] ss:$16 sps:$4 sm:$0xff]  }
 0x3fe   : > { %4068 = vst [vmem:[#allocation2 + $0x60] sm:$0x1] %v4039_v61  ;;  %v4040_v3 = vsel %vm315_vm0, %v4029_v59, %v4031_v62  ;;  %4070 = vst.msk [vmem:[#allocation2 + $0x70] sm:$0x1] %vm412_vm10, %v4031_v62  ;;  %v4233_v6 = vld [vmem:[#allocation2 + $0x18] sm:$0xfe] }
 0x3ff   : > { %4069 = vst [vmem:[#allocation2 + $0x68] sm:$0x1] %v4040_v3  ;;  %v4417_v8 = vrot.slane %v4415_v2, 1  ;;  %v4243_v9 = vpack.c.bf16 %v10844_v53, %v4233_v6  ;;  %v4406_v17 = vsel %vm738_vm11, %v4401_v11, %v4405_v5  ;;  %v9689_v57 = vld [vmem:[#allocation9 + $0x76c] ss:$16 sps:$4 sm:$0xff]  }
 0x400   : > { %v9684_v58 = vld [vmem:[#allocation9 + $0x760] ss:$16 sps:$4 sm:$0xff]   ;;  %v9687_v59 = vld [vmem:[#allocation9 + $0x768] ss:$16 sps:$4 sm:$0xff]   ;;  %v9692_v60 = vld [vmem:[#allocation9 + $0x784] ss:$16 sps:$4 sm:$0xff]  }
 0x401   : > { %v4418_v12 = vsel %vm738_vm11, %v4413_v7, %v4417_v8  ;;  %v4434_v20 = vshll.u32 %v4243_v9, 16  ;;  %v4432_v29 = vshrl.u32 %v4243_v9, 16  ;;  %v9695_v61 = vld [vmem:[#allocation9 + $0x78c] ss:$16 sps:$4 sm:$0xff]   ;;  %v9690_v62 = vld [vmem:[#allocation9 + $0x780] ss:$16 sps:$4 sm:$0xff]  }
 0x402   : > { %5214 = vmatprep.mubr.bf16.mxu0 %v4418_v12  ;;  %5343 = vmatprep.mubr.bf16.mxu1 %v4418_v12  ;;  %v9693_v63 = vld [vmem:[#allocation9 + $0x788] ss:$16 sps:$4 sm:$0xff]   ;;  %v9698_v2 = vld [vmem:[#allocation9 + $0x7a4] ss:$16 sps:$4 sm:$0xff]   ;;  %v9701_v3 = vld [vmem:[#allocation9 + $0x7ac] ss:$16 sps:$4 sm:$0xff]  }
 0x403   : > { %5215 = vmatmul.mubr.bf16.vlgmr.msra.gmra.mrb[4].mxu0 %v4406_v17  ;;  %5344 = vmatmul.mubr.bf16.vlgmr.msra.gmra.mrb[4].mxu1 %v4406_v17  ;;  %v4436_v25 = vrot.slane %v4434_v20, 1  ;;  %v9696_v4 = vld [vmem:[#allocation9 + $0x7a0] ss:$16 sps:$4 sm:$0xff]   ;;  %v9699_v5 = vld [vmem:[#allocation9 + $0x7a8] ss:$16 sps:$4 sm:$0xff]  }
 0x404   : > { %5226 = vmatpush1.bf16.msra.mxu0 %v9642_v56  ;;  %5355 = vmatpush1.bf16.msra.mxu1 %v9645_v10  ;;  %v9704_v6 = vld [vmem:[#allocation9 + $0x7c4] ss:$16 sps:$4 sm:$0xff]   ;;  %v9707_v7 = vld [vmem:[#allocation9 + $0x7cc] ss:$16 sps:$4 sm:$0xff]   ;;  %v9702_v8 = vld [vmem:[#allocation9 + $0x7c0] ss:$16 sps:$4 sm:$0xff]  }
 0x405   : > { %5227 = vmatprep.subr.bf16.mxu0 %v9650_v13  ;;  %5356 = vmatprep.subr.bf16.mxu1 %v9653_v14  ;;  %v4437_v33 = vor.u32 %v4436_v25, %v4432_v29  ;;  %v9705_v9 = vld [vmem:[#allocation9 + $0x7c8] ss:$16 sps:$4 sm:$0xff]   ;;  %v9710_v56 = vld [vmem:[#allocation9 + $0x7e4] ss:$16 sps:$4 sm:$0xff]   ;;  %v9713_v10 = vld [vmem:[#allocation9 + $0x7ec] ss:$16 sps:$4 sm:$0xff]  }
 0x406   : > { %v4238_v0 = vld [vmem:[#allocation2 + $0x68] sm:$0x1]  ;;  %v9708_v11 = vld [vmem:[#allocation9 + $0x7e0] ss:$16 sps:$4 sm:$0xff]   ;;  %v9711_v12 = vld [vmem:[#allocation9 + $0x7e8] ss:$16 sps:$4 sm:$0xff]  }
 0x407   : > { %v4248_v24 = vpack.c.bf16 %v4238_v0, %v4238_v0  ;;  %v9716_v13 = vld [vmem:[#allocation9 + $0x804] ss:$16 sps:$4 sm:$0xff]   ;;  %v9719_v14 = vld [vmem:[#allocation9 + $0x80c] ss:$16 sps:$4 sm:$0xff]   ;;  %v9714_v17 = vld [vmem:[#allocation9 + $0x800] ss:$16 sps:$4 sm:$0xff]  }
 0x408   : > { %5228 = vmatpush1.bf16.msra.mxu0 %v9648_v21  ;;  %5357 = vmatpush1.bf16.msra.mxu1 %v9651_v22  ;;  %v9717_v20 = vld [vmem:[#allocation9 + $0x808] ss:$16 sps:$4 sm:$0xff]   ;;  %v9722_v21 = vld [vmem:[#allocation9 + $0x824] ss:$16 sps:$4 sm:$0xff]   ;;  %v9725_v22 = vld [vmem:[#allocation9 + $0x82c] ss:$16 sps:$4 sm:$0xff]  }
 0x409   : > { %5229 = vmatprep.subr.bf16.mxu0 %v9656_v23  ;;  %5358 = vmatprep.subr.bf16.mxu1 %v9659_v1  ;;  %v4439_v30 = vshll.u32 %v4248_v24, 16  ;;  %v4232_v23 = vld [vmem:[#allocation2 + $0x10] sm:$0xfe]  ;;  %v4237_v1 = vld [vmem:[#allocation2 + $0x60] sm:$0x1] }
 0x40a   : > { %v9720_v0 = vld [vmem:[#allocation9 + $0x820] ss:$16 sps:$4 sm:$0xff]   ;;  %v9723_v24 = vld [vmem:[#allocation9 + $0x828] ss:$16 sps:$4 sm:$0xff]   ;;  %v4242_v25 = vpack.c.bf16 %v10840_v51, %v4232_v23 }
 0x40b   : > { %v4441_v34 = vrot.slane %v4439_v30, 1  ;;  %v9726_v29 = vld [vmem:[#allocation9 + $0x840] ss:$16 sps:$4 sm:$0xff]   ;;  %v9729_v30 = vld [vmem:[#allocation9 + $0x848] ss:$16 sps:$4 sm:$0xff]  }
 0x40c   : > { %5230 = vmatpush1.bf16.msra.mxu0 %v9654_v26  ;;  %5359 = vmatpush1.bf16.msra.mxu1 %v9657_v27  ;;  %v9728_v26 = vld [vmem:[#allocation9 + $0x844] ss:$16 sps:$4 sm:$0xff]   ;;  %v9731_v27 = vld [vmem:[#allocation9 + $0x84c] ss:$16 sps:$4 sm:$0xff]  }
 0x40d   : > { %5231 = vmatprep.subr.bf16.mxu0 %v9662_v28  ;;  %v4442_v38 = vsel %vm738_vm11, %v4437_v33, %v4441_v34  ;;  %5360 = vmatprep.subr.bf16.mxu1 %v9665_v32  ;;  %v4247_v28 = vpack.c.bf16 %v4237_v1, %v4237_v1  ;;  %v4422_v32 = vshll.u32 %v4242_v25, 16  ;;  %v9734_v33 = vld [vmem:[#allocation9 + $0x864] ss:$16 sps:$4 sm:$0xff]   ;;  %v9737_v34 = vld [vmem:[#allocation9 + $0x86c] ss:$16 sps:$4 sm:$0xff]  }
 0x40e   : > { %5257 = vmatprep.mubr.bf16.mxu0 %v4442_v38  ;;  %5386 = vmatprep.mubr.bf16.mxu1 %v4442_v38  ;;  %v9735_v38 = vld [vmem:[#allocation9 + $0x868] ss:$16 sps:$4 sm:$0xff]   ;;  %v9770_v1 = vld [vmem:[#allocation9 + $0x24] ss:$16 sps:$4 sm:$0xff]  }
 0x410   : > { %5232 = vmatpush1.bf16.msra.mxu0 %v9660_v35  ;;  %5361 = vmatpush1.bf16.msra.mxu1 %v9663_v36  ;;  %v4427_v35 = vshll.u32 %v4247_v28, 16  ;;  %v9732_v36 = vld [vmem:[#allocation9 + $0x860] ss:$16 sps:$4 sm:$0xff]  }
 0x411   : > { %5233 = vmatprep.subr.bf16.mxu0 %v9668_v40  ;;  %5362 = vmatprep.subr.bf16.mxu1 %v9671_v41  ;;  %v4424_v40 = vrot.slane %v4422_v32, 1  ;;  %v9740_v41 = vld [vmem:[#allocation9 + $0x884] ss:$16 sps:$4 sm:$0xff]   ;;  %v9774_v28 = vld [vmem:[#allocation9 + $0x40] ss:$16 sps:$4 sm:$0xff]  }
 0x412   : > { %v9780_v32 = vld [vmem:[#allocation9 + $0x60] ss:$16 sps:$4 sm:$0xff]  }
 0x414   : > { %5234 = vmatpush1.bf16.msra.mxu0 %v9666_v42  ;;  %5363 = vmatpush1.bf16.msra.mxu1 %v9669_v43  ;;  %v9743_v42 = vld [vmem:[#allocation9 + $0x88c] ss:$16 sps:$4 sm:$0xff]   ;;  %v4420_v43 = vshrl.u32 %v4242_v25, 16  ;;  %v9771_v25 = vld [vmem:[#allocation9 + $0x28] ss:$16 sps:$4 sm:$0xff]  }
 0x415   : > { %5235 = vmatprep.subr.bf16.mxu0 %v9674_v44  ;;  %5364 = vmatprep.subr.bf16.mxu1 %v9677_v45  ;;  %v4429_v44 = vrot.slane %v4427_v35, 1  ;;  %v9791_v35 = vld [vmem:[#allocation9 + $0x8c] ss:$16 sps:$4 sm:$0xff]  }
 0x416   : > { %v4425_v45 = vor.u32 %v4424_v40, %v4420_v43  ;;  %v9794_v40 = vld [vmem:[#allocation9 + $0xa4] ss:$16 sps:$4 sm:$0xff]   ;;  %v9795_v43 = vld [vmem:[#allocation9 + $0xa8] ss:$16 sps:$4 sm:$0xff]  }
 0x418   : > { %5236 = vmatpush1.bf16.msra.mxu0 %v9672_v46  ;;  %5365 = vmatpush1.bf16.msra.mxu1 %v9675_v49  ;;  %v9738_v46 = vld [vmem:[#allocation9 + $0x880] ss:$16 sps:$4 sm:$0xff]   ;;  %v9741_v49 = vld [vmem:[#allocation9 + $0x888] ss:$16 sps:$4 sm:$0xff]  }
 0x419   : > { %5237 = vmatprep.subr.bf16.mxu0 %v9680_v50  ;;  %5366 = vmatprep.subr.bf16.mxu1 %v9683_v52  ;;  %v9746_v50 = vld [vmem:[#allocation9 + $0x8a4] ss:$16 sps:$4 sm:$0xff]   ;;  %v9749_v52 = vld [vmem:[#allocation9 + $0x8ac] ss:$16 sps:$4 sm:$0xff]  }
 0x41c   : > { %5238 = vmatpush1.bf16.msra.mxu0 %v9678_v37  ;;  %5367 = vmatpush1.bf16.msra.mxu1 %v9681_v54  ;;  %v10856_v37 = vld [vmem:[#allocation2 + $0x48] sm:$0xff]  ;;  %v4430_v54 = vsel %vm738_vm11, %v4425_v45, %v4429_v44  ;;  %v9800_v44 = vld [vmem:[#allocation9 + $0xc4] ss:$16 sps:$4 sm:$0xff]  }
 0x41d   : > { %5239 = vmatprep.subr.bf16.mxu0 %v9686_v55  ;;  %5368 = vmatprep.subr.bf16.mxu1 %v9689_v57  ;;  %v4234_v55 = vld [vmem:[#allocation2 + $0x20] sm:$0xfe]  ;;  %v4239_v57 = vld [vmem:[#allocation2 + $0x70] sm:$0x1]  ;;  %v9803_v45 = vld [vmem:[#allocation9 + $0xcc] ss:$16 sps:$4 sm:$0xff]  }
 0x420   : > { %5240 = vmatpush1.bf16.msra.mxu0 %v9684_v58  ;;  %5369 = vmatpush1.bf16.msra.mxu1 %v9687_v59  ;;  %v9744_v58 = vld [vmem:[#allocation9 + $0x8a0] ss:$16 sps:$4 sm:$0xff]   ;;  %v9747_v59 = vld [vmem:[#allocation9 + $0x8a8] ss:$16 sps:$4 sm:$0xff]  }
 0x421   : > { %5241 = vmatprep.subr.bf16.mxu0 %v9692_v60  ;;  %5370 = vmatprep.subr.bf16.mxu1 %v9695_v61  ;;  %v4244_v60 = vpack.c.bf16 %v10856_v37, %v4234_v55  ;;  %v9752_v61 = vld [vmem:[#allocation9 + $0x8c4] ss:$16 sps:$4 sm:$0xff]   ;;  %v9807_v55 = vld [vmem:[#allocation9 + $0xe8] ss:$16 sps:$4 sm:$0xff]  }
 0x424   : > { %5242 = vmatpush1.bf16.msra.mxu0 %v9690_v62  ;;  %5371 = vmatpush1.bf16.msra.mxu1 %v9693_v63  ;;  %v9755_v62 = vld [vmem:[#allocation9 + $0x8cc] ss:$16 sps:$4 sm:$0xff]   ;;  %v4249_v63 = vpack.c.bf16 %v4239_v57, %v4239_v57  ;;  %v9812_v57 = vld [vmem:[#allocation9 + $0x104] ss:$16 sps:$4 sm:$0xff]  }
 0x425   : > { %5243 = vmatprep.subr.bf16.mxu0 %v9698_v2  ;;  %5372 = vmatprep.subr.bf16.mxu1 %v9701_v3  ;;  %v9750_v2 = vld [vmem:[#allocation9 + $0x8c0] ss:$16 sps:$4 sm:$0xff]   ;;  %v9753_v3 = vld [vmem:[#allocation9 + $0x8c8] ss:$16 sps:$4 sm:$0xff]  }
 0x428   : > { %5244 = vmatpush1.bf16.msra.mxu0 %v9696_v4  ;;  %5373 = vmatpush1.bf16.msra.mxu1 %v9699_v5  ;;  %v4446_v4 = vshll.u32 %v4244_v60, 16  ;;  %v9758_v5 = vld [vmem:[#allocation9 + $0x8e4] ss:$16 sps:$4 sm:$0xff]  }
 0x429   : > { %5245 = vmatprep.subr.bf16.mxu0 %v9704_v6  ;;  %5374 = vmatprep.subr.bf16.mxu1 %v9707_v7  ;;  %v9761_v6 = vld [vmem:[#allocation9 + $0x8ec] ss:$16 sps:$4 sm:$0xff]   ;;  %v4451_v7 = vshll.u32 %v4249_v63, 16  ;;  %v9816_v63 = vld [vmem:[#allocation9 + $0x120] ss:$16 sps:$4 sm:$0xff]  }
 0x42c   : > { %5246 = vmatpush1.bf16.msra.mxu0 %v9702_v8  ;;  %5375 = vmatpush1.bf16.msra.mxu1 %v9705_v9  ;;  %v9756_v8 = vld [vmem:[#allocation9 + $0x8e0] ss:$16 sps:$4 sm:$0xff]   ;;  %v9759_v9 = vld [vmem:[#allocation9 + $0x8e8] ss:$16 sps:$4 sm:$0xff]  }
 0x42d   : > { %5247 = vmatprep.subr.bf16.mxu0 %v9710_v56  ;;  %5376 = vmatprep.subr.bf16.mxu1 %v9713_v10  ;;  %v4448_v56 = vrot.slane %v4446_v4, 1  ;;  %v9764_v10 = vld [vmem:[#allocation9 + $0x4] ss:$16 sps:$4 sm:$0xff]   ;;  %v9827_v4 = vld [vmem:[#allocation9 + $0x14c] ss:$16 sps:$4 sm:$0xff]  }
 0x430   : > { %5248 = vmatpush1.bf16.msra.mxu0 %v9708_v11  ;;  %5377 = vmatpush1.bf16.msra.mxu1 %v9711_v12  ;;  %v9767_v11 = vld [vmem:[#allocation9 + $0xc] ss:$16 sps:$4 sm:$0xff]   ;;  %v4444_v12 = vshrl.u32 %v4244_v60, 16  ;;  %v9813_v60 = vld [vmem:[#allocation9 + $0x108] ss:$16 sps:$4 sm:$0xff]  }
 0x431   : > { %5249 = vmatprep.subr.bf16.mxu0 %v9716_v13  ;;  %5378 = vmatprep.subr.bf16.mxu1 %v9719_v14  ;;  %v4453_v13 = vrot.slane %v4451_v7, 1  ;;  %v4072_v14 = vld [vmem:[#allocation2 + $0x8] sm:$0xff]  ;;  %v9830_v7 = vld [vmem:[#allocation9 + $0x164] ss:$16 sps:$4 sm:$0xff]  }
 0x432   : > { %v4082_v23 = vpack.c.bf16 %v10827_v31, %v4072_v14  ;;  %v9777_v31 = vld [vmem:[#allocation9 + $0x48] ss:$16 sps:$4 sm:$0xff]   ;;  %v9842_v14 = vld [vmem:[#allocation9 + $0x1a4] ss:$16 sps:$4 sm:$0xff]  }
 0x434   : > { %5250 = vmatpush1.bf16.msra.mxu0 %v9714_v17  ;;  %5379 = vmatpush1.bf16.msra.mxu1 %v9717_v20  ;;  %v4449_v17 = vor.u32 %v4448_v56, %v4444_v12  ;;  %v9762_v20 = vld [vmem:[#allocation9] ss:$16 sps:$4 sm:$0xff]   ;;  %v9831_v56 = vld [vmem:[#allocation9 + $0x168] ss:$16 sps:$4 sm:$0xff]  }
 0x435   : > { %5251 = vmatprep.subr.bf16.mxu0 %v9722_v21  ;;  %5380 = vmatprep.subr.bf16.mxu1 %v9725_v22  ;;  %v9765_v21 = vld [vmem:[#allocation9 + $0x8] ss:$16 sps:$4 sm:$0xff]   ;;  %v9834_v12 = vld [vmem:[#allocation9 + $0x180] ss:$16 sps:$4 sm:$0xff]  }
 0x436   : > { %v4454_v22 = vsel %vm738_vm11, %v4449_v17, %v4453_v13  ;;  %v9837_v13 = vld [vmem:[#allocation9 + $0x188] ss:$16 sps:$4 sm:$0xff]   ;;  %v9845_v17 = vld [vmem:[#allocation9 + $0x1ac] ss:$16 sps:$4 sm:$0xff]  }
 0x438   : > { %5252 = vmatpush1.bf16.msra.mxu0 %v9720_v0  ;;  %5381 = vmatpush1.bf16.msra.mxu1 %v9723_v24  ;;  %v9773_v0 = vld [vmem:[#allocation9 + $0x2c] ss:$16 sps:$4 sm:$0xff]   ;;  %v9768_v24 = vld [vmem:[#allocation9 + $0x20] ss:$16 sps:$4 sm:$0xff]  }
 0x439   : > { %5253 = vmatprep.subr.bf16.mxu0 %v9728_v26  ;;  %5382 = vmatprep.subr.bf16.mxu1 %v9731_v27  ;;  %v9776_v26 = vld [vmem:[#allocation9 + $0x44] ss:$16 sps:$4 sm:$0xff]   ;;  %v9779_v27 = vld [vmem:[#allocation9 + $0x4c] ss:$16 sps:$4 sm:$0xff]  }
 0x43c   : > { %5254 = vmatpush1.bf16.msra.mxu0 %v9726_v29  ;;  %5383 = vmatpush1.bf16.msra.mxu1 %v9729_v30  ;;  %v9782_v29 = vld [vmem:[#allocation9 + $0x64] ss:$16 sps:$4 sm:$0xff]   ;;  %v9785_v30 = vld [vmem:[#allocation9 + $0x6c] ss:$16 sps:$4 sm:$0xff]  }
 0x43d   : > { %5255 = vmatprep.subr.bf16.mxu0 %v9734_v33  ;;  %5384 = vmatprep.subr.bf16.mxu1 %v9737_v34  ;;  %v9783_v33 = vld [vmem:[#allocation9 + $0x68] ss:$16 sps:$4 sm:$0xff]   ;;  %v9788_v34 = vld [vmem:[#allocation9 + $0x84] ss:$16 sps:$4 sm:$0xff]  }
 0x440   : > { %5256 = vmatpush1.bf16.msra.mxu0 %v9732_v36  ;;  %5385 = vmatpush1.bf16.msra.mxu1 %v9735_v38  ;;  %v9786_v36 = vld [vmem:[#allocation9 + $0x80] ss:$16 sps:$4 sm:$0xff]   ;;  %v9789_v38 = vld [vmem:[#allocation9 + $0x88] ss:$16 sps:$4 sm:$0xff]  }
 0x441   : > { %5268 = vmatprep.subr.bf16.mxu0 %v9740_v41  ;;  %5397 = vmatprep.subr.bf16.mxu1 %v9743_v42  ;;  %v9797_v41 = vld [vmem:[#allocation9 + $0xac] ss:$16 sps:$4 sm:$0xff]   ;;  %v9792_v42 = vld [vmem:[#allocation9 + $0xa0] ss:$16 sps:$4 sm:$0xff]  }
 0x443   : > { %5258 = vmatmul.mubr.bf16.vlgmr.msra.gmra.mrb[4].mxu0 %v4430_v54  ;;  %5387 = vmatmul.mubr.bf16.vlgmr.msra.gmra.mrb[4].mxu1 %v4430_v54  ;;  %v9804_v54 = vld [vmem:[#allocation9 + $0xe0] ss:$16 sps:$4 sm:$0xff]  }
 0x444   : > { %5269 = vmatpush1.bf16.msra.mxu0 %v9738_v46  ;;  %5398 = vmatpush1.bf16.msra.mxu1 %v9741_v49  ;;  %v9798_v46 = vld [vmem:[#allocation9 + $0xc0] ss:$16 sps:$4 sm:$0xff]   ;;  %v9801_v49 = vld [vmem:[#allocation9 + $0xc8] ss:$16 sps:$4 sm:$0xff]  }
 0x445   : > { %5270 = vmatprep.subr.bf16.mxu0 %v9746_v50  ;;  %5399 = vmatprep.subr.bf16.mxu1 %v9749_v52  ;;  %v9806_v50 = vld [vmem:[#allocation9 + $0xe4] ss:$16 sps:$4 sm:$0xff]   ;;  %v9809_v52 = vld [vmem:[#allocation9 + $0xec] ss:$16 sps:$4 sm:$0xff]  }
 0x446   : > { %5300 = vmatprep.mubr.bf16.mxu0 %v10440_v48  ;;  %5429 = vmatprep.mubr.bf16.mxu1 %v10440_v48 }
 0x448   : > { %5271 = vmatpush1.bf16.msra.mxu0 %v9744_v58  ;;  %5400 = vmatpush1.bf16.msra.mxu1 %v9747_v59  ;;  %v9815_v58 = vld [vmem:[#allocation9 + $0x10c] ss:$16 sps:$4 sm:$0xff]   ;;  %v9810_v59 = vld [vmem:[#allocation9 + $0x100] ss:$16 sps:$4 sm:$0xff]  }
 0x449   : > { %5272 = vmatprep.subr.bf16.mxu0 %v9752_v61  ;;  %5401 = vmatprep.subr.bf16.mxu1 %v9755_v62  ;;  %v9818_v61 = vld [vmem:[#allocation9 + $0x124] ss:$16 sps:$4 sm:$0xff]   ;;  %v9821_v62 = vld [vmem:[#allocation9 + $0x12c] ss:$16 sps:$4 sm:$0xff]  }
 0x44c   : > { %5273 = vmatpush1.bf16.msra.mxu0 %v9750_v2  ;;  %5402 = vmatpush1.bf16.msra.mxu1 %v9753_v3  ;;  %v9819_v2 = vld [vmem:[#allocation9 + $0x128] ss:$16 sps:$4 sm:$0xff]   ;;  %v9824_v3 = vld [vmem:[#allocation9 + $0x144] ss:$16 sps:$4 sm:$0xff]  }
 0x44d   : > { %5274 = vmatprep.subr.bf16.mxu0 %v9758_v5  ;;  %5403 = vmatprep.subr.bf16.mxu1 %v9761_v6  ;;  %v9822_v5 = vld [vmem:[#allocation9 + $0x140] ss:$16 sps:$4 sm:$0xff]   ;;  %v9825_v6 = vld [vmem:[#allocation9 + $0x148] ss:$16 sps:$4 sm:$0xff]  }
 0x450   : > { %5275 = vmatpush1.bf16.msra.mxu0 %v9756_v8  ;;  %5404 = vmatpush1.bf16.msra.mxu1 %v9759_v9  ;;  %v9833_v8 = vld [vmem:[#allocation9 + $0x16c] ss:$16 sps:$4 sm:$0xff]   ;;  %v9828_v9 = vld [vmem:[#allocation9 + $0x160] ss:$16 sps:$4 sm:$0xff]  }
 0x451   : > { %6163 = vmatprep.subr.bf16.mxu0 %v9764_v10  ;;  %6292 = vmatprep.subr.bf16.mxu1 %v9767_v11  ;;  %v9836_v10 = vld [vmem:[#allocation9 + $0x184] ss:$16 sps:$4 sm:$0xff]   ;;  %v9839_v11 = vld [vmem:[#allocation9 + $0x18c] ss:$16 sps:$4 sm:$0xff]  }
 0x453   : > { %8374 = vmatmul.mubr.msk.bf16.vlgmr.msra.gmra.mrb[4].mxu0 %vm1523_vm12, %v4454_v22  ;;  %8375 = vmatmul.mubr.msk.bf16.vlgmr.msra.gmra.mrb[4].mxu1 %vm1523_vm12, %v4454_v22  ;;  %v9848_v22 = vld [vmem:[#allocation9 + $0x1c4] ss:$16 sps:$4 sm:$0xff]  }
 0x454   : > { %6164 = vmatpush1.bf16.msra.mxu0 %v9762_v20  ;;  %6195 = vmatprep.mubr.bf16.mxu0 %v4082_v23  ;;  %v9840_v20 = vld [vmem:[#allocation9 + $0x1a0] ss:$16 sps:$4 sm:$0xff]  }
 0x455   : > { %6293 = vmatpush1.bf16.msra.mxu1 %v9765_v21  ;;  %6324 = vmatprep.mubr.bf16.mxu1 %v4082_v23  ;;  %v9843_v21 = vld [vmem:[#allocation9 + $0x1a8] ss:$16 sps:$4 sm:$0xff]   ;;  %v9851_v23 = vld [vmem:[#allocation9 + $0x1cc] ss:$16 sps:$4 sm:$0xff]  }
 0x456   : > { %6165 = vmatprep.subr.bf16.mxu0 %v9770_v1  ;;  %6294 = vmatprep.subr.bf16.mxu1 %v9773_v0  ;;  %v9846_v1 = vld [vmem:[#allocation9 + $0x1c0] ss:$16 sps:$4 sm:$0xff]   ;;  %v9849_v0 = vld [vmem:[#allocation9 + $0x1c8] ss:$16 sps:$4 sm:$0xff]  }
 0x458   : > { %6166 = vmatpush1.bf16.msra.mxu0 %v9768_v24  ;;  %v9854_v24 = vld [vmem:[#allocation9 + $0x1e4] ss:$16 sps:$4 sm:$0xff]  }
 0x459   : > { %6295 = vmatpush1.bf16.msra.mxu1 %v9771_v25  ;;  %6167 = vmatprep.subr.bf16.mxu0 %v9776_v26  ;;  %v9857_v25 = vld [vmem:[#allocation9 + $0x1ec] ss:$16 sps:$4 sm:$0xff]   ;;  %v9852_v26 = vld [vmem:[#allocation9 + $0x1e0] ss:$16 sps:$4 sm:$0xff]  }
 0x45a   : > { %6296 = vmatprep.subr.bf16.mxu1 %v9779_v27  ;;  %v9855_v27 = vld [vmem:[#allocation9 + $0x1e8] ss:$16 sps:$4 sm:$0xff]  }
 0x45c   : > { %6168 = vmatpush1.bf16.msra.mxu0 %v9774_v28  ;;  %v9860_v28 = vld [vmem:[#allocation9 + $0x204] ss:$16 sps:$4 sm:$0xff]  }
 0x45d   : > { %6297 = vmatpush1.bf16.msra.mxu1 %v9777_v31  ;;  %6169 = vmatprep.subr.bf16.mxu0 %v9782_v29  ;;  %v9863_v31 = vld [vmem:[#allocation9 + $0x20c] ss:$16 sps:$4 sm:$0xff]   ;;  %v4071_v29 = vld [vmem:[#allocation2] sm:$0xff] }
 0x45e   : > { %6298 = vmatprep.subr.bf16.mxu1 %v9785_v30  ;;  %v9858_v30 = vld [vmem:[#allocation9 + $0x200] ss:$16 sps:$4 sm:$0xff]  }
 0x460   : > { %6170 = vmatpush1.bf16.msra.mxu0 %v9780_v32  ;;  %v4074_v32 = vld [vmem:[#allocation2 + $0x18] sm:$0xff] }
 0x461   : > { %6299 = vmatpush1.bf16.msra.mxu1 %v9783_v33  ;;  %6171 = vmatprep.subr.bf16.mxu0 %v9788_v34  ;;  %v4081_v33 = vpack.c.bf16 %v10833_v39, %v4071_v29  ;;  %v9861_v34 = vld [vmem:[#allocation9 + $0x208] ss:$16 sps:$4 sm:$0xff]   ;;  %v9870_v39 = vld [vmem:[#allocation9 + $0x240] ss:$16 sps:$4 sm:$0xff]  }
 0x462   : > { %6300 = vmatprep.subr.bf16.mxu1 %v9791_v35  ;;  %v9866_v35 = vld [vmem:[#allocation9 + $0x224] ss:$16 sps:$4 sm:$0xff]   ;;  %v9936_v29 = vld [vmem:[#allocation9 + $0x3a0] ss:$16 sps:$4 sm:$0xff]  }
 0x464   : > { %6172 = vmatpush1.bf16.msra.mxu0 %v9786_v36  ;;  %v4084_v36 = vpack.c.bf16 %v10844_v53, %v4074_v32  ;;  %v9881_v53 = vld [vmem:[#allocation9 + $0x26c] ss:$16 sps:$4 sm:$0xff]   ;;  %v9944_v32 = vld [vmem:[#allocation9 + $0x3c4] ss:$16 sps:$4 sm:$0xff]  }
 0x465   : > { %6301 = vmatpush1.bf16.msra.mxu1 %v9789_v38  ;;  %6173 = vmatprep.subr.bf16.mxu0 %v9794_v40  ;;  %v9869_v38 = vld [vmem:[#allocation9 + $0x22c] ss:$16 sps:$4 sm:$0xff]   ;;  %v9864_v40 = vld [vmem:[#allocation9 + $0x220] ss:$16 sps:$4 sm:$0xff]  }
 0x466   : > { %6302 = vmatprep.subr.bf16.mxu1 %v9797_v41  ;;  %v9867_v41 = vld [vmem:[#allocation9 + $0x228] ss:$16 sps:$4 sm:$0xff]  }
 0x468   : > { %6174 = vmatpush1.bf16.msra.mxu0 %v9792_v42  ;;  %v9872_v42 = vld [vmem:[#allocation9 + $0x244] ss:$16 sps:$4 sm:$0xff]  }
 0x469   : > { %6303 = vmatpush1.bf16.msra.mxu1 %v9795_v43  ;;  %6175 = vmatprep.subr.bf16.mxu0 %v9800_v44  ;;  %v9875_v43 = vld [vmem:[#allocation9 + $0x24c] ss:$16 sps:$4 sm:$0xff]   ;;  %v9873_v44 = vld [vmem:[#allocation9 + $0x248] ss:$16 sps:$4 sm:$0xff]  }
 0x46a   : > { %6304 = vmatprep.subr.bf16.mxu1 %v9803_v45  ;;  %v9878_v45 = vld [vmem:[#allocation9 + $0x264] ss:$16 sps:$4 sm:$0xff]  }
 0x46c   : > { %6176 = vmatpush1.bf16.msra.mxu0 %v9798_v46  ;;  %v9876_v46 = vld [vmem:[#allocation9 + $0x260] ss:$16 sps:$4 sm:$0xff]  }
 0x46d   : > { %6305 = vmatpush1.bf16.msra.mxu1 %v9801_v49  ;;  %6177 = vmatprep.subr.bf16.mxu0 %v9806_v50  ;;  %v9879_v49 = vld [vmem:[#allocation9 + $0x268] ss:$16 sps:$4 sm:$0xff]   ;;  %v9884_v50 = vld [vmem:[#allocation9 + $0x284] ss:$16 sps:$4 sm:$0xff]  }
 0x46e   : > { %6306 = vmatprep.subr.bf16.mxu1 %v9809_v52  ;;  %v9887_v52 = vld [vmem:[#allocation9 + $0x28c] ss:$16 sps:$4 sm:$0xff]  }
 0x470   : > { %6178 = vmatpush1.bf16.msra.mxu0 %v9804_v54  ;;  %v9882_v54 = vld [vmem:[#allocation9 + $0x280] ss:$16 sps:$4 sm:$0xff]  }
 0x471   : > { %6307 = vmatpush1.bf16.msra.mxu1 %v9807_v55  ;;  %6179 = vmatprep.subr.bf16.mxu0 %v9812_v57  ;;  %v9885_v55 = vld [vmem:[#allocation9 + $0x288] ss:$16 sps:$4 sm:$0xff]   ;;  %v9890_v57 = vld [vmem:[#allocation9 + $0x2a4] ss:$16 sps:$4 sm:$0xff]  }
 0x472   : > { %6308 = vmatprep.subr.bf16.mxu1 %v9815_v58  ;;  %v9893_v58 = vld [vmem:[#allocation9 + $0x2ac] ss:$16 sps:$4 sm:$0xff]  }
 0x474   : > { %6180 = vmatpush1.bf16.msra.mxu0 %v9810_v59  ;;  %v9888_v59 = vld [vmem:[#allocation9 + $0x2a0] ss:$16 sps:$4 sm:$0xff]  }
 0x475   : > { %6309 = vmatpush1.bf16.msra.mxu1 %v9813_v60  ;;  %6181 = vmatprep.subr.bf16.mxu0 %v9818_v61  ;;  %v9891_v60 = vld [vmem:[#allocation9 + $0x2a8] ss:$16 sps:$4 sm:$0xff]   ;;  %v9896_v61 = vld [vmem:[#allocation9 + $0x2c4] ss:$16 sps:$4 sm:$0xff]  }
 0x476   : > { %6310 = vmatprep.subr.bf16.mxu1 %v9821_v62  ;;  %v9899_v62 = vld [vmem:[#allocation9 + $0x2cc] ss:$16 sps:$4 sm:$0xff]  }
 0x478   : > { %6182 = vmatpush1.bf16.msra.mxu0 %v9816_v63  ;;  %v9894_v63 = vld [vmem:[#allocation9 + $0x2c0] ss:$16 sps:$4 sm:$0xff]  }
 0x479   : > { %6311 = vmatpush1.bf16.msra.mxu1 %v9819_v2  ;;  %6183 = vmatprep.subr.bf16.mxu0 %v9824_v3  ;;  %v9897_v2 = vld [vmem:[#allocation9 + $0x2c8] ss:$16 sps:$4 sm:$0xff]   ;;  %v9902_v3 = vld [vmem:[#allocation9 + $0x2e4] ss:$16 sps:$4 sm:$0xff]  }
 0x47a   : > { %6312 = vmatprep.subr.bf16.mxu1 %v9827_v4  ;;  %v9905_v4 = vld [vmem:[#allocation9 + $0x2ec] ss:$16 sps:$4 sm:$0xff]  }
 0x47c   : > { %6184 = vmatpush1.bf16.msra.mxu0 %v9822_v5  ;;  %v9900_v5 = vld [vmem:[#allocation9 + $0x2e0] ss:$16 sps:$4 sm:$0xff]  }
 0x47d   : > { %6313 = vmatpush1.bf16.msra.mxu1 %v9825_v6  ;;  %6185 = vmatprep.subr.bf16.mxu0 %v9830_v7  ;;  %v9903_v6 = vld [vmem:[#allocation9 + $0x2e8] ss:$16 sps:$4 sm:$0xff]   ;;  %v9908_v7 = vld [vmem:[#allocation9 + $0x304] ss:$16 sps:$4 sm:$0xff]  }
 0x47e   : > { %6314 = vmatprep.subr.bf16.mxu1 %v9833_v8  ;;  %v9911_v8 = vld [vmem:[#allocation9 + $0x30c] ss:$16 sps:$4 sm:$0xff]  }
 0x480   : > { %6186 = vmatpush1.bf16.msra.mxu0 %v9828_v9  ;;  %v9906_v9 = vld [vmem:[#allocation9 + $0x300] ss:$16 sps:$4 sm:$0xff]  }
 0x481   : > { %6315 = vmatpush1.bf16.msra.mxu1 %v9831_v56  ;;  %6187 = vmatprep.subr.bf16.mxu0 %v9836_v10  ;;  %v9909_v56 = vld [vmem:[#allocation9 + $0x308] ss:$16 sps:$4 sm:$0xff]   ;;  %v9914_v10 = vld [vmem:[#allocation9 + $0x324] ss:$16 sps:$4 sm:$0xff]  }
 0x482   : > { %6316 = vmatprep.subr.bf16.mxu1 %v9839_v11  ;;  %v9917_v11 = vld [vmem:[#allocation9 + $0x32c] ss:$16 sps:$4 sm:$0xff]  }
 0x484   : > { %6188 = vmatpush1.bf16.msra.mxu0 %v9834_v12  ;;  %v9912_v12 = vld [vmem:[#allocation9 + $0x320] ss:$16 sps:$4 sm:$0xff]  }
 0x485   : > { %6317 = vmatpush1.bf16.msra.mxu1 %v9837_v13  ;;  %6189 = vmatprep.subr.bf16.mxu0 %v9842_v14  ;;  %v9915_v13 = vld [vmem:[#allocation9 + $0x328] ss:$16 sps:$4 sm:$0xff]   ;;  %v9920_v14 = vld [vmem:[#allocation9 + $0x344] ss:$16 sps:$4 sm:$0xff]  }
 0x486   : > { %6318 = vmatprep.subr.bf16.mxu1 %v9845_v17  ;;  %v9923_v17 = vld [vmem:[#allocation9 + $0x34c] ss:$16 sps:$4 sm:$0xff]  }
 0x488   : > { %6190 = vmatpush1.bf16.msra.mxu0 %v9840_v20  ;;  %v9918_v20 = vld [vmem:[#allocation9 + $0x340] ss:$16 sps:$4 sm:$0xff]  }
 0x489   : > { %6319 = vmatpush1.bf16.msra.mxu1 %v9843_v21  ;;  %6191 = vmatprep.subr.bf16.mxu0 %v9848_v22  ;;  %v9921_v21 = vld [vmem:[#allocation9 + $0x348] ss:$16 sps:$4 sm:$0xff]   ;;  %v9926_v22 = vld [vmem:[#allocation9 + $0x364] ss:$16 sps:$4 sm:$0xff]  }
 0x48a   : > { %6320 = vmatprep.subr.bf16.mxu1 %v9851_v23  ;;  %v9929_v23 = vld [vmem:[#allocation9 + $0x36c] ss:$16 sps:$4 sm:$0xff]  }
 0x48c   : > { %6192 = vmatpush1.bf16.msra.mxu0 %v9846_v1  ;;  %v9924_v1 = vld [vmem:[#allocation9 + $0x360] ss:$16 sps:$4 sm:$0xff]  }
 0x48d   : > { %6321 = vmatpush1.bf16.msra.mxu1 %v9849_v0  ;;  %6193 = vmatprep.subr.bf16.mxu0 %v9854_v24  ;;  %v9927_v0 = vld [vmem:[#allocation9 + $0x368] ss:$16 sps:$4 sm:$0xff]   ;;  %v9932_v24 = vld [vmem:[#allocation9 + $0x384] ss:$16 sps:$4 sm:$0xff]  }
 0x48e   : > { %6322 = vmatprep.subr.bf16.mxu1 %v9857_v25  ;;  %v9935_v25 = vld [vmem:[#allocation9 + $0x38c] ss:$16 sps:$4 sm:$0xff]  }
 0x490   : > { %6194 = vmatpush1.bf16.msra.mxu0 %v9852_v26  ;;  %v9930_v26 = vld [vmem:[#allocation9 + $0x380] ss:$16 sps:$4 sm:$0xff]  }
 0x491   : > { %6323 = vmatpush1.bf16.msra.mxu1 %v9855_v27  ;;  %6206 = vmatprep.subr.bf16.mxu0 %v9860_v28  ;;  %v9933_v27 = vld [vmem:[#allocation9 + $0x388] ss:$16 sps:$4 sm:$0xff]   ;;  %v9938_v28 = vld [vmem:[#allocation9 + $0x3a4] ss:$16 sps:$4 sm:$0xff]  }
 0x492   : > { %6335 = vmatprep.subr.bf16.mxu1 %v9863_v31  ;;  %v9941_v31 = vld [vmem:[#allocation9 + $0x3ac] ss:$16 sps:$4 sm:$0xff]  }
 0x493   : > { %6196 = vmatmul.mubr.bf16.vlgmr.msra.gmra.mrb[4].mxu0 %v4081_v33 }
 0x494   : > { %6325 = vmatmul.mubr.bf16.vlgmr.msra.gmra.mrb[4].mxu1 %v4081_v33  ;;  %6207 = vmatpush1.bf16.msra.mxu0 %v9858_v30  ;;  %v9939_v30 = vld [vmem:[#allocation9 + $0x3a8] ss:$16 sps:$4 sm:$0xff]   ;;  %v9947_v33 = vld [vmem:[#allocation9 + $0x3cc] ss:$16 sps:$4 sm:$0xff]  }
 0x495   : > { %6238 = vmatprep.mubr.bf16.mxu0 %v4084_v36  ;;  %6336 = vmatpush1.bf16.msra.mxu1 %v9861_v34  ;;  %v9942_v34 = vld [vmem:[#allocation9 + $0x3c0] ss:$16 sps:$4 sm:$0xff]  }
 0x496   : > { %6367 = vmatprep.mubr.bf16.mxu1 %v4084_v36  ;;  %6208 = vmatprep.subr.bf16.mxu0 %v9866_v35  ;;  %v9945_v35 = vld [vmem:[#allocation9 + $0x3c8] ss:$16 sps:$4 sm:$0xff]   ;;  %v9950_v36 = vld [vmem:[#allocation9 + $0x3e4] ss:$16 sps:$4 sm:$0xff]  }
 0x497   : > { %6337 = vmatprep.subr.bf16.mxu1 %v9869_v38  ;;  %v9953_v38 = vld [vmem:[#allocation9 + $0x3ec] ss:$16 sps:$4 sm:$0xff]  }
 0x498   : > { %6209 = vmatpush1.bf16.msra.mxu0 %v9864_v40  ;;  %v9948_v40 = vld [vmem:[#allocation9 + $0x3e0] ss:$16 sps:$4 sm:$0xff]  }
 0x499   : > { %6338 = vmatpush1.bf16.msra.mxu1 %v9867_v41  ;;  %6210 = vmatprep.subr.bf16.mxu0 %v9872_v42  ;;  %v9951_v41 = vld [vmem:[#allocation9 + $0x3e8] ss:$16 sps:$4 sm:$0xff]   ;;  %v9956_v42 = vld [vmem:[#allocation9 + $0x404] ss:$16 sps:$4 sm:$0xff]  }
 0x49a   : > { %6339 = vmatprep.subr.bf16.mxu1 %v9875_v43  ;;  %v4073_v43 = vld [vmem:[#allocation2 + $0x10] sm:$0xff] }
 0x49c   : > { %6211 = vmatpush1.bf16.msra.mxu0 %v9870_v39  ;;  %v9959_v39 = vld [vmem:[#allocation9 + $0x40c] ss:$16 sps:$4 sm:$0xff]  }
 0x49d   : > { %6340 = vmatpush1.bf16.msra.mxu1 %v9873_v44  ;;  %6212 = vmatprep.subr.bf16.mxu0 %v9878_v45  ;;  %v9954_v44 = vld [vmem:[#allocation9 + $0x400] ss:$16 sps:$4 sm:$0xff]   ;;  %v4083_v45 = vpack.c.bf16 %v10840_v51, %v4073_v43  ;;  %v10023_v43 = vld [vmem:[#allocation9 + $0x9e8] ss:$16 sps:$4 sm:$0xff]  }
 0x49e   : > { %6341 = vmatprep.subr.bf16.mxu1 %v9881_v53  ;;  %v9957_v53 = vld [vmem:[#allocation9 + $0x408] ss:$16 sps:$4 sm:$0xff]   ;;  %v9966_v51 = vld [vmem:[#allocation9 + $0x440] ss:$16 sps:$4 sm:$0xff]  }
 0x4a0   : > { %6213 = vmatpush1.bf16.msra.mxu0 %v9876_v46  ;;  %v9962_v46 = vld [vmem:[#allocation9 + $0x424] ss:$16 sps:$4 sm:$0xff]  }
 0x4a1   : > { %6342 = vmatpush1.bf16.msra.mxu1 %v9879_v49  ;;  %6214 = vmatprep.subr.bf16.mxu0 %v9884_v50  ;;  %v9965_v49 = vld [vmem:[#allocation9 + $0x42c] ss:$16 sps:$4 sm:$0xff]   ;;  %v9960_v50 = vld [vmem:[#allocation9 + $0x420] ss:$16 sps:$4 sm:$0xff]  }
 0x4a2   : > { %6343 = vmatprep.subr.bf16.mxu1 %v9887_v52  ;;  %v9963_v52 = vld [vmem:[#allocation9 + $0x428] ss:$16 sps:$4 sm:$0xff]  }
 0x4a4   : > { %6215 = vmatpush1.bf16.msra.mxu0 %v9882_v54  ;;  %v9968_v54 = vld [vmem:[#allocation9 + $0x444] ss:$16 sps:$4 sm:$0xff]  }
 0x4a5   : > { %6344 = vmatpush1.bf16.msra.mxu1 %v9885_v55  ;;  %6216 = vmatprep.subr.bf16.mxu0 %v9890_v57  ;;  %v9971_v55 = vld [vmem:[#allocation9 + $0x44c] ss:$16 sps:$4 sm:$0xff]   ;;  %v9969_v57 = vld [vmem:[#allocation9 + $0x448] ss:$16 sps:$4 sm:$0xff]  }
 0x4a6   : > { %6345 = vmatprep.subr.bf16.mxu1 %v9893_v58  ;;  %v9974_v58 = vld [vmem:[#allocation9 + $0x464] ss:$16 sps:$4 sm:$0xff]  }
 0x4a8   : > { %6217 = vmatpush1.bf16.msra.mxu0 %v9888_v59  ;;  %v6427_v59 = vld [vmem:[#allocation2 + $0x58] sm:$0x3] }
 0x4a9   : > { %6346 = vmatpush1.bf16.msra.mxu1 %v9891_v60  ;;  %6218 = vmatprep.subr.bf16.mxu0 %v9896_v61  ;;  %v9977_v60 = vld [vmem:[#allocation9 + $0x46c] ss:$16 sps:$4 sm:$0xff]  }
 0x4aa   : > { %6347 = vmatprep.subr.bf16.mxu1 %v9899_v62  ;;  %v6422_v61 = vld [vmem:[#allocation2 + $0x8] sm:$0xfc] }
 0x4ab   : > { %v9972_v62 = vld [vmem:[#allocation9 + $0x460] ss:$16 sps:$4 sm:$0xff]  }
 0x4ac   : > { %6219 = vmatpush1.bf16.msra.mxu0 %v9894_v63  ;;  %v6437_v63 = vpack.c.bf16 %v6427_v59, %v6427_v59  ;;  %v10049_v59 = vld [vmem:[#allocation9 + $0xa6c] ss:$16 sps:$4 sm:$0xff]  }
 0x4ad   : > { %6348 = vmatpush1.bf16.msra.mxu1 %v9897_v2  ;;  %6220 = vmatprep.subr.bf16.mxu0 %v9902_v3  ;;  %v9975_v2 = vld [vmem:[#allocation9 + $0x468] ss:$16 sps:$4 sm:$0xff]   ;;  %v9980_v3 = vld [vmem:[#allocation9 + $0x904] ss:$16 sps:$4 sm:$0xff]  }
 0x4ae   : > { %6349 = vmatprep.subr.bf16.mxu1 %v9905_v4  ;;  %v9983_v4 = vld [vmem:[#allocation9 + $0x90c] ss:$16 sps:$4 sm:$0xff]  }
 0x4b0   : > { %6221 = vmatpush1.bf16.msra.mxu0 %v9900_v5  ;;  %v10198_v5 = vld [vmem:[#allocation2 + $0x30] sm:$0xff] }
 0x4b1   : > { %6350 = vmatpush1.bf16.msra.mxu1 %v9903_v6  ;;  %6222 = vmatprep.subr.bf16.mxu0 %v9908_v7  ;;  %v6432_v6 = vpack.c.bf16 %v10198_v5, %v6422_v61  ;;  %v4075_v7 = vld [vmem:[#allocation2 + $0x20] sm:$0xff]  ;;  %v10061_v5 = vld [vmem:[#allocation9 + $0xaac] ss:$16 sps:$4 sm:$0xff]  }
 0x4b2   : > { %6351 = vmatprep.subr.bf16.mxu1 %v9911_v8  ;;  %v9978_v8 = vld [vmem:[#allocation9 + $0x900] ss:$16 sps:$4 sm:$0xff]   ;;  %v10047_v61 = vld [vmem:[#allocation9 + $0xa68] ss:$16 sps:$4 sm:$0xff]  }
 0x4b4   : > { %6223 = vmatpush1.bf16.msra.mxu0 %v9906_v9  ;;  %v6600_v9 = vrot.slane %v6437_v63, 1  ;;  %v10055_v63 = vld [vmem:[#allocation9 + $0xa8c] ss:$16 sps:$4 sm:$0xff]  }
 0x4b5   : > { %6352 = vmatpush1.bf16.msra.mxu1 %v9909_v56  ;;  %6224 = vmatprep.subr.bf16.mxu0 %v9914_v10  ;;  %v4085_v56 = vpack.c.bf16 %v10856_v37, %v4075_v7  ;;  %v9981_v10 = vld [vmem:[#allocation9 + $0x908] ss:$16 sps:$4 sm:$0xff]   ;;  %v9995_v37 = vld [vmem:[#allocation9 + $0x94c] ss:$16 sps:$4 sm:$0xff]  }
 0x4b6   : > { %6353 = vmatprep.subr.bf16.mxu1 %v9917_v11  ;;  %v6599_v11 = vrot.slane %v6432_v6, 1  ;;  %v10056_v6 = vld [vmem:[#allocation9 + $0xaa0] ss:$16 sps:$4 sm:$0xff]   ;;  %v10059_v7 = vld [vmem:[#allocation9 + $0xaa8] ss:$16 sps:$4 sm:$0xff]  }
 0x4b8   : > { %6225 = vmatpush1.bf16.msra.mxu0 %v9912_v12  ;;  %v9986_v12 = vld [vmem:[#allocation9 + $0x924] ss:$16 sps:$4 sm:$0xff]  }
 0x4b9   : > { %6354 = vmatpush1.bf16.msra.mxu1 %v9915_v13  ;;  %6226 = vmatprep.subr.bf16.mxu0 %v9920_v14  ;;  %v9989_v13 = vld [vmem:[#allocation9 + $0x92c] ss:$16 sps:$4 sm:$0xff]   ;;  %v6601_v14 = vsel %vm2941_vm13, %v6599_v11, %v6600_v9  ;;  %v10065_v11 = vld [vmem:[#allocation9 + $0xac8] ss:$16 sps:$4 sm:$0xff]  }
 0x4ba   : > { %6355 = vmatprep.subr.bf16.mxu1 %v9923_v17  ;;  %v9984_v17 = vld [vmem:[#allocation9 + $0x920] ss:$16 sps:$4 sm:$0xff]   ;;  %v10067_v9 = vld [vmem:[#allocation9 + $0xacc] ss:$16 sps:$4 sm:$0xff]  }
 0x4bc   : > { %6227 = vmatpush1.bf16.msra.mxu0 %v9918_v20  ;;  %v9987_v20 = vld [vmem:[#allocation9 + $0x928] ss:$16 sps:$4 sm:$0xff]  }
 0x4bd   : > { %6356 = vmatpush1.bf16.msra.mxu1 %v9921_v21  ;;  %6228 = vmatprep.subr.bf16.mxu0 %v9926_v22  ;;  %v9992_v21 = vld [vmem:[#allocation9 + $0x944] ss:$16 sps:$4 sm:$0xff]   ;;  %v9990_v22 = vld [vmem:[#allocation9 + $0x940] ss:$16 sps:$4 sm:$0xff]  }
 0x4be   : > { %6357 = vmatprep.subr.bf16.mxu1 %v9929_v23  ;;  %v9993_v23 = vld [vmem:[#allocation9 + $0x948] ss:$16 sps:$4 sm:$0xff]  }
 0x4c0   : > { %6229 = vmatpush1.bf16.msra.mxu0 %v9924_v1  ;;  %v9998_v1 = vld [vmem:[#allocation9 + $0x964] ss:$16 sps:$4 sm:$0xff]  }
 0x4c1   : > { %6358 = vmatpush1.bf16.msra.mxu1 %v9927_v0  ;;  %6230 = vmatprep.subr.bf16.mxu0 %v9932_v24  ;;  %v10001_v0 = vld [vmem:[#allocation9 + $0x96c] ss:$16 sps:$4 sm:$0xff]   ;;  %v9996_v24 = vld [vmem:[#allocation9 + $0x960] ss:$16 sps:$4 sm:$0xff]  }
 0x4c2   : > { %6359 = vmatprep.subr.bf16.mxu1 %v9935_v25  ;;  %v9999_v25 = vld [vmem:[#allocation9 + $0x968] ss:$16 sps:$4 sm:$0xff]  }
 0x4c4   : > { %6231 = vmatpush1.bf16.msra.mxu0 %v9930_v26  ;;  %v10004_v26 = vld [vmem:[#allocation9 + $0x984] ss:$16 sps:$4 sm:$0xff]  }
 0x4c5   : > { %6360 = vmatpush1.bf16.msra.mxu1 %v9933_v27  ;;  %6232 = vmatprep.subr.bf16.mxu0 %v9938_v28  ;;  %v10007_v27 = vld [vmem:[#allocation9 + $0x98c] ss:$16 sps:$4 sm:$0xff]   ;;  %v10002_v28 = vld [vmem:[#allocation9 + $0x980] ss:$16 sps:$4 sm:$0xff]  }
 0x4c6   : > { %6361 = vmatprep.subr.bf16.mxu1 %v9941_v31  ;;  %v10005_v31 = vld [vmem:[#allocation9 + $0x988] ss:$16 sps:$4 sm:$0xff]  }
 0x4c8   : > { %6233 = vmatpush1.bf16.msra.mxu0 %v9936_v29  ;;  %v10010_v29 = vld [vmem:[#allocation9 + $0x9a4] ss:$16 sps:$4 sm:$0xff]  }
 0x4c9   : > { %6362 = vmatpush1.bf16.msra.mxu1 %v9939_v30  ;;  %6234 = vmatprep.subr.bf16.mxu0 %v9944_v32  ;;  %v10013_v30 = vld [vmem:[#allocation9 + $0x9ac] ss:$16 sps:$4 sm:$0xff]   ;;  %v10008_v32 = vld [vmem:[#allocation9 + $0x9a0] ss:$16 sps:$4 sm:$0xff]  }
 0x4ca   : > { %6363 = vmatprep.subr.bf16.mxu1 %v9947_v33  ;;  %v10011_v33 = vld [vmem:[#allocation9 + $0x9a8] ss:$16 sps:$4 sm:$0xff]  }
 0x4cc   : > { %6235 = vmatpush1.bf16.msra.mxu0 %v9942_v34  ;;  %v10016_v34 = vld [vmem:[#allocation9 + $0x9c4] ss:$16 sps:$4 sm:$0xff]  }
 0x4cd   : > { %6364 = vmatpush1.bf16.msra.mxu1 %v9945_v35  ;;  %6236 = vmatprep.subr.bf16.mxu0 %v9950_v36  ;;  %v10019_v35 = vld [vmem:[#allocation9 + $0x9cc] ss:$16 sps:$4 sm:$0xff]   ;;  %v10014_v36 = vld [vmem:[#allocation9 + $0x9c0] ss:$16 sps:$4 sm:$0xff]  }
 0x4ce   : > { %6365 = vmatprep.subr.bf16.mxu1 %v9953_v38  ;;  %v10017_v38 = vld [vmem:[#allocation9 + $0x9c8] ss:$16 sps:$4 sm:$0xff]  }
 0x4d0   : > { %6237 = vmatpush1.bf16.msra.mxu0 %v9948_v40  ;;  %v10022_v40 = vld [vmem:[#allocation9 + $0x9e4] ss:$16 sps:$4 sm:$0xff]  }
 0x4d1   : > { %6366 = vmatpush1.bf16.msra.mxu1 %v9951_v41  ;;  %6249 = vmatprep.subr.bf16.mxu0 %v9956_v42  ;;  %v10025_v41 = vld [vmem:[#allocation9 + $0x9ec] ss:$16 sps:$4 sm:$0xff]   ;;  %v10020_v42 = vld [vmem:[#allocation9 + $0x9e0] ss:$16 sps:$4 sm:$0xff]  }
 0x4d2   : > { %6378 = vmatprep.subr.bf16.mxu1 %v9959_v39  ;;  %v10028_v39 = vld [vmem:[#allocation9 + $0xa04] ss:$16 sps:$4 sm:$0xff]  }
 0x4d3   : > { %6239 = vmatmul.mubr.bf16.vlgmr.msra.gmra.mrb[4].mxu0 %v4083_v45 }
 0x4d4   : > { %6368 = vmatmul.mubr.bf16.vlgmr.msra.gmra.mrb[4].mxu1 %v4083_v45  ;;  %6250 = vmatpush1.bf16.msra.mxu0 %v9954_v44  ;;  %v10031_v44 = vld [vmem:[#allocation9 + $0xa0c] ss:$16 sps:$4 sm:$0xff]   ;;  %v10026_v45 = vld [vmem:[#allocation9 + $0xa00] ss:$16 sps:$4 sm:$0xff]  }
 0x4d5   : > { %6379 = vmatpush1.bf16.msra.mxu1 %v9957_v53  ;;  %6251 = vmatprep.subr.bf16.mxu0 %v9962_v46  ;;  %v10029_v53 = vld [vmem:[#allocation9 + $0xa08] ss:$16 sps:$4 sm:$0xff]   ;;  %v10034_v46 = vld [vmem:[#allocation9 + $0xa24] ss:$16 sps:$4 sm:$0xff]  }
 0x4d6   : > { %6380 = vmatprep.subr.bf16.mxu1 %v9965_v49  ;;  %6281 = vmatprep.mubr.bf16.mxu0 %v10440_v48  ;;  %v10037_v49 = vld [vmem:[#allocation9 + $0xa2c] ss:$16 sps:$4 sm:$0xff]  }
 0x4d7   : > { %6410 = vmatprep.mubr.bf16.mxu1 %v10440_v48 }
 0x4d8   : > { %6252 = vmatpush1.bf16.msra.mxu0 %v9960_v50  ;;  %v10032_v50 = vld [vmem:[#allocation9 + $0xa20] ss:$16 sps:$4 sm:$0xff]  }
 0x4d9   : > { %6381 = vmatpush1.bf16.msra.mxu1 %v9963_v52  ;;  %6253 = vmatprep.subr.bf16.mxu0 %v9968_v54  ;;  %v10035_v52 = vld [vmem:[#allocation9 + $0xa28] ss:$16 sps:$4 sm:$0xff]   ;;  %v10040_v54 = vld [vmem:[#allocation9 + $0xa44] ss:$16 sps:$4 sm:$0xff]  }
 0x4da   : > { %6382 = vmatprep.subr.bf16.mxu1 %v9971_v55  ;;  %v10043_v55 = vld [vmem:[#allocation9 + $0xa4c] ss:$16 sps:$4 sm:$0xff]  }
 0x4dc   : > { %6254 = vmatpush1.bf16.msra.mxu0 %v9966_v51  ;;  %v10038_v51 = vld [vmem:[#allocation9 + $0xa40] ss:$16 sps:$4 sm:$0xff]  }
 0x4dd   : > { %6383 = vmatpush1.bf16.msra.mxu1 %v9969_v57  ;;  %6255 = vmatprep.subr.bf16.mxu0 %v9974_v58  ;;  %v10041_v57 = vld [vmem:[#allocation9 + $0xa48] ss:$16 sps:$4 sm:$0xff]   ;;  %v10046_v58 = vld [vmem:[#allocation9 + $0xa64] ss:$16 sps:$4 sm:$0xff]  }
 0x4de   : > { %6384 = vmatprep.subr.bf16.mxu1 %v9977_v60  ;;  %v10044_v60 = vld [vmem:[#allocation9 + $0xa60] ss:$16 sps:$4 sm:$0xff]  }
 0x4e0   : > { %6256 = vmatpush1.bf16.msra.mxu0 %v9972_v62  ;;  %v10052_v62 = vld [vmem:[#allocation9 + $0xa84] ss:$16 sps:$4 sm:$0xff]  }
 0x4e1   : > { %6385 = vmatpush1.bf16.msra.mxu1 %v9975_v2  ;;  %7338 = vmatprep.subr.bf16.mxu0 %v9980_v3  ;;  %v10050_v2 = vld [vmem:[#allocation9 + $0xa80] ss:$16 sps:$4 sm:$0xff]   ;;  %v10053_v3 = vld [vmem:[#allocation9 + $0xa88] ss:$16 sps:$4 sm:$0xff]  }
 0x4e2   : > { %7467 = vmatprep.subr.bf16.mxu1 %v9983_v4  ;;  %v10058_v4 = vld [vmem:[#allocation9 + $0xaa4] ss:$16 sps:$4 sm:$0xff]  }
 0x4e3   : > { %8520 = vmatmul.mubr.msk.bf16.vlgmr.msra.gmra.mrb[4].mxu0 %vm1523_vm12, %v4085_v56 }
 0x4e4   : > { %8521 = vmatmul.mubr.msk.bf16.vlgmr.msra.gmra.mrb[4].mxu1 %vm1523_vm12, %v4085_v56  ;;  %7339 = vmatpush1.bf16.msra.mxu0 %v9978_v8  ;;  %v10064_v8 = vld [vmem:[#allocation9 + $0xac4] ss:$16 sps:$4 sm:$0xff]  }
 0x4e5   : > { %7370 = vmatprep.mubr.bf16.mxu0 %v6601_v14  ;;  %7468 = vmatpush1.bf16.msra.mxu1 %v9981_v10  ;;  %v6426_v56 = vld [vmem:[#allocation2 + $0x50] sm:$0x3]  ;;  %v10062_v10 = vld [vmem:[#allocation9 + $0xac0] ss:$16 sps:$4 sm:$0xff]  }
 0x4e6   : > { %7499 = vmatprep.mubr.bf16.mxu1 %v6601_v14  ;;  %7340 = vmatprep.subr.bf16.mxu0 %v9986_v12  ;;  %v10070_v12 = vld [vmem:[#allocation9 + $0xae4] ss:$16 sps:$4 sm:$0xff]   ;;  %v10073_v14 = vld [vmem:[#allocation9 + $0xaec] ss:$16 sps:$4 sm:$0xff]  }
 0x4e7   : > { %7469 = vmatprep.subr.bf16.mxu1 %v9989_v13  ;;  %v6429_v13 = vld [vmem:[#allocation2 + $0x68] sm:$0x3] }
 0x4e8   : > { %7341 = vmatpush1.bf16.msra.mxu0 %v9984_v17  ;;  %v6436_v17 = vpack.c.bf16 %v6426_v56, %v6426_v56  ;;  %v10130_v56 = vld [vmem:[#allocation9 + $0xc24] ss:$16 sps:$4 sm:$0xff]  }
 0x4e9   : > { %7470 = vmatpush1.bf16.msra.mxu1 %v9987_v20  ;;  %7342 = vmatprep.subr.bf16.mxu0 %v9992_v21  ;;  %v6421_v20 = vld [vmem:[#allocation2] sm:$0xfc]  ;;  %v6424_v21 = vld [vmem:[#allocation2 + $0x18] sm:$0xfc] }
 0x4ea   : > { %7471 = vmatprep.subr.bf16.mxu1 %v9995_v37  ;;  %v10068_v37 = vld [vmem:[#allocation9 + $0xae0] ss:$16 sps:$4 sm:$0xff]  }
 0x4ec   : > { %7343 = vmatpush1.bf16.msra.mxu0 %v9990_v22  ;;  %v10199_v22 = vld [vmem:[#allocation2 + $0x28] sm:$0xff] }
 0x4ed   : > { %7472 = vmatpush1.bf16.msra.mxu1 %v9993_v23  ;;  %7344 = vmatprep.subr.bf16.mxu0 %v9998_v1  ;;  %v6431_v23 = vpack.c.bf16 %v10199_v22, %v6421_v20  ;;  %v6439_v1 = vpack.c.bf16 %v6429_v13, %v6429_v13  ;;  %v10136_v13 = vld [vmem:[#allocation9 + $0xc44] ss:$16 sps:$4 sm:$0xff]   ;;  %v10137_v20 = vld [vmem:[#allocation9 + $0xc48] ss:$16 sps:$4 sm:$0xff]   ;;  %v10140_v22 = vld [vmem:[#allocation9 + $0xc60] ss:$16 sps:$4 sm:$0xff]  }
 0x4ee   : > { %7473 = vmatprep.subr.bf16.mxu1 %v10001_v0  ;;  %v10071_v0 = vld [vmem:[#allocation9 + $0xae8] ss:$16 sps:$4 sm:$0xff]  }
 0x4f0   : > { %7345 = vmatpush1.bf16.msra.mxu0 %v9996_v24  ;;  %v10076_v24 = vld [vmem:[#allocation9 + $0xb04] ss:$16 sps:$4 sm:$0xff]  }
 0x4f1   : > { %7474 = vmatpush1.bf16.msra.mxu1 %v9999_v25  ;;  %7346 = vmatprep.subr.bf16.mxu0 %v10004_v26  ;;  %v6597_v25 = vrot.slane %v6436_v17, 1  ;;  %v10079_v26 = vld [vmem:[#allocation9 + $0xb0c] ss:$16 sps:$4 sm:$0xff]   ;;  %v10134_v17 = vld [vmem:[#allocation9 + $0xc40] ss:$16 sps:$4 sm:$0xff]  }
 0x4f2   : > { %7475 = vmatprep.subr.bf16.mxu1 %v10007_v27  ;;  %v10200_v27 = vld [vmem:[#allocation2 + $0x40] sm:$0xff] }
 0x4f4   : > { %7347 = vmatpush1.bf16.msra.mxu0 %v10002_v28  ;;  %v6434_v28 = vpack.c.bf16 %v10200_v27, %v6424_v21  ;;  %v10142_v21 = vld [vmem:[#allocation9 + $0xc64] ss:$16 sps:$4 sm:$0xff]   ;;  %v10157_v27 = vld [vmem:[#allocation9 + $0xcac] ss:$16 sps:$4 sm:$0xff]  }
 0x4f5   : > { %7476 = vmatpush1.bf16.msra.mxu1 %v10005_v31  ;;  %7348 = vmatprep.subr.bf16.mxu0 %v10010_v29  ;;  %v6596_v31 = vrot.slane %v6431_v23, 1  ;;  %v10074_v29 = vld [vmem:[#allocation9 + $0xb00] ss:$16 sps:$4 sm:$0xff]   ;;  %v10143_v23 = vld [vmem:[#allocation9 + $0xc68] ss:$16 sps:$4 sm:$0xff]  }
 0x4f6   : > { %7477 = vmatprep.subr.bf16.mxu1 %v10013_v30  ;;  %v6606_v30 = vrot.slane %v6439_v1, 1  ;;  %v10148_v1 = vld [vmem:[#allocation9 + $0xc84] ss:$16 sps:$4 sm:$0xff]  }
 0x4f8   : > { %7349 = vmatpush1.bf16.msra.mxu0 %v10008_v32  ;;  %v10077_v32 = vld [vmem:[#allocation9 + $0xb08] ss:$16 sps:$4 sm:$0xff]  }
 0x4f9   : > { %7478 = vmatpush1.bf16.msra.mxu1 %v10011_v33  ;;  %7350 = vmatprep.subr.bf16.mxu0 %v10016_v34  ;;  %v6598_v33 = vsel %vm2941_vm13, %v6596_v31, %v6597_v25  ;;  %v6605_v34 = vrot.slane %v6434_v28, 1  ;;  %v10149_v25 = vld [vmem:[#allocation9 + $0xc88] ss:$16 sps:$4 sm:$0xff]   ;;  %v10152_v28 = vld [vmem:[#allocation9 + $0xca0] ss:$16 sps:$4 sm:$0xff]  }
 0x4fa   : > { %7479 = vmatprep.subr.bf16.mxu1 %v10019_v35  ;;  %v10082_v35 = vld [vmem:[#allocation9 + $0xb24] ss:$16 sps:$4 sm:$0xff]   ;;  %v10155_v31 = vld [vmem:[#allocation9 + $0xca8] ss:$16 sps:$4 sm:$0xff]  }
 0x4fc   : > { %7351 = vmatpush1.bf16.msra.mxu0 %v10014_v36  ;;  %v10085_v36 = vld [vmem:[#allocation9 + $0xb2c] ss:$16 sps:$4 sm:$0xff]  }
 0x4fd   : > { %7480 = vmatpush1.bf16.msra.mxu1 %v10017_v38  ;;  %7352 = vmatprep.subr.bf16.mxu0 %v10022_v40  ;;  %v6607_v38 = vsel %vm2941_vm13, %v6605_v34, %v6606_v30  ;;  %v10080_v40 = vld [vmem:[#allocation9 + $0xb20] ss:$16 sps:$4 sm:$0xff]   ;;  %v10163_v30 = vld [vmem:[#allocation9 + $0xccc] ss:$16 sps:$4 sm:$0xff]   ;;  %v10161_v34 = vld [vmem:[#allocation9 + $0xcc8] ss:$16 sps:$4 sm:$0xff]  }
 0x4fe   : > { %7481 = vmatprep.subr.bf16.mxu1 %v10025_v41  ;;  %v10083_v41 = vld [vmem:[#allocation9 + $0xb28] ss:$16 sps:$4 sm:$0xff]  }
 0x500   : > { %7353 = vmatpush1.bf16.msra.mxu0 %v10020_v42  ;;  %v10088_v42 = vld [vmem:[#allocation9 + $0xb44] ss:$16 sps:$4 sm:$0xff]  }
 0x501   : > { %7482 = vmatpush1.bf16.msra.mxu1 %v10023_v43  ;;  %7354 = vmatprep.subr.bf16.mxu0 %v10028_v39  ;;  %v10091_v43 = vld [vmem:[#allocation9 + $0xb4c] ss:$16 sps:$4 sm:$0xff]   ;;  %v10086_v39 = vld [vmem:[#allocation9 + $0xb40] ss:$16 sps:$4 sm:$0xff]  }
 0x502   : > { %7483 = vmatprep.subr.bf16.mxu1 %v10031_v44  ;;  %v10089_v44 = vld [vmem:[#allocation9 + $0xb48] ss:$16 sps:$4 sm:$0xff]  }
 0x504   : > { %7355 = vmatpush1.bf16.msra.mxu0 %v10026_v45  ;;  %v10094_v45 = vld [vmem:[#allocation9 + $0xb64] ss:$16 sps:$4 sm:$0xff]  }
 0x505   : > { %7484 = vmatpush1.bf16.msra.mxu1 %v10029_v53  ;;  %7356 = vmatprep.subr.bf16.mxu0 %v10034_v46  ;;  %v10097_v53 = vld [vmem:[#allocation9 + $0xb6c] ss:$16 sps:$4 sm:$0xff]   ;;  %v10092_v46 = vld [vmem:[#allocation9 + $0xb60] ss:$16 sps:$4 sm:$0xff]  }
 0x506   : > { %7485 = vmatprep.subr.bf16.mxu1 %v10037_v49  ;;  %v10095_v49 = vld [vmem:[#allocation9 + $0xb68] ss:$16 sps:$4 sm:$0xff]  }
 0x508   : > { %7357 = vmatpush1.bf16.msra.mxu0 %v10032_v50  ;;  %v10100_v50 = vld [vmem:[#allocation9 + $0xb84] ss:$16 sps:$4 sm:$0xff]  }
 0x509   : > { %7486 = vmatpush1.bf16.msra.mxu1 %v10035_v52  ;;  %7358 = vmatprep.subr.bf16.mxu0 %v10040_v54  ;;  %v10103_v52 = vld [vmem:[#allocation9 + $0xb8c] ss:$16 sps:$4 sm:$0xff]   ;;  %v10098_v54 = vld [vmem:[#allocation9 + $0xb80] ss:$16 sps:$4 sm:$0xff]  }
 0x50a   : > { %7487 = vmatprep.subr.bf16.mxu1 %v10043_v55  ;;  %v10101_v55 = vld [vmem:[#allocation9 + $0xb88] ss:$16 sps:$4 sm:$0xff]  }
 0x50c   : > { %7359 = vmatpush1.bf16.msra.mxu0 %v10038_v51  ;;  %v10106_v51 = vld [vmem:[#allocation9 + $0xba4] ss:$16 sps:$4 sm:$0xff]  }
 0x50d   : > { %7488 = vmatpush1.bf16.msra.mxu1 %v10041_v57  ;;  %7360 = vmatprep.subr.bf16.mxu0 %v10046_v58  ;;  %v10109_v57 = vld [vmem:[#allocation9 + $0xbac] ss:$16 sps:$4 sm:$0xff]   ;;  %v10104_v58 = vld [vmem:[#allocation9 + $0xba0] ss:$16 sps:$4 sm:$0xff]  }
 0x50e   : > { %7489 = vmatprep.subr.bf16.mxu1 %v10049_v59  ;;  %v10107_v59 = vld [vmem:[#allocation9 + $0xba8] ss:$16 sps:$4 sm:$0xff]  }
 0x510   : > { %7361 = vmatpush1.bf16.msra.mxu0 %v10044_v60  ;;  %v10112_v60 = vld [vmem:[#allocation9 + $0xbc4] ss:$16 sps:$4 sm:$0xff]  }
 0x511   : > { %7490 = vmatpush1.bf16.msra.mxu1 %v10047_v61  ;;  %7362 = vmatprep.subr.bf16.mxu0 %v10052_v62  ;;  %v10115_v61 = vld [vmem:[#allocation9 + $0xbcc] ss:$16 sps:$4 sm:$0xff]   ;;  %v10110_v62 = vld [vmem:[#allocation9 + $0xbc0] ss:$16 sps:$4 sm:$0xff]  }
 0x512   : > { %7491 = vmatprep.subr.bf16.mxu1 %v10055_v63  ;;  %v10113_v63 = vld [vmem:[#allocation9 + $0xbc8] ss:$16 sps:$4 sm:$0xff]  }
 0x514   : > { %7363 = vmatpush1.bf16.msra.mxu0 %v10050_v2  ;;  %v10118_v2 = vld [vmem:[#allocation9 + $0xbe4] ss:$16 sps:$4 sm:$0xff]  }
 0x515   : > { %7492 = vmatpush1.bf16.msra.mxu1 %v10053_v3  ;;  %7364 = vmatprep.subr.bf16.mxu0 %v10058_v4  ;;  %v10121_v3 = vld [vmem:[#allocation9 + $0xbec] ss:$16 sps:$4 sm:$0xff]   ;;  %v10116_v4 = vld [vmem:[#allocation9 + $0xbe0] ss:$16 sps:$4 sm:$0xff]  }
 0x516   : > { %7493 = vmatprep.subr.bf16.mxu1 %v10061_v5  ;;  %v10119_v5 = vld [vmem:[#allocation9 + $0xbe8] ss:$16 sps:$4 sm:$0xff]  }
 0x518   : > { %7365 = vmatpush1.bf16.msra.mxu0 %v10056_v6  ;;  %v10124_v6 = vld [vmem:[#allocation9 + $0xc04] ss:$16 sps:$4 sm:$0xff]  }
 0x519   : > { %7494 = vmatpush1.bf16.msra.mxu1 %v10059_v7  ;;  %7366 = vmatprep.subr.bf16.mxu0 %v10064_v8  ;;  %v10127_v7 = vld [vmem:[#allocation9 + $0xc0c] ss:$16 sps:$4 sm:$0xff]   ;;  %v10122_v8 = vld [vmem:[#allocation9 + $0xc00] ss:$16 sps:$4 sm:$0xff]  }
 0x51a   : > { %7495 = vmatprep.subr.bf16.mxu1 %v10067_v9  ;;  %v10125_v9 = vld [vmem:[#allocation9 + $0xc08] ss:$16 sps:$4 sm:$0xff]  }
 0x51c   : > { %7367 = vmatpush1.bf16.msra.mxu0 %v10062_v10  ;;  %v10133_v10 = vld [vmem:[#allocation9 + $0xc2c] ss:$16 sps:$4 sm:$0xff]  }
 0x51d   : > { %7496 = vmatpush1.bf16.msra.mxu1 %v10065_v11  ;;  %7368 = vmatprep.subr.bf16.mxu0 %v10070_v12  ;;  %v10128_v11 = vld [vmem:[#allocation9 + $0xc20] ss:$16 sps:$4 sm:$0xff]   ;;  %v10131_v12 = vld [vmem:[#allocation9 + $0xc28] ss:$16 sps:$4 sm:$0xff]  }
 0x51e   : > { %7497 = vmatprep.subr.bf16.mxu1 %v10073_v14  ;;  %v10139_v14 = vld [vmem:[#allocation9 + $0xc4c] ss:$16 sps:$4 sm:$0xff]  }
 0x520   : > { %7369 = vmatpush1.bf16.msra.mxu0 %v10068_v37  ;;  %v10145_v37 = vld [vmem:[#allocation9 + $0xc6c] ss:$16 sps:$4 sm:$0xff]  }
 0x521   : > { %7498 = vmatpush1.bf16.msra.mxu1 %v10071_v0  ;;  %7381 = vmatprep.subr.bf16.mxu0 %v10076_v24  ;;  %v10151_v0 = vld [vmem:[#allocation9 + $0xc8c] ss:$16 sps:$4 sm:$0xff]   ;;  %v10146_v24 = vld [vmem:[#allocation9 + $0xc80] ss:$16 sps:$4 sm:$0xff]  }
 0x522   : > { %7510 = vmatprep.subr.bf16.mxu1 %v10079_v26  ;;  %v10154_v26 = vld [vmem:[#allocation9 + $0xca4] ss:$16 sps:$4 sm:$0xff]  }
 0x523   : > { %7371 = vmatmul.mubr.bf16.vlgmr.msra.gmra.mrb[4].mxu0 %v6598_v33 }
 0x524   : > { %7500 = vmatmul.mubr.bf16.vlgmr.msra.gmra.mrb[4].mxu1 %v6598_v33  ;;  %7382 = vmatpush1.bf16.msra.mxu0 %v10074_v29  ;;  %v10160_v29 = vld [vmem:[#allocation9 + $0xcc4] ss:$16 sps:$4 sm:$0xff]   ;;  %v10158_v33 = vld [vmem:[#allocation9 + $0xcc0] ss:$16 sps:$4 sm:$0xff]  }
 0x525   : > { %7413 = vmatprep.mubr.bf16.mxu0 %v6607_v38  ;;  %7511 = vmatpush1.bf16.msra.mxu1 %v10077_v32  ;;  %v6428_v32 = vld [vmem:[#allocation2 + $0x60] sm:$0x3] }
 0x526   : > { %7542 = vmatprep.mubr.bf16.mxu1 %v6607_v38  ;;  %7383 = vmatprep.subr.bf16.mxu0 %v10082_v35  ;;  %v10166_v35 = vld [vmem:[#allocation9 + $0xce4] ss:$16 sps:$4 sm:$0xff]   ;;  %v10169_v38 = vld [vmem:[#allocation9 + $0xcec] ss:$16 sps:$4 sm:$0xff]  }
 0x527   : > { %7512 = vmatprep.subr.bf16.mxu1 %v10085_v36  ;;  %v6423_v36 = vld [vmem:[#allocation2 + $0x10] sm:$0xfc] }
 0x528   : > { %7384 = vmatpush1.bf16.msra.mxu0 %v10080_v40  ;;  %v6438_v40 = vpack.c.bf16 %v6428_v32, %v6428_v32  ;;  %v10206_v32 = vld [vmem:[%s10689_s28 + $0x18] sm:$0xff] }
 0x529   : > { %7513 = vmatpush1.bf16.msra.mxu1 %v10083_v41  ;;  %7385 = vmatprep.subr.bf16.mxu0 %v10088_v42  ;;  %v10164_v41 = vld [vmem:[#allocation9 + $0xce0] ss:$16 sps:$4 sm:$0xff]  }
 0x52a   : > { %7514 = vmatprep.subr.bf16.mxu1 %v10091_v43  ;;  %v10201_v42 = vld [vmem:[#allocation2 + $0x38] sm:$0xff] }
 0x52b   : > { %v6433_v43 = vpack.c.bf16 %v10201_v42, %v6423_v36 }
 0x52c   : > { %7386 = vmatpush1.bf16.msra.mxu0 %v10086_v39  ;;  %v10167_v39 = vld [vmem:[#allocation9 + $0xce8] ss:$16 sps:$4 sm:$0xff]  }
 0x52d   : > { %7515 = vmatpush1.bf16.msra.mxu1 %v10089_v44  ;;  %7387 = vmatprep.subr.bf16.mxu0 %v10094_v45  ;;  %v10172_v44 = vld [vmem:[#allocation9 + $0xd04] ss:$16 sps:$4 sm:$0xff]   ;;  %v6603_v45 = vrot.slane %v6438_v40, 1 }
 0x52e   : > { %7516 = vmatprep.subr.bf16.mxu1 %v10097_v53  ;;  %v10175_v53 = vld [vmem:[#allocation9 + $0xd0c] ss:$16 sps:$4 sm:$0xff]  }
 0x530   : > { %7388 = vmatpush1.bf16.msra.mxu0 %v10092_v46  ;;  %v6602_v46 = vrot.slane %v6433_v43, 1  ;;  %v10210_v43 = vld [vmem:[%s10689_s28 + $0x38] sm:$0xff] }
 0x531   : > { %7517 = vmatpush1.bf16.msra.mxu1 %v10095_v49  ;;  %7389 = vmatprep.subr.bf16.mxu0 %v10100_v50  ;;  %v10170_v49 = vld [vmem:[#allocation9 + $0xd00] ss:$16 sps:$4 sm:$0xff]   ;;  %v10173_v50 = vld [vmem:[#allocation9 + $0xd08] ss:$16 sps:$4 sm:$0xff]  }
 0x532   : > { %7518 = vmatprep.subr.bf16.mxu1 %v10103_v52  ;;  %v10178_v52 = vld [vmem:[#allocation9 + $0xd24] ss:$16 sps:$4 sm:$0xff]  }
 0x534   : > { %7390 = vmatpush1.bf16.msra.mxu0 %v10098_v54  ;;  %v6604_v54 = vsel %vm2941_vm13, %v6602_v46, %v6603_v45 }
 0x535   : > { %7519 = vmatpush1.bf16.msra.mxu1 %v10101_v55  ;;  %7391 = vmatprep.subr.bf16.mxu0 %v10106_v51  ;;  %v10181_v55 = vld [vmem:[#allocation9 + $0xd2c] ss:$16 sps:$4 sm:$0xff]   ;;  %v10176_v51 = vld [vmem:[#allocation9 + $0xd20] ss:$16 sps:$4 sm:$0xff]  }
 0x536   : > { %7520 = vmatprep.subr.bf16.mxu1 %v10109_v57  ;;  %v10179_v57 = vld [vmem:[#allocation9 + $0xd28] ss:$16 sps:$4 sm:$0xff]  }
 0x538   : > { %7392 = vmatpush1.bf16.msra.mxu0 %v10104_v58  ;;  %v10184_v58 = vld [vmem:[#allocation9 + $0xd44] ss:$16 sps:$4 sm:$0xff]  }
 0x539   : > { %7521 = vmatpush1.bf16.msra.mxu1 %v10107_v59  ;;  %7393 = vmatprep.subr.bf16.mxu0 %v10112_v60  ;;  %v10187_v59 = vld [vmem:[#allocation9 + $0xd4c] ss:$16 sps:$4 sm:$0xff]   ;;  %v6430_v60 = vld [vmem:[#allocation2 + $0x70] sm:$0x3] }
 0x53a   : > { %7522 = vmatprep.subr.bf16.mxu1 %v10115_v61  ;;  %v10182_v61 = vld [vmem:[#allocation9 + $0xd40] ss:$16 sps:$4 sm:$0xff]  }
 0x53c   : > { %7394 = vmatpush1.bf16.msra.mxu0 %v10110_v62  ;;  %v10185_v62 = vld [vmem:[#allocation9 + $0xd48] ss:$16 sps:$4 sm:$0xff]  }
 0x53d   : > { %7523 = vmatpush1.bf16.msra.mxu1 %v10113_v63  ;;  %7395 = vmatprep.subr.bf16.mxu0 %v10118_v2  ;;  %v10190_v63 = vld [vmem:[#allocation9 + $0xd64] ss:$16 sps:$4 sm:$0xff]   ;;  %v10193_v2 = vld [vmem:[#allocation9 + $0xd6c] ss:$16 sps:$4 sm:$0xff]  }
 0x53e   : > { %7524 = vmatprep.subr.bf16.mxu1 %v10121_v3  ;;  %v6440_v3 = vpack.c.bf16 %v6430_v60, %v6430_v60 }
 0x540   : > { %7396 = vmatpush1.bf16.msra.mxu0 %v10116_v4  ;;  %v6425_v4 = vld [vmem:[#allocation2 + $0x20] sm:$0xfc] }
 0x541   : > { %7525 = vmatpush1.bf16.msra.mxu1 %v10119_v5  ;;  %7397 = vmatprep.subr.bf16.mxu0 %v10124_v6  ;;  %v10188_v5 = vld [vmem:[#allocation9 + $0xd60] ss:$16 sps:$4 sm:$0xff]  }
 0x542   : > { %7526 = vmatprep.subr.bf16.mxu1 %v10127_v7  ;;  %v10202_v6 = vld [vmem:[#allocation2 + $0x48] sm:$0xff] }
 0x543   : > { %v6435_v7 = vpack.c.bf16 %v10202_v6, %v6425_v4 }
 0x544   : > { %7398 = vmatpush1.bf16.msra.mxu0 %v10122_v8  ;;  %v10191_v8 = vld [vmem:[#allocation9 + $0xd68] ss:$16 sps:$4 sm:$0xff]  }
 0x545   : > { %7527 = vmatpush1.bf16.msra.mxu1 %v10125_v9  ;;  %7399 = vmatprep.subr.bf16.mxu0 %v10130_v56  ;;  %v6608_v9 = vrot.slane %v6435_v7, 1 }
 0x546   : > { %7528 = vmatprep.subr.bf16.mxu1 %v10133_v10  ;;  %v7604_v10 = vld [vmem:[#allocation11] sm:$0xf] }
 0x548   : > { %7400 = vmatpush1.bf16.msra.mxu0 %v10128_v11  ;;  %v7609_v11 = vrot.slane %v7604_v10, %v3954_v16  ;;  %v10203_v16 = vld [vmem:[%s10689_s28] sm:$0xff] }
 0x549   : > { %7529 = vmatpush1.bf16.msra.mxu1 %v10131_v12  ;;  %7401 = vmatprep.subr.bf16.mxu0 %v10136_v13  ;;  %v7617_v12 = vrot.slane %v7604_v10, %v3962_v18  ;;  %v7613_v13 = vrot.slane %v7604_v10, %v3958_v47 }
 0x54a   : > { %7530 = vmatprep.subr.bf16.mxu1 %v10139_v14  ;;  %v7621_v14 = vrot.slane %v7604_v10, %v3966_v19 }
 0x54c   : > { %7402 = vmatpush1.bf16.msra.mxu0 %v10134_v17 }
 0x54d   : > { %7531 = vmatpush1.bf16.msra.mxu1 %v10137_v20  ;;  %7403 = vmatprep.subr.bf16.mxu0 %v10142_v21 }
 0x54e   : > { %7532 = vmatprep.subr.bf16.mxu1 %v10145_v37 }
 0x550   : > { %7404 = vmatpush1.bf16.msra.mxu0 %v10140_v22 }
 0x551   : > { %7533 = vmatpush1.bf16.msra.mxu1 %v10143_v23  ;;  %7405 = vmatprep.subr.bf16.mxu0 %v10148_v1 }
 0x552   : > { %7534 = vmatprep.subr.bf16.mxu1 %v10151_v0 }
 0x554   : > { %7406 = vmatpush1.bf16.msra.mxu0 %v10146_v24 }
 0x555   : > { %7535 = vmatpush1.bf16.msra.mxu1 %v10149_v25  ;;  %7407 = vmatprep.subr.bf16.mxu0 %v10154_v26  ;;  %v10204_v25 = vld [vmem:[%s10689_s28 + $0x10] sm:$0xff] }
 0x556   : > { %7536 = vmatprep.subr.bf16.mxu1 %v10157_v27  ;;  %v10205_v27 = vld [vmem:[%s10689_s28 + $0x8] sm:$0xff] }
 0x558   : > { %7408 = vmatpush1.bf16.msra.mxu0 %v10152_v28 }
 0x559   : > { %7537 = vmatpush1.bf16.msra.mxu1 %v10155_v31  ;;  %7409 = vmatprep.subr.bf16.mxu0 %v10160_v29 }
 0x55a   : > { %7538 = vmatprep.subr.bf16.mxu1 %v10163_v30 }
 0x55c   : > { %7410 = vmatpush1.bf16.msra.mxu0 %v10158_v33 }
 0x55d   : > { %7539 = vmatpush1.bf16.msra.mxu1 %v10161_v34  ;;  %7411 = vmatprep.subr.bf16.mxu0 %v10166_v35  ;;  %v10207_v34 = vld [vmem:[%s10689_s28 + $0x20] sm:$0xff] }
 0x55e   : > { %7540 = vmatprep.subr.bf16.mxu1 %v10169_v38  ;;  %v10208_v38 = vld [vmem:[%s10689_s28 + $0x30] sm:$0xff] }
 0x560   : > { %7412 = vmatpush1.bf16.msra.mxu0 %v10164_v41  ;;  %v10209_v41 = vld [vmem:[%s10689_s28 + $0x28] sm:$0xff] }
 0x561   : > { %7541 = vmatpush1.bf16.msra.mxu1 %v10167_v39  ;;  %7424 = vmatprep.subr.bf16.mxu0 %v10172_v44 }
 0x562   : > { %7553 = vmatprep.subr.bf16.mxu1 %v10175_v53 }
 0x563   : > { %7414 = vmatmul.mubr.bf16.vlgmr.msra.gmra.mrb[4].mxu0 %v6604_v54 }
 0x564   : > { %7543 = vmatmul.mubr.bf16.vlgmr.msra.gmra.mrb[4].mxu1 %v6604_v54  ;;  %7425 = vmatpush1.bf16.msra.mxu0 %v10170_v49 }
 0x565   : > { %7554 = vmatpush1.bf16.msra.mxu1 %v10173_v50  ;;  %7426 = vmatprep.subr.bf16.mxu0 %v10178_v52 }
 0x566   : > { %7555 = vmatprep.subr.bf16.mxu1 %v10181_v55  ;;  %7456 = vmatprep.mubr.bf16.mxu0 %v10440_v48 }
 0x567   : > { %7585 = vmatprep.mubr.bf16.mxu1 %v10440_v48  ;;  %v6609_v48 = vrot.slane %v6440_v3, 1 }
 0x568   : > { %7427 = vmatpush1.bf16.msra.mxu0 %v10176_v51 }
 0x569   : > { %7556 = vmatpush1.bf16.msra.mxu1 %v10179_v57  ;;  %7428 = vmatprep.subr.bf16.mxu0 %v10184_v58  ;;  %v6610_v56 = vsel %vm2941_vm13, %v6608_v9, %v6609_v48 }
 0x56a   : > { %7557 = vmatprep.subr.bf16.mxu1 %v10187_v59 }
 0x56c   : > { %7429 = vmatpush1.bf16.msra.mxu0 %v10182_v61 }
 0x56d   : > { %7558 = vmatpush1.bf16.msra.mxu1 %v10185_v62  ;;  %7430 = vmatprep.subr.bf16.mxu0 %v10190_v63 }
 0x56e   : > { %7559 = vmatprep.subr.bf16.mxu1 %v10193_v2 }
 0x570   : > { %7431 = vmatpush1.bf16.msra.mxu0 %v10188_v5 }
 0x571   : > { %7560 = vmatpush1.bf16.msra.mxu1 %v10191_v8 }
 0x573   : > { %8666 = vmatmul.mubr.msk.bf16.vlgmr.msra.gmra.mrb[4].mxu0 %vm1523_vm12, %v6610_v56 }
 0x574   : > { %8667 = vmatmul.mubr.msk.bf16.vlgmr.msra.gmra.mrb[4].mxu1 %vm1523_vm12, %v6610_v56 }
 0x646   : > { %v7458_v17 = vpop.f32.mrb[4].mxu0 }
 0x647   : > { %v7626_v20 = vadd.f32 %v7609_v11, %v7458_v17  ;;  %v7587_v21 = vpop.f32.mrb[4].mxu1  ;;  %v7460_v37 = vpop.f32.mrb[5].mxu0 }
 0x648   : > { %v7628_v22 = vadd.f32 %v7617_v12, %v7587_v21  ;;  %v7627_v23 = vadd.f32 %v7613_v13, %v7460_v37  ;;  %v7589_v1 = vpop.f32.mrb[5].mxu1  ;;  %v7462_v0 = vpop.f32.mrb[6].mxu0 }
 0x649   : > { %v7634_v24 = vadd.f32 %v10203_v16, %v7626_v20  ;;  %v7629_v15 = vadd.f32 %v7621_v14, %v7589_v1  ;;  %v7630_v18 = vadd.f32 %v7609_v11, %v7462_v0  ;;  %v7591_v47 = vpop.f32.mrb[6].mxu1  ;;  %v7464_v19 = vpop.f32.mrb[7].mxu0 }
 0x64a   : > { %v7636_v26 = vadd.f32 %v10204_v25, %v7628_v22  ;;  %v7635_v28 = vadd.f32 %v10205_v27, %v7627_v23  ;;  %v7632_v31 = vadd.f32 %v7617_v12, %v7591_v47  ;;  %v7631_v29 = vadd.f32 %v7613_v13, %v7464_v19  ;;  %v7593_v30 = vpop.f32.mrb[7].mxu1 }
 0x64b   : > { %7642 = vst [vmem:[%s10894_s26] sm:$0xff] %v7634_v24  ;;  %v7637_v33 = vadd.f32 %v10206_v32, %v7629_v15  ;;  %v7638_v35 = vadd.f32 %v10207_v34, %v7630_v18  ;;  %v7633_v36 = vadd.f32 %v7621_v14, %v7593_v30 }
 0x64c   : > { %7644 = vst [vmem:[%s10894_s26 + $0x10] sm:$0xff] %v7636_v26  ;;  %7643 = vst [vmem:[%s10894_s26 + $0x8] sm:$0xff] %v7635_v28  ;;  %v7640_v40 = vadd.f32 %v10208_v38, %v7632_v31  ;;  %v7639_v42 = vadd.f32 %v10209_v41, %v7631_v29 }
 0x64d   : > { %7645 = vst [vmem:[%s10894_s26 + $0x18] sm:$0xff] %v7637_v33  ;;  %7646 = vst [vmem:[%s10894_s26 + $0x20] sm:$0xff] %v7638_v35  ;;  %v7641_v39 = vadd.f32 %v10210_v43, %v7633_v36 }
 0x64e   : > { %7648 = vst [vmem:[%s10894_s26 + $0x30] sm:$0xff] %v7640_v40  ;;  %7647 = vst [vmem:[%s10894_s26 + $0x28] sm:$0xff] %v7639_v42 }
 0x64f   : > { %7649 = vst [vmem:[%s10894_s26 + $0x38] sm:$0xff] %v7641_v39 }
 0x650   : > { %10366 = shalt.err (!%p10363_p12)
}
 0x651   : > { %s10367_s15 = scalar_lea.hbm %s10915_s8, 1024  ;;  %s10371_s28 = scalar_lea.hbm %s10967_s5, 8192 }
 0x652   : > { %p10368_p9 = scmp.ne.s32.totalorder %s10915_s8, %s10367_s15  ;;  %p10372_p6 = scmp.lt.u32.totalorder %s10915_s8, %s10967_s5 }
 0x653   : > { %p10373_p4 = scmp.lt.u32.totalorder %s10371_s28, %s10367_s15  ;;  %p10375_p3 = scmp.lt.u32.totalorder %s10367_s15, %s10915_s8 }
 0x654   : > { %p10369_p13 = pnand %p10368_p9, %p10631_p0 }
 0x655   : > { %p10374_p8 = por %p10373_p4, %p10372_p6 }
 0x656   : > { %p10370_p10 = pneg %p10369_p13 }
 0x657   : > { %p10376_p5 = por %p10375_p3, %p10374_p8 }
 0x659   : > { %p10377_p7 = pnand %p10376_p5, %p10370_p10 }
 0x65b   : > { %10380 = shalt.err (!%p10377_p7)
}
 0x65c   : > { %s10442_s22 = smov 512  }
 0x65d   : > { %8821 = dma.vmem_to_hbm [thread:$0]  (%p10631_p0), %s10903_s9, 1024, %s10915_s8, %s7651_s27, %s10442_s22, %s10442_s22, %s10439_s24  }
 0x65e PF: > { %p8853_p11 = scmp.ge.s32.totalorder %s10427_s21, 2  ;;  %s7679_s12 = sand.u32 1, %s10415_s18  }
 0x65f   : > { %p10985_p2 = scmp.ne.s32.totalorder %s10972_s25, 0  ;;  %s7680_s30 = scalar_lea.sflag [#allocation5], %s7679_s12 }
 0x661   : > { %p8841_p1 = pnand %p8853_p11, %p10985_p2 }
 0x663   : > { %10410 = dma.done.wait (!%p8841_p1), %s7680_s30, 1024  }
 0x664   : > { %10412 = vsyncadd (!%p8841_p1), %s7680_s30, 4294966272  ;;  %p20_p12 = scmp.ge.s32.totalorder %s10621_s14, 10   ;;  %s10986_s18 = smov %s10419_s19 }
 0x665   : > { %s10987_s19 = smov %s10423_s20  ;;  %s10988_s20 = smov %s10637_s23 }
 0x666   : > { %s10989_s21 = smov %s10621_s14  ;;  %22 = sbr.rel (!%p20_p12) target bundleno = 7 (0x7), region = 106 }
 0x66d   :  { %7685 = vsyncpa [#allocation4], 1 }
 0x66e   :  { %7687 = vsyncpa [#allocation4 + $0x1], 1 }
 0x66f   :  { %7688 = vsyncpa [#allocation7], 1 }
 0x670   :  { %7689 = vsyncpa [#allocation10], 1 }
 0x671   :  { %7690 = vsyncpa [#allocation5], 1 }
 0x672   :  { %7692 = vsyncpa [#allocation5 + $0x1], 1 }

</bundles_post_ra>
